<compile_context>
chip_gen: v7x
topology: tpu7x:2x2x1
jax: 0.10.0
libtpu: 0.0.40
codegen_flags: <defaults>
</compile_context>

<pallas_src>
import functools

import jax
import jax.numpy as jnp
from jax.experimental import pallas as pl
from jax.experimental.pallas import tpu as pltpu


# ----------------------------------------------------------------------------
# Fused kernel: all LSTM layers + final FC for one batch tile, VMEM-resident.
# ----------------------------------------------------------------------------
def _fused_lstm_fc_kernel(num_layers, x_ref, *refs):
    # refs = [W_ih_0, W_hh_0, b_0, ..., W_ih_{L-1}, W_hh_{L-1}, b_{L-1},
    #         W_fc, b_fc, out_ref, seq_scratch]
    layer_refs = refs[: 3 * num_layers]
    w_fc_ref, b_fc_ref, out_ref, seq_ref = refs[3 * num_layers:]

    B, T, I = x_ref.shape
    H = layer_refs[1].shape[0]          # W_hh_0 is (H, 4H)

    def mm(a, w_ref):
        # Operands pre-cast in the wrapper; cast only the f32 carry (h) here.
        w = w_ref[...]
        return jnp.dot(a.astype(w.dtype), w, preferred_element_type=jnp.float32)

    def cell(gates, c):
        # PyTorch gate order: i, f, g, o.
        # NOTE: at production sizes pick H % 128 == 0 so each gate slice is a
        # full lane tile (here H=32 -> lane sub-slices, negligible at toy size).
        i_g = jax.nn.sigmoid(gates[:, 0 * H:1 * H])
        f_g = jax.nn.sigmoid(gates[:, 1 * H:2 * H])
        g_g = jnp.tanh(gates[:, 2 * H:3 * H])
        o_g = jax.nn.sigmoid(gates[:, 3 * H:4 * H])
        c = f_g * c + i_g * g_g
        h = o_g * jnp.tanh(c)
        return h, c

    h = None
    for layer in range(num_layers):
        w_ih_ref = layer_refs[3 * layer]             # (in_sz, 4H)
        w_hh_ref = layer_refs[3 * layer + 1]         # (H, 4H)
        b = layer_refs[3 * layer + 2][...]           # (1, 4H) f32 == b_ih + b_hh

        # ---- hoisted input projection: ONE big matmul, off the serial chain.
        if layer == 0:
            # Contiguous flatten of the batch-first block (no slice+concat
            # relayout), then static middle-dim slices of the reshaped result.
            flat_in = x_ref[...].reshape(B * T, I)            # batch-major rows
            gx = (mm(flat_in, w_ih_ref) + b).reshape(B, T, 4 * H)
        else:
            # Time-major scratch from the previous layer: contiguous read.
            flat_in = seq_ref[...]                            # (T*B, H)
            gx = mm(flat_in, w_ih_ref) + b                    # (T*B, 4H)

        # ---- serial recurrence: only h_prev @ W_hh + gate math per step.
        # T is small and static -> unrolled at trace time (full LLO visibility).
        # For large T switch this to lax.fori_loop over the VMEM scratch.
        h = jnp.zeros((B, H), jnp.float32)
        c = jnp.zeros((B, H), jnp.float32)
        last_layer = layer == num_layers - 1
        for t in range(T):
            if layer == 0:
                g_in = gx[:, t, :]                            # static mid-dim slice
            else:
                g_in = gx[t * B:(t + 1) * B, :]               # contiguous time block
            # TODO(synk): for small B/H the per-step jnp.dot re-pushes W_hh to
            # the MXU; pltpu.matmul_push_rhs/acc_lhs could hold it resident.
            h, c = cell(g_in + mm(h, w_hh_ref), c)
            if not last_layer:
                # Scratch-backed write bounds live ranges (no list/concat).
                seq_ref[t * B:(t + 1) * B, :] = h

    # ---- fused FC on out[:, -1, :] of the top layer.  C is lane-padded to a
    # full 128-lane tile in the wrapper -> unmasked full-lane store.
    out_ref[...] = mm(h, w_fc_ref) + b_fc_ref[...]


# ----------------------------------------------------------------------------
# Wrapper: one pallas_call for the whole model (grid only over batch tiles).
# ----------------------------------------------------------------------------
def _round_up(x, m):
    return ((x + m - 1) // m) * m


def _vmem_budget(B_tile, T, input_size, H, num_layers, C_pad, mm_bytes):
    gate = 4 * H
    weights = 0
    for layer in range(num_layers):
        in_sz = input_size if layer == 0 else H
        weights += (in_sz + H) * gate * mm_bytes + gate * 4
    weights += H * C_pad * mm_bytes + C_pad * 4
    acts = (2 * B_tile * T * input_size * mm_bytes      # x block (double-buffered)
            + T * B_tile * H * 4                        # seq scratch
            + 2 * T * B_tile * gate * 4                 # gx + temporaries
            + 2 * B_tile * C_pad * 4)                   # out block (double-buffered)
    need = weights + acts
    # Headroom, floor at 8 MiB, cap below the v7x 64 MiB physical ceiling.
    return int(min(max(2 * need + (2 << 20), 8 << 20), 64 << 20))


@functools.partial(jax.jit, static_argnames=("num_layers", "matmul_dtype"))
def lstm_model_forward(x, params, num_layers, matmul_dtype=jnp.float32):
    """x: (B, T, input_size) batch-first (PyTorch layout). Returns (B, num_classes).

    matmul_dtype=jnp.bfloat16 halves resident weight VMEM and hits the fast
    MXU path on v6e/v7x; state/gate math stays f32 (parity test uses f32)."""
    B, T, I = x.shape
    w_fc, b_fc = params["fc"]
    H = params["lstm_0"][1].shape[0]
    C = w_fc.shape[1]

    mm_dt = jnp.dtype(matmul_dtype)
    sublane = 8 if mm_dt.itemsize == 4 else 16          # bf16 packs 16 rows/vreg

    # Batch padding / tiling: keep tiles sublane-aligned; >128 rows split into
    # 128-row tiles over a "parallel" grid axis (fills both TCs on v7x).
    B_pad = _round_up(B, sublane)
    if B_pad > 128:
        B_pad = _round_up(B_pad, 128)
        B_tile = 128
    else:
        B_tile = B_pad
    n_tiles = B_pad // B_tile
    if B_pad != B:
        x = jnp.pad(x, ((0, B_pad - B), (0, 0), (0, 0)))

    # Lane-pad the classifier to a full 128-lane tile; sliced back below.
    C_pad = _round_up(max(C, 1), 128)
    w_fc_p = jnp.zeros((H, C_pad), w_fc.dtype).at[:, :C].set(w_fc)
    b_fc_p = jnp.zeros((1, C_pad), jnp.float32).at[:, :C].set(b_fc)

    # Pre-cast matmul operands ONCE here (no per-call casts inside the kernel).
    x = x.astype(mm_dt)
    flat_weights = []
    for layer in range(num_layers):
        w_ih, w_hh, b = params[f"lstm_{layer}"]
        flat_weights.extend([w_ih.astype(mm_dt), w_hh.astype(mm_dt), b])
    flat_weights.extend([w_fc_p.astype(mm_dt), b_fc_p])

    def full_spec(arr):
        # Whole array resident, same block for every grid step.
        return pl.BlockSpec(arr.shape, lambda i, nd=arr.ndim: (0,) * nd)

    in_specs = [pl.BlockSpec((B_tile, T, I), lambda i: (i, 0, 0))]
    in_specs += [full_spec(w) for w in flat_weights]
    out_spec = pl.BlockSpec((B_tile, C_pad), lambda i: (i, 0))

    vmem_bytes = _vmem_budget(B_tile, T, I, H, num_layers, C_pad, mm_dt.itemsize)

    out = pl.pallas_call(
        functools.partial(_fused_lstm_fc_kernel, num_layers),
        out_shape=jax.ShapeDtypeStruct((B_pad, C_pad), jnp.float32),
        grid_spec=pltpu.PrefetchScalarGridSpec(
            num_scalar_prefetch=0,
            grid=(n_tiles,),
            in_specs=in_specs,
            out_specs=out_spec,
            scratch_shapes=[pltpu.VMEM((T * B_tile, H), jnp.float32)],
        ),
        compiler_params=pltpu.CompilerParams(
            dimension_semantics=("parallel",),
            vmem_limit_bytes=vmem_bytes,
        ),
    )(x, *flat_weights)
    return out[:B, :C]


# ----------------------------------------------------------------------------
# Parameter init (PyTorch-style shapes/init; weights stored transposed so the
# kernel computes x @ W; b = b_ih + b_hh pre-summed).
# ----------------------------------------------------------------------------
def init_params(key, input_size, hidden_size, num_layers, num_classes):
    params = {}
    k = 1.0 / jnp.sqrt(jnp.float32(hidden_size))
    for layer in range(num_layers):
        in_sz = input_size if layer == 0 else hidden_size
        key, k1, k2, k3, k4 = jax.random.split(key, 5)
        w_ih = jax.random.uniform(k1, (in_sz, 4 * hidden_size), jnp.float32, -k, k)
        w_hh = jax.random.uniform(k2, (hidden_size, 4 * hidden_size), jnp.float32, -k, k)
        b_ih = jax.random.uniform(k3, (4 * hidden_size,), jnp.float32, -k, k)
        b_hh = jax.random.uniform(k4, (4 * hidden_size,), jnp.float32, -k, k)
        params[f"lstm_{layer}"] = (w_ih, w_hh, (b_ih + b_hh)[None, :])
    key, k1, k2 = jax.random.split(key, 3)
    w_fc = jax.random.uniform(k1, (hidden_size, num_classes), jnp.float32, -k, k)
    b_fc = jax.random.uniform(k2, (1, num_classes), jnp.float32, -k, k)
    params["fc"] = (w_fc, b_fc)
    return params


# Pure-JAX reference (same math) for the correctness check.
def _reference_forward(x, params, num_layers):
    B, T, _ = x.shape
    seq = x
    for layer in range(num_layers):
        w_ih, w_hh, b = params[f"lstm_{layer}"]
        H = w_hh.shape[0]
        h = jnp.zeros((B, H), jnp.float32)
        c = jnp.zeros((B, H), jnp.float32)
        outs = []
        for t in range(T):
            g = seq[:, t, :] @ w_ih + h @ w_hh + b
            i_g = jax.nn.sigmoid(g[:, 0 * H:1 * H])
            f_g = jax.nn.sigmoid(g[:, 1 * H:2 * H])
            g_g = jnp.tanh(g[:, 2 * H:3 * H])
            o_g = jax.nn.sigmoid(g[:, 3 * H:4 * H])
            c = f_g * c + i_g * g_g
            h = o_g * jnp.tanh(c)
            outs.append(h)
        seq = jnp.stack(outs, axis=1)
    w_fc, b_fc = params["fc"]
    return seq[:, -1, :] @ w_fc + b_fc


if __name__ == "__main__":
    # Small deterministic example consistent with the module's forward:
    # x: (batch=4, seq=8, input_size=16), hidden=32, num_layers=2, classes=5
    B, T, INPUT, HIDDEN, LAYERS, CLASSES = 4, 8, 16, 32, 2, 5

    key = jax.random.PRNGKey(0)
    key, xkey = jax.random.split(key)
    x = jax.random.normal(xkey, (B, T, INPUT), dtype=jnp.float32)
    params = init_params(key, INPUT, HIDDEN, LAYERS, CLASSES)

    out = lstm_model_forward(x, params, num_layers=LAYERS)
    out = jax.block_until_ready(out)
    assert out.shape == (B, CLASSES), out.shape

    ref = jax.block_until_ready(_reference_forward(x, params, LAYERS))
    assert bool(jnp.allclose(out, ref, rtol=1e-4, atol=1e-4)), (
        float(jnp.max(jnp.abs(out - ref))))

    print("KERNEL_OK")
</pallas_src>

<mosaic_0001>
module attributes {stable_mosaic.version = 11 : i64} {
  func.func @_fused_lstm_fc_kernel(%arg0: i32, %arg1: memref<8x8x16xf32, #tpu.memory_space<vmem>>, %arg2: memref<16x128xf32, #tpu.memory_space<vmem>>, %arg3: memref<32x128xf32, #tpu.memory_space<vmem>>, %arg4: memref<1x128xf32, #tpu.memory_space<vmem>>, %arg5: memref<32x128xf32, #tpu.memory_space<vmem>>, %arg6: memref<32x128xf32, #tpu.memory_space<vmem>>, %arg7: memref<1x128xf32, #tpu.memory_space<vmem>>, %arg8: memref<32x128xf32, #tpu.memory_space<vmem>>, %arg9: memref<1x128xf32, #tpu.memory_space<vmem>>, %arg10: memref<8x128xf32, #tpu.memory_space<vmem>>, %arg11: memref<64x32xf32, #tpu.memory_space<vmem>>) attributes {dimension_semantics = [#tpu.dimension_semantics<parallel>], iteration_bounds = array<i64: 1>, scalar_prefetch = 0 : i64, scratch_operands = 1 : i64, tpu.core_type = #tpu.core_type<tc>, window_params = [{transform_indices = @transform_0, window_bounds = array<i64: 8, 8, 16>}, {pipeline_mode = #tpu.pipeline_mode<synchronous>, transform_indices = @transform_1, window_bounds = array<i64: 16, 128>}, {pipeline_mode = #tpu.pipeline_mode<synchronous>, transform_indices = @transform_2, window_bounds = array<i64: 32, 128>}, {pipeline_mode = #tpu.pipeline_mode<synchronous>, transform_indices = @transform_3, window_bounds = array<i64: 1, 128>}, {pipeline_mode = #tpu.pipeline_mode<synchronous>, transform_indices = @transform_4, window_bounds = array<i64: 32, 128>}, {pipeline_mode = #tpu.pipeline_mode<synchronous>, transform_indices = @transform_5, window_bounds = array<i64: 32, 128>}, {pipeline_mode = #tpu.pipeline_mode<synchronous>, transform_indices = @transform_6, window_bounds = array<i64: 1, 128>}, {pipeline_mode = #tpu.pipeline_mode<synchronous>, transform_indices = @transform_7, window_bounds = array<i64: 32, 128>}, {pipeline_mode = #tpu.pipeline_mode<synchronous>, transform_indices = @transform_8, window_bounds = array<i64: 1, 128>}, {transform_indices = @transform_9, window_bounds = array<i64: 8, 128>}]} {
    %c0 = arith.constant 0 : index
    %c0_0 = arith.constant 0 : index
    %0 = vector.load %arg4[%c0, %c0_0] : memref<1x128xf32, #tpu.memory_space<vmem>>, vector<1x128xf32>
    %c0_1 = arith.constant 0 : index
    %c0_2 = arith.constant 0 : index
    %c0_3 = arith.constant 0 : index
    %1 = vector.load %arg1[%c0_1, %c0_2, %c0_3] : memref<8x8x16xf32, #tpu.memory_space<vmem>>, vector<8x8x16xf32>
    %2 = vector.shape_cast %1 : vector<8x8x16xf32> to vector<64x16xf32>
    %c0_4 = arith.constant 0 : index
    %c0_5 = arith.constant 0 : index
    %3 = vector.load %arg2[%c0_4, %c0_5] : memref<16x128xf32, #tpu.memory_space<vmem>>, vector<16x128xf32>
    %cst = arith.constant dense<0.000000e+00> : vector<64x128xf32>
    %4 = tpu.matmul %2, %3, %cst {dimension_numbers = #tpu.dot_dimension_numbers<[1], [0], [0], [1], [0, 0, 1, 1], [], []>} : vector<64x16xf32>, vector<16x128xf32>, vector<64x128xf32> -> vector<64x128xf32>
    %5 = vector.broadcast %0 : vector<1x128xf32> to vector<64x128xf32>
    %6 = arith.addf %4, %5 : vector<64x128xf32>
    %7 = vector.shape_cast %6 : vector<64x128xf32> to vector<8x8x128xf32>
    %cst_6 = arith.constant 0.000000e+00 : f32
    %8 = vector.broadcast %cst_6 : f32 to vector<8x32xf32>
    %cst_7 = arith.constant 0.000000e+00 : f32
    %9 = vector.broadcast %cst_7 : f32 to vector<8x32xf32>
    %10 = vector.extract_strided_slice %7 {offsets = [0, 0, 0], sizes = [8, 1, 128], strides = [1, 1, 1]} : vector<8x8x128xf32> to vector<8x1x128xf32>
    %11 = vector.shape_cast %10 : vector<8x1x128xf32> to vector<8x128xf32>
    %c0_8 = arith.constant 0 : index
    %c0_9 = arith.constant 0 : index
    %12 = vector.load %arg3[%c0_8, %c0_9] : memref<32x128xf32, #tpu.memory_space<vmem>>, vector<32x128xf32>
    %cst_10 = arith.constant dense<0.000000e+00> : vector<8x128xf32>
    %13 = tpu.matmul %8, %12, %cst_10 {dimension_numbers = #tpu.dot_dimension_numbers<[1], [0], [0], [1], [0, 0, 1, 1], [], []>} : vector<8x32xf32>, vector<32x128xf32>, vector<8x128xf32> -> vector<8x128xf32>
    %14 = arith.addf %11, %13 : vector<8x128xf32>
    %15 = vector.extract_strided_slice %14 {offsets = [0, 0], sizes = [8, 32], strides = [1, 1]} : vector<8x128xf32> to vector<8x32xf32>
    %16 = arith.negf %15 : vector<8x32xf32>
    %17 = math.exp %16 : vector<8x32xf32>
    %cst_11 = arith.constant 1.000000e+00 : f32
    %18 = vector.broadcast %cst_11 : f32 to vector<8x32xf32>
    %19 = arith.addf %18, %17 : vector<8x32xf32>
    %20 = arith.divf %18, %19 : vector<8x32xf32>
    %21 = vector.extract_strided_slice %14 {offsets = [0, 32], sizes = [8, 32], strides = [1, 1]} : vector<8x128xf32> to vector<8x32xf32>
    %22 = arith.negf %21 : vector<8x32xf32>
    %23 = math.exp %22 : vector<8x32xf32>
    %cst_12 = arith.constant 1.000000e+00 : f32
    %24 = vector.broadcast %cst_12 : f32 to vector<8x32xf32>
    %25 = arith.addf %24, %23 : vector<8x32xf32>
    %26 = arith.divf %24, %25 : vector<8x32xf32>
    %27 = vector.extract_strided_slice %14 {offsets = [0, 64], sizes = [8, 32], strides = [1, 1]} : vector<8x128xf32> to vector<8x32xf32>
    %28 = math.tanh %27 : vector<8x32xf32>
    %29 = vector.extract_strided_slice %14 {offsets = [0, 96], sizes = [8, 32], strides = [1, 1]} : vector<8x128xf32> to vector<8x32xf32>
    %30 = arith.negf %29 : vector<8x32xf32>
    %31 = math.exp %30 : vector<8x32xf32>
    %cst_13 = arith.constant 1.000000e+00 : f32
    %32 = vector.broadcast %cst_13 : f32 to vector<8x32xf32>
    %33 = arith.addf %32, %31 : vector<8x32xf32>
    %34 = arith.divf %32, %33 : vector<8x32xf32>
    %35 = arith.mulf %26, %9 : vector<8x32xf32>
    %36 = arith.mulf %20, %28 : vector<8x32xf32>
    %37 = arith.addf %35, %36 : vector<8x32xf32>
    %38 = math.tanh %37 : vector<8x32xf32>
    %39 = arith.mulf %34, %38 : vector<8x32xf32>
    %c0_14 = arith.constant 0 : index
    %c0_15 = arith.constant 0 : index
    %40 = vector.load %arg11[%c0_14, %c0_15] : memref<64x32xf32, #tpu.memory_space<vmem>>, vector<8x32xf32>
    tpu.vector_store %arg11[%c0_14, %c0_15], %39 {strides = array<i32>} : memref<64x32xf32, #tpu.memory_space<vmem>>, vector<8x32xf32>,
    %41 = vector.extract_strided_slice %7 {offsets = [0, 1, 0], sizes = [8, 1, 128], strides = [1, 1, 1]} : vector<8x8x128xf32> to vector<8x1x128xf32>
    %42 = vector.shape_cast %41 : vector<8x1x128xf32> to vector<8x128xf32>
    %c0_16 = arith.constant 0 : index
    %c0_17 = arith.constant 0 : index
    %43 = vector.load %arg3[%c0_16, %c0_17] : memref<32x128xf32, #tpu.memory_space<vmem>>, vector<32x128xf32>
    %cst_18 = arith.constant dense<0.000000e+00> : vector<8x128xf32>
    %44 = tpu.matmul %39, %43, %cst_18 {dimension_numbers = #tpu.dot_dimension_numbers<[1], [0], [0], [1], [0, 0, 1, 1], [], []>} : vector<8x32xf32>, vector<32x128xf32>, vector<8x128xf32> -> vector<8x128xf32>
    %45 = arith.addf %42, %44 : vector<8x128xf32>
    %46 = vector.extract_strided_slice %45 {offsets = [0, 0], sizes = [8, 32], strides = [1, 1]} : vector<8x128xf32> to vector<8x32xf32>
    %47 = arith.negf %46 : vector<8x32xf32>
    %48 = math.exp %47 : vector<8x32xf32>
    %cst_19 = arith.constant 1.000000e+00 : f32
    %49 = vector.broadcast %cst_19 : f32 to vector<8x32xf32>
    %50 = arith.addf %49, %48 : vector<8x32xf32>
    %51 = arith.divf %49, %50 : vector<8x32xf32>
    %52 = vector.extract_strided_slice %45 {offsets = [0, 32], sizes = [8, 32], strides = [1, 1]} : vector<8x128xf32> to vector<8x32xf32>
    %53 = arith.negf %52 : vector<8x32xf32>
    %54 = math.exp %53 : vector<8x32xf32>
    %cst_20 = arith.constant 1.000000e+00 : f32
    %55 = vector.broadcast %cst_20 : f32 to vector<8x32xf32>
    %56 = arith.addf %55, %54 : vector<8x32xf32>
    %57 = arith.divf %55, %56 : vector<8x32xf32>
    %58 = vector.extract_strided_slice %45 {offsets = [0, 64], sizes = [8, 32], strides = [1, 1]} : vector<8x128xf32> to vector<8x32xf32>
    %59 = math.tanh %58 : vector<8x32xf32>
    %60 = vector.extract_strided_slice %45 {offsets = [0, 96], sizes = [8, 32], strides = [1, 1]} : vector<8x128xf32> to vector<8x32xf32>
    %61 = arith.negf %60 : vector<8x32xf32>
    %62 = math.exp %61 : vector<8x32xf32>
    %cst_21 = arith.constant 1.000000e+00 : f32
    %63 = vector.broadcast %cst_21 : f32 to vector<8x32xf32>
    %64 = arith.addf %63, %62 : vector<8x32xf32>
    %65 = arith.divf %63, %64 : vector<8x32xf32>
    %66 = arith.mulf %57, %37 : vector<8x32xf32>
    %67 = arith.mulf %51, %59 : vector<8x32xf32>
    %68 = arith.addf %66, %67 : vector<8x32xf32>
    %69 = math.tanh %68 : vector<8x32xf32>
    %70 = arith.mulf %65, %69 : vector<8x32xf32>
    %c8 = arith.constant 8 : index
    %c0_22 = arith.constant 0 : index
    %71 = vector.load %arg11[%c8, %c0_22] : memref<64x32xf32, #tpu.memory_space<vmem>>, vector<8x32xf32>
    tpu.vector_store %arg11[%c8, %c0_22], %70 {strides = array<i32>} : memref<64x32xf32, #tpu.memory_space<vmem>>, vector<8x32xf32>,
    %72 = vector.extract_strided_slice %7 {offsets = [0, 2, 0], sizes = [8, 1, 128], strides = [1, 1, 1]} : vector<8x8x128xf32> to vector<8x1x128xf32>
    %73 = vector.shape_cast %72 : vector<8x1x128xf32> to vector<8x128xf32>
    %c0_23 = arith.constant 0 : index
    %c0_24 = arith.constant 0 : index
    %74 = vector.load %arg3[%c0_23, %c0_24] : memref<32x128xf32, #tpu.memory_space<vmem>>, vector<32x128xf32>
    %cst_25 = arith.constant dense<0.000000e+00> : vector<8x128xf32>
    %75 = tpu.matmul %70, %74, %cst_25 {dimension_numbers = #tpu.dot_dimension_numbers<[1], [0], [0], [1], [0, 0, 1, 1], [], []>} : vector<8x32xf32>, vector<32x128xf32>, vector<8x128xf32> -> vector<8x128xf32>
    %76 = arith.addf %73, %75 : vector<8x128xf32>
    %77 = vector.extract_strided_slice %76 {offsets = [0, 0], sizes = [8, 32], strides = [1, 1]} : vector<8x128xf32> to vector<8x32xf32>
    %78 = arith.negf %77 : vector<8x32xf32>
    %79 = math.exp %78 : vector<8x32xf32>
    %cst_26 = arith.constant 1.000000e+00 : f32
    %80 = vector.broadcast %cst_26 : f32 to vector<8x32xf32>
    %81 = arith.addf %80, %79 : vector<8x32xf32>
    %82 = arith.divf %80, %81 : vector<8x32xf32>
    %83 = vector.extract_strided_slice %76 {offsets = [0, 32], sizes = [8, 32], strides = [1, 1]} : vector<8x128xf32> to vector<8x32xf32>
    %84 = arith.negf %83 : vector<8x32xf32>
    %85 = math.exp %84 : vector<8x32xf32>
    %cst_27 = arith.constant 1.000000e+00 : f32
    %86 = vector.broadcast %cst_27 : f32 to vector<8x32xf32>
    %87 = arith.addf %86, %85 : vector<8x32xf32>
    %88 = arith.divf %86, %87 : vector<8x32xf32>
    %89 = vector.extract_strided_slice %76 {offsets = [0, 64], sizes = [8, 32], strides = [1, 1]} : vector<8x128xf32> to vector<8x32xf32>
    %90 = math.tanh %89 : vector<8x32xf32>
    %91 = vector.extract_strided_slice %76 {offsets = [0, 96], sizes = [8, 32], strides = [1, 1]} : vector<8x128xf32> to vector<8x32xf32>
    %92 = arith.negf %91 : vector<8x32xf32>
    %93 = math.exp %92 : vector<8x32xf32>
    %cst_28 = arith.constant 1.000000e+00 : f32
    %94 = vector.broadcast %cst_28 : f32 to vector<8x32xf32>
    %95 = arith.addf %94, %93 : vector<8x32xf32>
    %96 = arith.divf %94, %95 : vector<8x32xf32>
    %97 = arith.mulf %88, %68 : vector<8x32xf32>
    %98 = arith.mulf %82, %90 : vector<8x32xf32>
    %99 = arith.addf %97, %98 : vector<8x32xf32>
    %100 = math.tanh %99 : vector<8x32xf32>
    %101 = arith.mulf %96, %100 : vector<8x32xf32>
    %c16 = arith.constant 16 : index
    %c0_29 = arith.constant 0 : index
    %102 = vector.load %arg11[%c16, %c0_29] : memref<64x32xf32, #tpu.memory_space<vmem>>, vector<8x32xf32>
    tpu.vector_store %arg11[%c16, %c0_29], %101 {strides = array<i32>} : memref<64x32xf32, #tpu.memory_space<vmem>>, vector<8x32xf32>,
    %103 = vector.extract_strided_slice %7 {offsets = [0, 3, 0], sizes = [8, 1, 128], strides = [1, 1, 1]} : vector<8x8x128xf32> to vector<8x1x128xf32>
    %104 = vector.shape_cast %103 : vector<8x1x128xf32> to vector<8x128xf32>
    %c0_30 = arith.constant 0 : index
    %c0_31 = arith.constant 0 : index
    %105 = vector.load %arg3[%c0_30, %c0_31] : memref<32x128xf32, #tpu.memory_space<vmem>>, vector<32x128xf32>
    %cst_32 = arith.constant dense<0.000000e+00> : vector<8x128xf32>
    %106 = tpu.matmul %101, %105, %cst_32 {dimension_numbers = #tpu.dot_dimension_numbers<[1], [0], [0], [1], [0, 0, 1, 1], [], []>} : vector<8x32xf32>, vector<32x128xf32>, vector<8x128xf32> -> vector<8x128xf32>
    %107 = arith.addf %104, %106 : vector<8x128xf32>
    %108 = vector.extract_strided_slice %107 {offsets = [0, 0], sizes = [8, 32], strides = [1, 1]} : vector<8x128xf32> to vector<8x32xf32>
    %109 = arith.negf %108 : vector<8x32xf32>
    %110 = math.exp %109 : vector<8x32xf32>
    %cst_33 = arith.constant 1.000000e+00 : f32
    %111 = vector.broadcast %cst_33 : f32 to vector<8x32xf32>
    %112 = arith.addf %111, %110 : vector<8x32xf32>
    %113 = arith.divf %111, %112 : vector<8x32xf32>
    %114 = vector.extract_strided_slice %107 {offsets = [0, 32], sizes = [8, 32], strides = [1, 1]} : vector<8x128xf32> to vector<8x32xf32>
    %115 = arith.negf %114 : vector<8x32xf32>
    %116 = math.exp %115 : vector<8x32xf32>
    %cst_34 = arith.constant 1.000000e+00 : f32
    %117 = vector.broadcast %cst_34 : f32 to vector<8x32xf32>
    %118 = arith.addf %117, %116 : vector<8x32xf32>
    %119 = arith.divf %117, %118 : vector<8x32xf32>
    %120 = vector.extract_strided_slice %107 {offsets = [0, 64], sizes = [8, 32], strides = [1, 1]} : vector<8x128xf32> to vector<8x32xf32>
    %121 = math.tanh %120 : vector<8x32xf32>
    %122 = vector.extract_strided_slice %107 {offsets = [0, 96], sizes = [8, 32], strides = [1, 1]} : vector<8x128xf32> to vector<8x32xf32>
    %123 = arith.negf %122 : vector<8x32xf32>
    %124 = math.exp %123 : vector<8x32xf32>
    %cst_35 = arith.constant 1.000000e+00 : f32
    %125 = vector.broadcast %cst_35 : f32 to vector<8x32xf32>
    %126 = arith.addf %125, %124 : vector<8x32xf32>
    %127 = arith.divf %125, %126 : vector<8x32xf32>
    %128 = arith.mulf %119, %99 : vector<8x32xf32>
    %129 = arith.mulf %113, %121 : vector<8x32xf32>
    %130 = arith.addf %128, %129 : vector<8x32xf32>
    %131 = math.tanh %130 : vector<8x32xf32>
    %132 = arith.mulf %127, %131 : vector<8x32xf32>
    %c24 = arith.constant 24 : index
    %c0_36 = arith.constant 0 : index
    %133 = vector.load %arg11[%c24, %c0_36] : memref<64x32xf32, #tpu.memory_space<vmem>>, vector<8x32xf32>
    tpu.vector_store %arg11[%c24, %c0_36], %132 {strides = array<i32>} : memref<64x32xf32, #tpu.memory_space<vmem>>, vector<8x32xf32>,
    %134 = vector.extract_strided_slice %7 {offsets = [0, 4, 0], sizes = [8, 1, 128], strides = [1, 1, 1]} : vector<8x8x128xf32> to vector<8x1x128xf32>
    %135 = vector.shape_cast %134 : vector<8x1x128xf32> to vector<8x128xf32>
    %c0_37 = arith.constant 0 : index
    %c0_38 = arith.constant 0 : index
    %136 = vector.load %arg3[%c0_37, %c0_38] : memref<32x128xf32, #tpu.memory_space<vmem>>, vector<32x128xf32>
    %cst_39 = arith.constant dense<0.000000e+00> : vector<8x128xf32>
    %137 = tpu.matmul %132, %136, %cst_39 {dimension_numbers = #tpu.dot_dimension_numbers<[1], [0], [0], [1], [0, 0, 1, 1], [], []>} : vector<8x32xf32>, vector<32x128xf32>, vector<8x128xf32> -> vector<8x128xf32>
    %138 = arith.addf %135, %137 : vector<8x128xf32>
    %139 = vector.extract_strided_slice %138 {offsets = [0, 0], sizes = [8, 32], strides = [1, 1]} : vector<8x128xf32> to vector<8x32xf32>
    %140 = arith.negf %139 : vector<8x32xf32>
    %141 = math.exp %140 : vector<8x32xf32>
    %cst_40 = arith.constant 1.000000e+00 : f32
    %142 = vector.broadcast %cst_40 : f32 to vector<8x32xf32>
    %143 = arith.addf %142, %141 : vector<8x32xf32>
    %144 = arith.divf %142, %143 : vector<8x32xf32>
    %145 = vector.extract_strided_slice %138 {offsets = [0, 32], sizes = [8, 32], strides = [1, 1]} : vector<8x128xf32> to vector<8x32xf32>
    %146 = arith.negf %145 : vector<8x32xf32>
    %147 = math.exp %146 : vector<8x32xf32>
    %cst_41 = arith.constant 1.000000e+00 : f32
    %148 = vector.broadcast %cst_41 : f32 to vector<8x32xf32>
    %149 = arith.addf %148, %147 : vector<8x32xf32>
    %150 = arith.divf %148, %149 : vector<8x32xf32>
    %151 = vector.extract_strided_slice %138 {offsets = [0, 64], sizes = [8, 32], strides = [1, 1]} : vector<8x128xf32> to vector<8x32xf32>
    %152 = math.tanh %151 : vector<8x32xf32>
    %153 = vector.extract_strided_slice %138 {offsets = [0, 96], sizes = [8, 32], strides = [1, 1]} : vector<8x128xf32> to vector<8x32xf32>
    %154 = arith.negf %153 : vector<8x32xf32>
    %155 = math.exp %154 : vector<8x32xf32>
    %cst_42 = arith.constant 1.000000e+00 : f32
    %156 = vector.broadcast %cst_42 : f32 to vector<8x32xf32>
    %157 = arith.addf %156, %155 : vector<8x32xf32>
    %158 = arith.divf %156, %157 : vector<8x32xf32>
    %159 = arith.mulf %150, %130 : vector<8x32xf32>
    %160 = arith.mulf %144, %152 : vector<8x32xf32>
    %161 = arith.addf %159, %160 : vector<8x32xf32>
    %162 = math.tanh %161 : vector<8x32xf32>
    %163 = arith.mulf %158, %162 : vector<8x32xf32>
    %c32 = arith.constant 32 : index
    %c0_43 = arith.constant 0 : index
    %164 = vector.load %arg11[%c32, %c0_43] : memref<64x32xf32, #tpu.memory_space<vmem>>, vector<8x32xf32>
    tpu.vector_store %arg11[%c32, %c0_43], %163 {strides = array<i32>} : memref<64x32xf32, #tpu.memory_space<vmem>>, vector<8x32xf32>,
    %165 = vector.extract_strided_slice %7 {offsets = [0, 5, 0], sizes = [8, 1, 128], strides = [1, 1, 1]} : vector<8x8x128xf32> to vector<8x1x128xf32>
    %166 = vector.shape_cast %165 : vector<8x1x128xf32> to vector<8x128xf32>
    %c0_44 = arith.constant 0 : index
    %c0_45 = arith.constant 0 : index
    %167 = vector.load %arg3[%c0_44, %c0_45] : memref<32x128xf32, #tpu.memory_space<vmem>>, vector<32x128xf32>
    %cst_46 = arith.constant dense<0.000000e+00> : vector<8x128xf32>
    %168 = tpu.matmul %163, %167, %cst_46 {dimension_numbers = #tpu.dot_dimension_numbers<[1], [0], [0], [1], [0, 0, 1, 1], [], []>} : vector<8x32xf32>, vector<32x128xf32>, vector<8x128xf32> -> vector<8x128xf32>
    %169 = arith.addf %166, %168 : vector<8x128xf32>
    %170 = vector.extract_strided_slice %169 {offsets = [0, 0], sizes = [8, 32], strides = [1, 1]} : vector<8x128xf32> to vector<8x32xf32>
    %171 = arith.negf %170 : vector<8x32xf32>
    %172 = math.exp %171 : vector<8x32xf32>
    %cst_47 = arith.constant 1.000000e+00 : f32
    %173 = vector.broadcast %cst_47 : f32 to vector<8x32xf32>
    %174 = arith.addf %173, %172 : vector<8x32xf32>
    %175 = arith.divf %173, %174 : vector<8x32xf32>
    %176 = vector.extract_strided_slice %169 {offsets = [0, 32], sizes = [8, 32], strides = [1, 1]} : vector<8x128xf32> to vector<8x32xf32>
    %177 = arith.negf %176 : vector<8x32xf32>
    %178 = math.exp %177 : vector<8x32xf32>
    %cst_48 = arith.constant 1.000000e+00 : f32
    %179 = vector.broadcast %cst_48 : f32 to vector<8x32xf32>
    %180 = arith.addf %179, %178 : vector<8x32xf32>
    %181 = arith.divf %179, %180 : vector<8x32xf32>
    %182 = vector.extract_strided_slice %169 {offsets = [0, 64], sizes = [8, 32], strides = [1, 1]} : vector<8x128xf32> to vector<8x32xf32>
    %183 = math.tanh %182 : vector<8x32xf32>
    %184 = vector.extract_strided_slice %169 {offsets = [0, 96], sizes = [8, 32], strides = [1, 1]} : vector<8x128xf32> to vector<8x32xf32>
    %185 = arith.negf %184 : vector<8x32xf32>
    %186 = math.exp %185 : vector<8x32xf32>
    %cst_49 = arith.constant 1.000000e+00 : f32
    %187 = vector.broadcast %cst_49 : f32 to vector<8x32xf32>
    %188 = arith.addf %187, %186 : vector<8x32xf32>
    %189 = arith.divf %187, %188 : vector<8x32xf32>
    %190 = arith.mulf %181, %161 : vector<8x32xf32>
    %191 = arith.mulf %175, %183 : vector<8x32xf32>
    %192 = arith.addf %190, %191 : vector<8x32xf32>
    %193 = math.tanh %192 : vector<8x32xf32>
    %194 = arith.mulf %189, %193 : vector<8x32xf32>
    %c40 = arith.constant 40 : index
    %c0_50 = arith.constant 0 : index
    %195 = vector.load %arg11[%c40, %c0_50] : memref<64x32xf32, #tpu.memory_space<vmem>>, vector<8x32xf32>
    tpu.vector_store %arg11[%c40, %c0_50], %194 {strides = array<i32>} : memref<64x32xf32, #tpu.memory_space<vmem>>, vector<8x32xf32>,
    %196 = vector.extract_strided_slice %7 {offsets = [0, 6, 0], sizes = [8, 1, 128], strides = [1, 1, 1]} : vector<8x8x128xf32> to vector<8x1x128xf32>
    %197 = vector.shape_cast %196 : vector<8x1x128xf32> to vector<8x128xf32>
    %c0_51 = arith.constant 0 : index
    %c0_52 = arith.constant 0 : index
    %198 = vector.load %arg3[%c0_51, %c0_52] : memref<32x128xf32, #tpu.memory_space<vmem>>, vector<32x128xf32>
    %cst_53 = arith.constant dense<0.000000e+00> : vector<8x128xf32>
    %199 = tpu.matmul %194, %198, %cst_53 {dimension_numbers = #tpu.dot_dimension_numbers<[1], [0], [0], [1], [0, 0, 1, 1], [], []>} : vector<8x32xf32>, vector<32x128xf32>, vector<8x128xf32> -> vector<8x128xf32>
    %200 = arith.addf %197, %199 : vector<8x128xf32>
    %201 = vector.extract_strided_slice %200 {offsets = [0, 0], sizes = [8, 32], strides = [1, 1]} : vector<8x128xf32> to vector<8x32xf32>
    %202 = arith.negf %201 : vector<8x32xf32>
    %203 = math.exp %202 : vector<8x32xf32>
    %cst_54 = arith.constant 1.000000e+00 : f32
    %204 = vector.broadcast %cst_54 : f32 to vector<8x32xf32>
    %205 = arith.addf %204, %203 : vector<8x32xf32>
    %206 = arith.divf %204, %205 : vector<8x32xf32>
    %207 = vector.extract_strided_slice %200 {offsets = [0, 32], sizes = [8, 32], strides = [1, 1]} : vector<8x128xf32> to vector<8x32xf32>
    %208 = arith.negf %207 : vector<8x32xf32>
    %209 = math.exp %208 : vector<8x32xf32>
    %cst_55 = arith.constant 1.000000e+00 : f32
    %210 = vector.broadcast %cst_55 : f32 to vector<8x32xf32>
    %211 = arith.addf %210, %209 : vector<8x32xf32>
    %212 = arith.divf %210, %211 : vector<8x32xf32>
    %213 = vector.extract_strided_slice %200 {offsets = [0, 64], sizes = [8, 32], strides = [1, 1]} : vector<8x128xf32> to vector<8x32xf32>
    %214 = math.tanh %213 : vector<8x32xf32>
    %215 = vector.extract_strided_slice %200 {offsets = [0, 96], sizes = [8, 32], strides = [1, 1]} : vector<8x128xf32> to vector<8x32xf32>
    %216 = arith.negf %215 : vector<8x32xf32>
    %217 = math.exp %216 : vector<8x32xf32>
    %cst_56 = arith.constant 1.000000e+00 : f32
    %218 = vector.broadcast %cst_56 : f32 to vector<8x32xf32>
    %219 = arith.addf %218, %217 : vector<8x32xf32>
    %220 = arith.divf %218, %219 : vector<8x32xf32>
    %221 = arith.mulf %212, %192 : vector<8x32xf32>
    %222 = arith.mulf %206, %214 : vector<8x32xf32>
    %223 = arith.addf %221, %222 : vector<8x32xf32>
    %224 = math.tanh %223 : vector<8x32xf32>
    %225 = arith.mulf %220, %224 : vector<8x32xf32>
    %c48 = arith.constant 48 : index
    %c0_57 = arith.constant 0 : index
    %226 = vector.load %arg11[%c48, %c0_57] : memref<64x32xf32, #tpu.memory_space<vmem>>, vector<8x32xf32>
    tpu.vector_store %arg11[%c48, %c0_57], %225 {strides = array<i32>} : memref<64x32xf32, #tpu.memory_space<vmem>>, vector<8x32xf32>,
    %227 = vector.extract_strided_slice %7 {offsets = [0, 7, 0], sizes = [8, 1, 128], strides = [1, 1, 1]} : vector<8x8x128xf32> to vector<8x1x128xf32>
    %228 = vector.shape_cast %227 : vector<8x1x128xf32> to vector<8x128xf32>
    %c0_58 = arith.constant 0 : index
    %c0_59 = arith.constant 0 : index
    %229 = vector.load %arg3[%c0_58, %c0_59] : memref<32x128xf32, #tpu.memory_space<vmem>>, vector<32x128xf32>
    %cst_60 = arith.constant dense<0.000000e+00> : vector<8x128xf32>
    %230 = tpu.matmul %225, %229, %cst_60 {dimension_numbers = #tpu.dot_dimension_numbers<[1], [0], [0], [1], [0, 0, 1, 1], [], []>} : vector<8x32xf32>, vector<32x128xf32>, vector<8x128xf32> -> vector<8x128xf32>
    %231 = arith.addf %228, %230 : vector<8x128xf32>
    %232 = vector.extract_strided_slice %231 {offsets = [0, 0], sizes = [8, 32], strides = [1, 1]} : vector<8x128xf32> to vector<8x32xf32>
    %233 = arith.negf %232 : vector<8x32xf32>
    %234 = math.exp %233 : vector<8x32xf32>
    %cst_61 = arith.constant 1.000000e+00 : f32
    %235 = vector.broadcast %cst_61 : f32 to vector<8x32xf32>
    %236 = arith.addf %235, %234 : vector<8x32xf32>
    %237 = arith.divf %235, %236 : vector<8x32xf32>
    %238 = vector.extract_strided_slice %231 {offsets = [0, 32], sizes = [8, 32], strides = [1, 1]} : vector<8x128xf32> to vector<8x32xf32>
    %239 = arith.negf %238 : vector<8x32xf32>
    %240 = math.exp %239 : vector<8x32xf32>
    %cst_62 = arith.constant 1.000000e+00 : f32
    %241 = vector.broadcast %cst_62 : f32 to vector<8x32xf32>
    %242 = arith.addf %241, %240 : vector<8x32xf32>
    %243 = arith.divf %241, %242 : vector<8x32xf32>
    %244 = vector.extract_strided_slice %231 {offsets = [0, 64], sizes = [8, 32], strides = [1, 1]} : vector<8x128xf32> to vector<8x32xf32>
    %245 = math.tanh %244 : vector<8x32xf32>
    %246 = vector.extract_strided_slice %231 {offsets = [0, 96], sizes = [8, 32], strides = [1, 1]} : vector<8x128xf32> to vector<8x32xf32>
    %247 = arith.negf %246 : vector<8x32xf32>
    %248 = math.exp %247 : vector<8x32xf32>
    %cst_63 = arith.constant 1.000000e+00 : f32
    %249 = vector.broadcast %cst_63 : f32 to vector<8x32xf32>
    %250 = arith.addf %249, %248 : vector<8x32xf32>
    %251 = arith.divf %249, %250 : vector<8x32xf32>
    %252 = arith.mulf %243, %223 : vector<8x32xf32>
    %253 = arith.mulf %237, %245 : vector<8x32xf32>
    %254 = arith.addf %252, %253 : vector<8x32xf32>
    %255 = math.tanh %254 : vector<8x32xf32>
    %256 = arith.mulf %251, %255 : vector<8x32xf32>
    %c56 = arith.constant 56 : index
    %c0_64 = arith.constant 0 : index
    %257 = vector.load %arg11[%c56, %c0_64] : memref<64x32xf32, #tpu.memory_space<vmem>>, vector<8x32xf32>
    tpu.vector_store %arg11[%c56, %c0_64], %256 {strides = array<i32>} : memref<64x32xf32, #tpu.memory_space<vmem>>, vector<8x32xf32>,
    %c0_65 = arith.constant 0 : index
    %c0_66 = arith.constant 0 : index
    %258 = vector.load %arg7[%c0_65, %c0_66] : memref<1x128xf32, #tpu.memory_space<vmem>>, vector<1x128xf32>
    %c0_67 = arith.constant 0 : index
    %c0_68 = arith.constant 0 : index
    %259 = vector.load %arg11[%c0_67, %c0_68] : memref<64x32xf32, #tpu.memory_space<vmem>>, vector<64x32xf32>
    %c0_69 = arith.constant 0 : index
    %c0_70 = arith.constant 0 : index
    %260 = vector.load %arg5[%c0_69, %c0_70] : memref<32x128xf32, #tpu.memory_space<vmem>>, vector<32x128xf32>
    %cst_71 = arith.constant dense<0.000000e+00> : vector<64x128xf32>
    %261 = tpu.matmul %259, %260, %cst_71 {dimension_numbers = #tpu.dot_dimension_numbers<[1], [0], [0], [1], [0, 0, 1, 1], [], []>} : vector<64x32xf32>, vector<32x128xf32>, vector<64x128xf32> -> vector<64x128xf32>
    %262 = vector.broadcast %258 : vector<1x128xf32> to vector<64x128xf32>
    %263 = arith.addf %261, %262 : vector<64x128xf32>
    %cst_72 = arith.constant 0.000000e+00 : f32
    %264 = vector.broadcast %cst_72 : f32 to vector<8x32xf32>
    %cst_73 = arith.constant 0.000000e+00 : f32
    %265 = vector.broadcast %cst_73 : f32 to vector<8x32xf32>
    %266 = vector.extract_strided_slice %263 {offsets = [0, 0], sizes = [8, 128], strides = [1, 1]} : vector<64x128xf32> to vector<8x128xf32>
    %c0_74 = arith.constant 0 : index
    %c0_75 = arith.constant 0 : index
    %267 = vector.load %arg6[%c0_74, %c0_75] : memref<32x128xf32, #tpu.memory_space<vmem>>, vector<32x128xf32>
    %cst_76 = arith.constant dense<0.000000e+00> : vector<8x128xf32>
    %268 = tpu.matmul %264, %267, %cst_76 {dimension_numbers = #tpu.dot_dimension_numbers<[1], [0], [0], [1], [0, 0, 1, 1], [], []>} : vector<8x32xf32>, vector<32x128xf32>, vector<8x128xf32> -> vector<8x128xf32>
    %269 = arith.addf %266, %268 : vector<8x128xf32>
    %270 = vector.extract_strided_slice %269 {offsets = [0, 0], sizes = [8, 32], strides = [1, 1]} : vector<8x128xf32> to vector<8x32xf32>
    %271 = arith.negf %270 : vector<8x32xf32>
    %272 = math.exp %271 : vector<8x32xf32>
    %cst_77 = arith.constant 1.000000e+00 : f32
    %273 = vector.broadcast %cst_77 : f32 to vector<8x32xf32>
    %274 = arith.addf %273, %272 : vector<8x32xf32>
    %275 = arith.divf %273, %274 : vector<8x32xf32>
    %276 = vector.extract_strided_slice %269 {offsets = [0, 32], sizes = [8, 32], strides = [1, 1]} : vector<8x128xf32> to vector<8x32xf32>
    %277 = arith.negf %276 : vector<8x32xf32>
    %278 = math.exp %277 : vector<8x32xf32>
    %cst_78 = arith.constant 1.000000e+00 : f32
    %279 = vector.broadcast %cst_78 : f32 to vector<8x32xf32>
    %280 = arith.addf %279, %278 : vector<8x32xf32>
    %281 = arith.divf %279, %280 : vector<8x32xf32>
    %282 = vector.extract_strided_slice %269 {offsets = [0, 64], sizes = [8, 32], strides = [1, 1]} : vector<8x128xf32> to vector<8x32xf32>
    %283 = math.tanh %282 : vector<8x32xf32>
    %284 = vector.extract_strided_slice %269 {offsets = [0, 96], sizes = [8, 32], strides = [1, 1]} : vector<8x128xf32> to vector<8x32xf32>
    %285 = arith.negf %284 : vector<8x32xf32>
    %286 = math.exp %285 : vector<8x32xf32>
    %cst_79 = arith.constant 1.000000e+00 : f32
    %287 = vector.broadcast %cst_79 : f32 to vector<8x32xf32>
    %288 = arith.addf %287, %286 : vector<8x32xf32>
    %289 = arith.divf %287, %288 : vector<8x32xf32>
    %290 = arith.mulf %281, %265 : vector<8x32xf32>
    %291 = arith.mulf %275, %283 : vector<8x32xf32>
    %292 = arith.addf %290, %291 : vector<8x32xf32>
    %293 = math.tanh %292 : vector<8x32xf32>
    %294 = arith.mulf %289, %293 : vector<8x32xf32>
    %295 = vector.extract_strided_slice %263 {offsets = [8, 0], sizes = [8, 128], strides = [1, 1]} : vector<64x128xf32> to vector<8x128xf32>
    %c0_80 = arith.constant 0 : index
    %c0_81 = arith.constant 0 : index
    %296 = vector.load %arg6[%c0_80, %c0_81] : memref<32x128xf32, #tpu.memory_space<vmem>>, vector<32x128xf32>
    %cst_82 = arith.constant dense<0.000000e+00> : vector<8x128xf32>
    %297 = tpu.matmul %294, %296, %cst_82 {dimension_numbers = #tpu.dot_dimension_numbers<[1], [0], [0], [1], [0, 0, 1, 1], [], []>} : vector<8x32xf32>, vector<32x128xf32>, vector<8x128xf32> -> vector<8x128xf32>
    %298 = arith.addf %295, %297 : vector<8x128xf32>
    %299 = vector.extract_strided_slice %298 {offsets = [0, 0], sizes = [8, 32], strides = [1, 1]} : vector<8x128xf32> to vector<8x32xf32>
    %300 = arith.negf %299 : vector<8x32xf32>
    %301 = math.exp %300 : vector<8x32xf32>
    %cst_83 = arith.constant 1.000000e+00 : f32
    %302 = vector.broadcast %cst_83 : f32 to vector<8x32xf32>
    %303 = arith.addf %302, %301 : vector<8x32xf32>
    %304 = arith.divf %302, %303 : vector<8x32xf32>
    %305 = vector.extract_strided_slice %298 {offsets = [0, 32], sizes = [8, 32], strides = [1, 1]} : vector<8x128xf32> to vector<8x32xf32>
    %306 = arith.negf %305 : vector<8x32xf32>
    %307 = math.exp %306 : vector<8x32xf32>
    %cst_84 = arith.constant 1.000000e+00 : f32
    %308 = vector.broadcast %cst_84 : f32 to vector<8x32xf32>
    %309 = arith.addf %308, %307 : vector<8x32xf32>
    %310 = arith.divf %308, %309 : vector<8x32xf32>
    %311 = vector.extract_strided_slice %298 {offsets = [0, 64], sizes = [8, 32], strides = [1, 1]} : vector<8x128xf32> to vector<8x32xf32>
    %312 = math.tanh %311 : vector<8x32xf32>
    %313 = vector.extract_strided_slice %298 {offsets = [0, 96], sizes = [8, 32], strides = [1, 1]} : vector<8x128xf32> to vector<8x32xf32>
    %314 = arith.negf %313 : vector<8x32xf32>
    %315 = math.exp %314 : vector<8x32xf32>
    %cst_85 = arith.constant 1.000000e+00 : f32
    %316 = vector.broadcast %cst_85 : f32 to vector<8x32xf32>
    %317 = arith.addf %316, %315 : vector<8x32xf32>
    %318 = arith.divf %316, %317 : vector<8x32xf32>
    %319 = arith.mulf %310, %292 : vector<8x32xf32>
    %320 = arith.mulf %304, %312 : vector<8x32xf32>
    %321 = arith.addf %319, %320 : vector<8x32xf32>
    %322 = math.tanh %321 : vector<8x32xf32>
    %323 = arith.mulf %318, %322 : vector<8x32xf32>
    %324 = vector.extract_strided_slice %263 {offsets = [16, 0], sizes = [8, 128], strides = [1, 1]} : vector<64x128xf32> to vector<8x128xf32>
    %c0_86 = arith.constant 0 : index
    %c0_87 = arith.constant 0 : index
    %325 = vector.load %arg6[%c0_86, %c0_87] : memref<32x128xf32, #tpu.memory_space<vmem>>, vector<32x128xf32>
    %cst_88 = arith.constant dense<0.000000e+00> : vector<8x128xf32>
    %326 = tpu.matmul %323, %325, %cst_88 {dimension_numbers = #tpu.dot_dimension_numbers<[1], [0], [0], [1], [0, 0, 1, 1], [], []>} : vector<8x32xf32>, vector<32x128xf32>, vector<8x128xf32> -> vector<8x128xf32>
    %327 = arith.addf %324, %326 : vector<8x128xf32>
    %328 = vector.extract_strided_slice %327 {offsets = [0, 0], sizes = [8, 32], strides = [1, 1]} : vector<8x128xf32> to vector<8x32xf32>
    %329 = arith.negf %328 : vector<8x32xf32>
    %330 = math.exp %329 : vector<8x32xf32>
    %cst_89 = arith.constant 1.000000e+00 : f32
    %331 = vector.broadcast %cst_89 : f32 to vector<8x32xf32>
    %332 = arith.addf %331, %330 : vector<8x32xf32>
    %333 = arith.divf %331, %332 : vector<8x32xf32>
    %334 = vector.extract_strided_slice %327 {offsets = [0, 32], sizes = [8, 32], strides = [1, 1]} : vector<8x128xf32> to vector<8x32xf32>
    %335 = arith.negf %334 : vector<8x32xf32>
    %336 = math.exp %335 : vector<8x32xf32>
    %cst_90 = arith.constant 1.000000e+00 : f32
    %337 = vector.broadcast %cst_90 : f32 to vector<8x32xf32>
    %338 = arith.addf %337, %336 : vector<8x32xf32>
    %339 = arith.divf %337, %338 : vector<8x32xf32>
    %340 = vector.extract_strided_slice %327 {offsets = [0, 64], sizes = [8, 32], strides = [1, 1]} : vector<8x128xf32> to vector<8x32xf32>
    %341 = math.tanh %340 : vector<8x32xf32>
    %342 = vector.extract_strided_slice %327 {offsets = [0, 96], sizes = [8, 32], strides = [1, 1]} : vector<8x128xf32> to vector<8x32xf32>
    %343 = arith.negf %342 : vector<8x32xf32>
    %344 = math.exp %343 : vector<8x32xf32>
    %cst_91 = arith.constant 1.000000e+00 : f32
    %345 = vector.broadcast %cst_91 : f32 to vector<8x32xf32>
    %346 = arith.addf %345, %344 : vector<8x32xf32>
    %347 = arith.divf %345, %346 : vector<8x32xf32>
    %348 = arith.mulf %339, %321 : vector<8x32xf32>
    %349 = arith.mulf %333, %341 : vector<8x32xf32>
    %350 = arith.addf %348, %349 : vector<8x32xf32>
    %351 = math.tanh %350 : vector<8x32xf32>
    %352 = arith.mulf %347, %351 : vector<8x32xf32>
    %353 = vector.extract_strided_slice %263 {offsets = [24, 0], sizes = [8, 128], strides = [1, 1]} : vector<64x128xf32> to vector<8x128xf32>
    %c0_92 = arith.constant 0 : index
    %c0_93 = arith.constant 0 : index
    %354 = vector.load %arg6[%c0_92, %c0_93] : memref<32x128xf32, #tpu.memory_space<vmem>>, vector<32x128xf32>
    %cst_94 = arith.constant dense<0.000000e+00> : vector<8x128xf32>
    %355 = tpu.matmul %352, %354, %cst_94 {dimension_numbers = #tpu.dot_dimension_numbers<[1], [0], [0], [1], [0, 0, 1, 1], [], []>} : vector<8x32xf32>, vector<32x128xf32>, vector<8x128xf32> -> vector<8x128xf32>
    %356 = arith.addf %353, %355 : vector<8x128xf32>
    %357 = vector.extract_strided_slice %356 {offsets = [0, 0], sizes = [8, 32], strides = [1, 1]} : vector<8x128xf32> to vector<8x32xf32>
    %358 = arith.negf %357 : vector<8x32xf32>
    %359 = math.exp %358 : vector<8x32xf32>
    %cst_95 = arith.constant 1.000000e+00 : f32
    %360 = vector.broadcast %cst_95 : f32 to vector<8x32xf32>
    %361 = arith.addf %360, %359 : vector<8x32xf32>
    %362 = arith.divf %360, %361 : vector<8x32xf32>
    %363 = vector.extract_strided_slice %356 {offsets = [0, 32], sizes = [8, 32], strides = [1, 1]} : vector<8x128xf32> to vector<8x32xf32>
    %364 = arith.negf %363 : vector<8x32xf32>
    %365 = math.exp %364 : vector<8x32xf32>
    %cst_96 = arith.constant 1.000000e+00 : f32
    %366 = vector.broadcast %cst_96 : f32 to vector<8x32xf32>
    %367 = arith.addf %366, %365 : vector<8x32xf32>
    %368 = arith.divf %366, %367 : vector<8x32xf32>
    %369 = vector.extract_strided_slice %356 {offsets = [0, 64], sizes = [8, 32], strides = [1, 1]} : vector<8x128xf32> to vector<8x32xf32>
    %370 = math.tanh %369 : vector<8x32xf32>
    %371 = vector.extract_strided_slice %356 {offsets = [0, 96], sizes = [8, 32], strides = [1, 1]} : vector<8x128xf32> to vector<8x32xf32>
    %372 = arith.negf %371 : vector<8x32xf32>
    %373 = math.exp %372 : vector<8x32xf32>
    %cst_97 = arith.constant 1.000000e+00 : f32
    %374 = vector.broadcast %cst_97 : f32 to vector<8x32xf32>
    %375 = arith.addf %374, %373 : vector<8x32xf32>
    %376 = arith.divf %374, %375 : vector<8x32xf32>
    %377 = arith.mulf %368, %350 : vector<8x32xf32>
    %378 = arith.mulf %362, %370 : vector<8x32xf32>
    %379 = arith.addf %377, %378 : vector<8x32xf32>
    %380 = math.tanh %379 : vector<8x32xf32>
    %381 = arith.mulf %376, %380 : vector<8x32xf32>
    %382 = vector.extract_strided_slice %263 {offsets = [32, 0], sizes = [8, 128], strides = [1, 1]} : vector<64x128xf32> to vector<8x128xf32>
    %c0_98 = arith.constant 0 : index
    %c0_99 = arith.constant 0 : index
    %383 = vector.load %arg6[%c0_98, %c0_99] : memref<32x128xf32, #tpu.memory_space<vmem>>, vector<32x128xf32>
    %cst_100 = arith.constant dense<0.000000e+00> : vector<8x128xf32>
    %384 = tpu.matmul %381, %383, %cst_100 {dimension_numbers = #tpu.dot_dimension_numbers<[1], [0], [0], [1], [0, 0, 1, 1], [], []>} : vector<8x32xf32>, vector<32x128xf32>, vector<8x128xf32> -> vector<8x128xf32>
    %385 = arith.addf %382, %384 : vector<8x128xf32>
    %386 = vector.extract_strided_slice %385 {offsets = [0, 0], sizes = [8, 32], strides = [1, 1]} : vector<8x128xf32> to vector<8x32xf32>
    %387 = arith.negf %386 : vector<8x32xf32>
    %388 = math.exp %387 : vector<8x32xf32>
    %cst_101 = arith.constant 1.000000e+00 : f32
    %389 = vector.broadcast %cst_101 : f32 to vector<8x32xf32>
    %390 = arith.addf %389, %388 : vector<8x32xf32>
    %391 = arith.divf %389, %390 : vector<8x32xf32>
    %392 = vector.extract_strided_slice %385 {offsets = [0, 32], sizes = [8, 32], strides = [1, 1]} : vector<8x128xf32> to vector<8x32xf32>
    %393 = arith.negf %392 : vector<8x32xf32>
    %394 = math.exp %393 : vector<8x32xf32>
    %cst_102 = arith.constant 1.000000e+00 : f32
    %395 = vector.broadcast %cst_102 : f32 to vector<8x32xf32>
    %396 = arith.addf %395, %394 : vector<8x32xf32>
    %397 = arith.divf %395, %396 : vector<8x32xf32>
    %398 = vector.extract_strided_slice %385 {offsets = [0, 64], sizes = [8, 32], strides = [1, 1]} : vector<8x128xf32> to vector<8x32xf32>
    %399 = math.tanh %398 : vector<8x32xf32>
    %400 = vector.extract_strided_slice %385 {offsets = [0, 96], sizes = [8, 32], strides = [1, 1]} : vector<8x128xf32> to vector<8x32xf32>
    %401 = arith.negf %400 : vector<8x32xf32>
    %402 = math.exp %401 : vector<8x32xf32>
    %cst_103 = arith.constant 1.000000e+00 : f32
    %403 = vector.broadcast %cst_103 : f32 to vector<8x32xf32>
    %404 = arith.addf %403, %402 : vector<8x32xf32>
    %405 = arith.divf %403, %404 : vector<8x32xf32>
    %406 = arith.mulf %397, %379 : vector<8x32xf32>
    %407 = arith.mulf %391, %399 : vector<8x32xf32>
    %408 = arith.addf %406, %407 : vector<8x32xf32>
    %409 = math.tanh %408 : vector<8x32xf32>
    %410 = arith.mulf %405, %409 : vector<8x32xf32>
    %411 = vector.extract_strided_slice %263 {offsets = [40, 0], sizes = [8, 128], strides = [1, 1]} : vector<64x128xf32> to vector<8x128xf32>
    %c0_104 = arith.constant 0 : index
    %c0_105 = arith.constant 0 : index
    %412 = vector.load %arg6[%c0_104, %c0_105] : memref<32x128xf32, #tpu.memory_space<vmem>>, vector<32x128xf32>
    %cst_106 = arith.constant dense<0.000000e+00> : vector<8x128xf32>
    %413 = tpu.matmul %410, %412, %cst_106 {dimension_numbers = #tpu.dot_dimension_numbers<[1], [0], [0], [1], [0, 0, 1, 1], [], []>} : vector<8x32xf32>, vector<32x128xf32>, vector<8x128xf32> -> vector<8x128xf32>
    %414 = arith.addf %411, %413 : vector<8x128xf32>
    %415 = vector.extract_strided_slice %414 {offsets = [0, 0], sizes = [8, 32], strides = [1, 1]} : vector<8x128xf32> to vector<8x32xf32>
    %416 = arith.negf %415 : vector<8x32xf32>
    %417 = math.exp %416 : vector<8x32xf32>
    %cst_107 = arith.constant 1.000000e+00 : f32
    %418 = vector.broadcast %cst_107 : f32 to vector<8x32xf32>
    %419 = arith.addf %418, %417 : vector<8x32xf32>
    %420 = arith.divf %418, %419 : vector<8x32xf32>
    %421 = vector.extract_strided_slice %414 {offsets = [0, 32], sizes = [8, 32], strides = [1, 1]} : vector<8x128xf32> to vector<8x32xf32>
    %422 = arith.negf %421 : vector<8x32xf32>
    %423 = math.exp %422 : vector<8x32xf32>
    %cst_108 = arith.constant 1.000000e+00 : f32
    %424 = vector.broadcast %cst_108 : f32 to vector<8x32xf32>
    %425 = arith.addf %424, %423 : vector<8x32xf32>
    %426 = arith.divf %424, %425 : vector<8x32xf32>
    %427 = vector.extract_strided_slice %414 {offsets = [0, 64], sizes = [8, 32], strides = [1, 1]} : vector<8x128xf32> to vector<8x32xf32>
    %428 = math.tanh %427 : vector<8x32xf32>
    %429 = vector.extract_strided_slice %414 {offsets = [0, 96], sizes = [8, 32], strides = [1, 1]} : vector<8x128xf32> to vector<8x32xf32>
    %430 = arith.negf %429 : vector<8x32xf32>
    %431 = math.exp %430 : vector<8x32xf32>
    %cst_109 = arith.constant 1.000000e+00 : f32
    %432 = vector.broadcast %cst_109 : f32 to vector<8x32xf32>
    %433 = arith.addf %432, %431 : vector<8x32xf32>
    %434 = arith.divf %432, %433 : vector<8x32xf32>
    %435 = arith.mulf %426, %408 : vector<8x32xf32>
    %436 = arith.mulf %420, %428 : vector<8x32xf32>
    %437 = arith.addf %435, %436 : vector<8x32xf32>
    %438 = math.tanh %437 : vector<8x32xf32>
    %439 = arith.mulf %434, %438 : vector<8x32xf32>
    %440 = vector.extract_strided_slice %263 {offsets = [48, 0], sizes = [8, 128], strides = [1, 1]} : vector<64x128xf32> to vector<8x128xf32>
    %c0_110 = arith.constant 0 : index
    %c0_111 = arith.constant 0 : index
    %441 = vector.load %arg6[%c0_110, %c0_111] : memref<32x128xf32, #tpu.memory_space<vmem>>, vector<32x128xf32>
    %cst_112 = arith.constant dense<0.000000e+00> : vector<8x128xf32>
    %442 = tpu.matmul %439, %441, %cst_112 {dimension_numbers = #tpu.dot_dimension_numbers<[1], [0], [0], [1], [0, 0, 1, 1], [], []>} : vector<8x32xf32>, vector<32x128xf32>, vector<8x128xf32> -> vector<8x128xf32>
    %443 = arith.addf %440, %442 : vector<8x128xf32>
    %444 = vector.extract_strided_slice %443 {offsets = [0, 0], sizes = [8, 32], strides = [1, 1]} : vector<8x128xf32> to vector<8x32xf32>
    %445 = arith.negf %444 : vector<8x32xf32>
    %446 = math.exp %445 : vector<8x32xf32>
    %cst_113 = arith.constant 1.000000e+00 : f32
    %447 = vector.broadcast %cst_113 : f32 to vector<8x32xf32>
    %448 = arith.addf %447, %446 : vector<8x32xf32>
    %449 = arith.divf %447, %448 : vector<8x32xf32>
    %450 = vector.extract_strided_slice %443 {offsets = [0, 32], sizes = [8, 32], strides = [1, 1]} : vector<8x128xf32> to vector<8x32xf32>
    %451 = arith.negf %450 : vector<8x32xf32>
    %452 = math.exp %451 : vector<8x32xf32>
    %cst_114 = arith.constant 1.000000e+00 : f32
    %453 = vector.broadcast %cst_114 : f32 to vector<8x32xf32>
    %454 = arith.addf %453, %452 : vector<8x32xf32>
    %455 = arith.divf %453, %454 : vector<8x32xf32>
    %456 = vector.extract_strided_slice %443 {offsets = [0, 64], sizes = [8, 32], strides = [1, 1]} : vector<8x128xf32> to vector<8x32xf32>
    %457 = math.tanh %456 : vector<8x32xf32>
    %458 = vector.extract_strided_slice %443 {offsets = [0, 96], sizes = [8, 32], strides = [1, 1]} : vector<8x128xf32> to vector<8x32xf32>
    %459 = arith.negf %458 : vector<8x32xf32>
    %460 = math.exp %459 : vector<8x32xf32>
    %cst_115 = arith.constant 1.000000e+00 : f32
    %461 = vector.broadcast %cst_115 : f32 to vector<8x32xf32>
    %462 = arith.addf %461, %460 : vector<8x32xf32>
    %463 = arith.divf %461, %462 : vector<8x32xf32>
    %464 = arith.mulf %455, %437 : vector<8x32xf32>
    %465 = arith.mulf %449, %457 : vector<8x32xf32>
    %466 = arith.addf %464, %465 : vector<8x32xf32>
    %467 = math.tanh %466 : vector<8x32xf32>
    %468 = arith.mulf %463, %467 : vector<8x32xf32>
    %469 = vector.extract_strided_slice %263 {offsets = [56, 0], sizes = [8, 128], strides = [1, 1]} : vector<64x128xf32> to vector<8x128xf32>
    %c0_116 = arith.constant 0 : index
    %c0_117 = arith.constant 0 : index
    %470 = vector.load %arg6[%c0_116, %c0_117] : memref<32x128xf32, #tpu.memory_space<vmem>>, vector<32x128xf32>
    %cst_118 = arith.constant dense<0.000000e+00> : vector<8x128xf32>
    %471 = tpu.matmul %468, %470, %cst_118 {dimension_numbers = #tpu.dot_dimension_numbers<[1], [0], [0], [1], [0, 0, 1, 1], [], []>} : vector<8x32xf32>, vector<32x128xf32>, vector<8x128xf32> -> vector<8x128xf32>
    %472 = arith.addf %469, %471 : vector<8x128xf32>
    %473 = vector.extract_strided_slice %472 {offsets = [0, 0], sizes = [8, 32], strides = [1, 1]} : vector<8x128xf32> to vector<8x32xf32>
    %474 = arith.negf %473 : vector<8x32xf32>
    %475 = math.exp %474 : vector<8x32xf32>
    %cst_119 = arith.constant 1.000000e+00 : f32
    %476 = vector.broadcast %cst_119 : f32 to vector<8x32xf32>
    %477 = arith.addf %476, %475 : vector<8x32xf32>
    %478 = arith.divf %476, %477 : vector<8x32xf32>
    %479 = vector.extract_strided_slice %472 {offsets = [0, 32], sizes = [8, 32], strides = [1, 1]} : vector<8x128xf32> to vector<8x32xf32>
    %480 = arith.negf %479 : vector<8x32xf32>
    %481 = math.exp %480 : vector<8x32xf32>
    %cst_120 = arith.constant 1.000000e+00 : f32
    %482 = vector.broadcast %cst_120 : f32 to vector<8x32xf32>
    %483 = arith.addf %482, %481 : vector<8x32xf32>
    %484 = arith.divf %482, %483 : vector<8x32xf32>
    %485 = vector.extract_strided_slice %472 {offsets = [0, 64], sizes = [8, 32], strides = [1, 1]} : vector<8x128xf32> to vector<8x32xf32>
    %486 = math.tanh %485 : vector<8x32xf32>
    %487 = vector.extract_strided_slice %472 {offsets = [0, 96], sizes = [8, 32], strides = [1, 1]} : vector<8x128xf32> to vector<8x32xf32>
    %488 = arith.negf %487 : vector<8x32xf32>
    %489 = math.exp %488 : vector<8x32xf32>
    %cst_121 = arith.constant 1.000000e+00 : f32
    %490 = vector.broadcast %cst_121 : f32 to vector<8x32xf32>
    %491 = arith.addf %490, %489 : vector<8x32xf32>
    %492 = arith.divf %490, %491 : vector<8x32xf32>
    %493 = arith.mulf %484, %466 : vector<8x32xf32>
    %494 = arith.mulf %478, %486 : vector<8x32xf32>
    %495 = arith.addf %493, %494 : vector<8x32xf32>
    %496 = math.tanh %495 : vector<8x32xf32>
    %497 = arith.mulf %492, %496 : vector<8x32xf32>
    %c0_122 = arith.constant 0 : index
    %c0_123 = arith.constant 0 : index
    %498 = vector.load %arg8[%c0_122, %c0_123] : memref<32x128xf32, #tpu.memory_space<vmem>>, vector<32x128xf32>
    %cst_124 = arith.constant dense<0.000000e+00> : vector<8x128xf32>
    %499 = tpu.matmul %497, %498, %cst_124 {dimension_numbers = #tpu.dot_dimension_numbers<[1], [0], [0], [1], [0, 0, 1, 1], [], []>} : vector<8x32xf32>, vector<32x128xf32>, vector<8x128xf32> -> vector<8x128xf32>
    %c0_125 = arith.constant 0 : index
    %c0_126 = arith.constant 0 : index
    %500 = vector.load %arg9[%c0_125, %c0_126] : memref<1x128xf32, #tpu.memory_space<vmem>>, vector<1x128xf32>
    %501 = vector.broadcast %500 : vector<1x128xf32> to vector<8x128xf32>
    %502 = arith.addf %499, %501 : vector<8x128xf32>
    %c0_127 = arith.constant 0 : index
    %c0_128 = arith.constant 0 : index
    %503 = vector.load %arg10[%c0_127, %c0_128] : memref<8x128xf32, #tpu.memory_space<vmem>>, vector<8x128xf32>
    tpu.vector_store %arg10[%c0_127, %c0_128], %502 {strides = array<i32>} : memref<8x128xf32, #tpu.memory_space<vmem>>, vector<8x128xf32>,
    return
  }
  func.func @transform_0(%arg0: i32) -> (i32, i32, i32) {
    %c0_i32 = arith.constant 0 : i32
    %c0_i32_0 = arith.constant 0 : i32
    %c0_i32_1 = arith.constant 0 : i32
    return %arg0, %c0_i32, %c0_i32_0 : i32, i32, i32
  }
  func.func @transform_1(%arg0: i32) -> (i32, i32) {
    %c0_i32 = arith.constant 0 : i32
    %c0_i32_0 = arith.constant 0 : i32
    %c0_i32_1 = arith.constant 0 : i32
    return %c0_i32, %c0_i32_0 : i32, i32
  }
  func.func @transform_2(%arg0: i32) -> (i32, i32) {
    %c0_i32 = arith.constant 0 : i32
    %c0_i32_0 = arith.constant 0 : i32
    %c0_i32_1 = arith.constant 0 : i32
    return %c0_i32, %c0_i32_0 : i32, i32
  }
  func.func @transform_3(%arg0: i32) -> (i32, i32) {
    %c0_i32 = arith.constant 0 : i32
    %c0_i32_0 = arith.constant 0 : i32
    %c0_i32_1 = arith.constant 0 : i32
    return %c0_i32, %c0_i32_0 : i32, i32
  }
  func.func @transform_4(%arg0: i32) -> (i32, i32) {
    %c0_i32 = arith.constant 0 : i32
    %c0_i32_0 = arith.constant 0 : i32
    %c0_i32_1 = arith.constant 0 : i32
    return %c0_i32, %c0_i32_0 : i32, i32
  }
  func.func @transform_5(%arg0: i32) -> (i32, i32) {
    %c0_i32 = arith.constant 0 : i32
    %c0_i32_0 = arith.constant 0 : i32
    %c0_i32_1 = arith.constant 0 : i32
    return %c0_i32, %c0_i32_0 : i32, i32
  }
  func.func @transform_6(%arg0: i32) -> (i32, i32) {
    %c0_i32 = arith.constant 0 : i32
    %c0_i32_0 = arith.constant 0 : i32
    %c0_i32_1 = arith.constant 0 : i32
    return %c0_i32, %c0_i32_0 : i32, i32
  }
  func.func @transform_7(%arg0: i32) -> (i32, i32) {
    %c0_i32 = arith.constant 0 : i32
    %c0_i32_0 = arith.constant 0 : i32
    %c0_i32_1 = arith.constant 0 : i32
    return %c0_i32, %c0_i32_0 : i32, i32
  }
  func.func @transform_8(%arg0: i32) -> (i32, i32) {
    %c0_i32 = arith.constant 0 : i32
    %c0_i32_0 = arith.constant 0 : i32
    %c0_i32_1 = arith.constant 0 : i32
    return %c0_i32, %c0_i32_0 : i32, i32
  }
  func.func @transform_9(%arg0: i32) -> (i32, i32) {
    %c0_i32 = arith.constant 0 : i32
    %c0_i32_0 = arith.constant 0 : i32
    return %arg0, %c0_i32 : i32, i32
  }
}

</mosaic_0001>

<bundles_post_ra>
// kernel: lstm_model_forward.1
= control target key start
LH: loop header
LB: loop body
LE: loop exit
PB: predicated region body
PF: predicated region fallthrough
CT: control target
= control target key end

     0   :  { %vm49_vm0 = vcmask 130048   ;;  %v5200_v0 = vmov 0.0|0.0   ;;  %vm5201_vm1 = vmmov 0   ;;  %v5202_v4 = vmov 0.0   ;;  %s6541_s1 = inlined_call_operand.vmem [shape: f32[16,128], index: 1, kind: input, shape index: {}]   ;;  %s6542_s2 = inlined_call_operand.vmem [shape: f32[32,128], index: 2, kind: input, shape index: {}]   ;;  %s6543_s0 = inlined_call_operand.vmem [shape: f32[8,8,16], index: 0, kind: input, shape index: {}]   ;;  %s6544_s3 = inlined_call_operand.vmem [shape: f32[1,128], index: 3, kind: input, shape index: {}]   ;;  %s6545_s4 = inlined_call_operand.vmem [shape: f32[32,128], index: 4, kind: input, shape index: {}]   ;;  %s6546_s5 = inlined_call_operand.vmem [shape: f32[32,128], index: 5, kind: input, shape index: {}]   ;;  %s6547_s6 = inlined_call_operand.vmem [shape: f32[1,128], index: 6, kind: input, shape index: {}]   ;;  %s6548_s7 = inlined_call_operand.vmem [shape: f32[32,128], index: 7, kind: input, shape index: {}]   ;;  %s6549_s8 = inlined_call_operand.vmem [shape: f32[1,128], index: 8, kind: input, shape index: {}]   ;;  %s6550_s9 = inlined_call_operand.vmem [shape: f32[8,128], index: 9, kind: output, shape index: {}]  }
   0x1   :  { %4509 = vmatprep.subr.bf16.mxu1 %v5200_v0  ;;  %v41_v1 = vld [vmem:[%s6541_s1] sm:$0xff]  ;;  %v42_v2 = vld [vmem:[%s6541_s1 + $0x8] sm:$0xff]  ;;  %4306 = vmatprep.mubr.msk.f32.mxu1 %vm5201_vm1, %v5202_v4  ;;  %v181_v9 = vld [vmem:[%s6542_s2 + $0x10] sm:$0xff]  ;;  %vm482_vm2 = vcmask 1041409   ;;  %vm485_vm3 = vcmask 1042434   ;;  %vm488_vm4 = vcmask 1043459  }
   0x2   :  { %v179_v3 = vld [vmem:[%s6542_s2] sm:$0xff]  ;;  %v4505_v5 = vpack.c.bf16 %v42_v2, %v41_v1  ;;  %v180_v6 = vld [vmem:[%s6542_s2 + $0x8] sm:$0xff]  ;;  %v182_v10 = vld [vmem:[%s6542_s2 + $0x18] sm:$0xff]  ;;  %vm491_vm5 = vcmask 1044484   ;;  %vm494_vm6 = vcmask 1045509   ;;  %vm497_vm7 = vcmask 1046534  }
   0x3   :  { %v33_v7 = vld [vmem:[%s6543_s0] sm:$0xff]  ;;  %v4510_v8 = vpack.c.bf16 %v180_v6, %v179_v3  ;;  %v34_v11 = vld [vmem:[%s6543_s0 + $0x8] sm:$0xff]  ;;  %v4513_v12 = vpack.c.bf16 %v182_v10, %v181_v9  ;;  %v35_v13 = vld [vmem:[%s6543_s0 + $0x10] sm:$0xff]  ;;  %vm500_vm8 = vcmask 1047559   ;;  %vm183_vm9 = vcmask 261120  }
   0x4   :  { %4286 = vmatprep.mubr.msk.f32.mxu0 %vm49_vm0, %v33_v7  ;;  %4506 = vmatprep.subr.bf16.mxu0 %v4505_v5  ;;  %v36_v14 = vld [vmem:[%s6543_s0 + $0x18] sm:$0xff]  ;;  %v37_v15 = vld [vmem:[%s6543_s0 + $0x20] sm:$0xff]  ;;  %v38_v16 = vld [vmem:[%s6543_s0 + $0x28] sm:$0xff]  ;;  %vm849_vm10 = vcmask 261121   ;;  %vm851_vm11 = vcmask 253952   ;;  %vm1212_vm12 = vcmask 261122  }
   0x5   :  { %4511 = vmatpush3.bf16.msra.mxu1 %v4510_v8  ;;  %4508 = vmatpush3.bf16.msra.mxu0 %v4505_v5  ;;  %v39_v17 = vld [vmem:[%s6543_s0 + $0x30] sm:$0xff]  ;;  %v40_v18 = vld [vmem:[%s6543_s0 + $0x38] sm:$0xff]  ;;  %v4069_v20 = vld [vmem:[%s6544_s3] ss:$0 sm:$0xff]  ;;  %s5203_s0 = smov 64   ;;  %s5204_s3 = smov 32  }
   0x6   :  { %4512 = vmatprep.subr.bf16.mxu1 %v5200_v0  ;;  %4521 = vmatprep.subr.bf16.mxu0 %v5200_v0  ;;  %vm1575_vm13 = vcmask 261123   ;;  %vm1938_vm14 = vcmask 261124   ;;  %vm2301_vm15 = vcmask 261125  }
   0x8   :  { %4287 = vmatmul.mubr.msk.f32.vlgmr.msra.gmra.mrb[0].mxu0 %vm49_vm0, %v34_v11 }
   0x9   :  { %4514 = vmatpush3.bf16.msra.mxu1 %v4513_v12  ;;  %4289 = vmatprep.mubr.msk.f32.mxu0 %vm49_vm0, %v35_v13 }
   0xa   :  { %4515 = vmatprep.subr.bf16.mxu1 %v5200_v0  ;;  %4523 = vmatpush3.bf16.msra.mxu0 %v4510_v8 }
   0xb   :  { %4524 = vmatprep.subr.bf16.mxu0 %v5200_v0 }
   0xc   :  { %4307 = vmatmul.mubr.f32.vlgmr.msra.gmra.mrb[0].mxu1 %v5202_v4  ;;  %4290 = vmatmul.mubr.msk.f32.gmra.mrb[2].mxu0 %vm49_vm0, %v36_v14 }
   0xd   :  { %4292 = vmatprep.mubr.msk.f32.mxu0 %vm49_vm0, %v37_v15  ;;  %4517 = vmatpush3.bf16.msra.mxu1 %v4510_v8 }
   0xe   :  { %4518 = vmatprep.subr.bf16.mxu1 %v5200_v0  ;;  %4317 = vmatprep.mubr.msk.f32.mxu1 %vm5201_vm1, %v5202_v4 }
   0xf   :  { %4526 = vmatpush3.bf16.msra.mxu0 %v4513_v12 }
  0x10   :  { %4293 = vmatmul.mubr.msk.f32.gmra.mrb[4].mxu0 %vm49_vm0, %v38_v16  ;;  %4533 = vmatprep.subr.bf16.mxu0 %v5200_v0 }
  0x11   :  { %4295 = vmatprep.mubr.msk.f32.mxu0 %vm49_vm0, %v39_v17  ;;  %4520 = vmatpush3.bf16.msra.mxu1 %v4513_v12 }
  0x12   :  { %4527 = vmatprep.subr.bf16.mxu1 %v5200_v0 }
  0x14   :  { %4296 = vmatmul.mubr.msk.f32.gmra.mrb[6].mxu0 %vm49_vm0, %v40_v18  ;;  %vm2664_vm0 = vcmask 261126  }
  0x15   :  { %4328 = vmatprep.mubr.msk.f32.mxu0 %vm5201_vm1, %v5202_v4 }
  0xdb   :  { %v4288_v19 = vpop.f32.mrb[0].mxu0 }
  0xdc   :  { %v140_v21 = vpop.f32.mrb[1].mxu0  ;;  %v5327_v29 = vadd.f32 %v4288_v19, %v4069_v20 }
  0xdd   :  { %v5323_v22 = vadd.f32 %v4069_v20, %v140_v21 }
  0xdf   :  { %v253_v23 = vpop.f32.mrb[0].mxu1  ;;  %v4291_v24 = vpop.f32.mrb[2].mxu0 }
  0xe0   :  { %v260_v25 = vrot.slane %v253_v23, 3  ;;  %v4308_v26 = vpop.f32.mrb[1].mxu1  ;;  %v150_v27 = vpop.f32.mrb[3].mxu0  ;;  %v5325_v28 = vadd.f32 %v4291_v24, %v4069_v20  ;;  %v273_v30 = vadd.f32 %v253_v23, %v5323_v22  ;;  %v258_v31 = vrot.slane %v253_v23, 1 }
  0xe1   :  { %v5330_v32 = vadd.f32 %v4069_v20, %v150_v27  ;;  %v259_v37 = vrot.slane %v253_v23, 2  ;;  %v262_v39 = vrot.slane %v253_v23, 5  ;;  %v261_v44 = vrot.slane %v253_v23, 4 }
  0xe2   :  { %v276_v34 = vadd.f32 %v260_v25, %v5325_v28  ;;  %4624 = vtanh.f32 %v273_v30  ;;  %v274_v36 = vadd.f32 %v258_v31, %v5327_v29  ;;  %v264_v47 = vrot.slane %v253_v23, 7 }
  0xe3   :  { %v4294_v33 = vpop.f32.mrb[4].mxu0  ;;  %v275_v42 = vadd.f32 %v259_v37, %v5330_v32  ;;  %v263_v52 = vrot.slane %v253_v23, 6  ;;  %v4078_v61 = vmul.f32 -1.442695, %v273_v30 }
  0xe4   :  { %v160_v35 = vpop.f32.mrb[5].mxu0  ;;  %v5334_v38 = vadd.f32 %v4294_v33, %v4069_v20  ;;  %4626 = vtanh.f32 %v276_v34  ;;  %v4079_v62 = vmul.f32 -1.442695, %v274_v36  ;;  %v4081_v63 = vmul.f32 -1.442695, %v276_v34 }
  0xe5   :  { %v5336_v40 = vadd.f32 %v4069_v20, %v160_v35  ;;  %4628 = vtanh.f32 %v274_v36  ;;  %v4080_v1 = vmul.f32 -1.442695, %v275_v42 }
  0xe6   :  { %v278_v46 = vadd.f32 %v262_v39, %v5334_v38  ;;  %4630 = vtanh.f32 %v275_v42 }
  0xe7   :  { %v4297_v41 = vpop.f32.mrb[6].mxu0  ;;  %v277_v48 = vadd.f32 %v261_v44, %v5336_v40 }
  0xe8   :  { %v170_v43 = vpop.f32.mrb[7].mxu0  ;;  %v5339_v45 = vadd.f32 %v4297_v41, %v4069_v20  ;;  %4632 = vtanh.f32 %v278_v46  ;;  %v4083_v3 = vmul.f32 -1.442695, %v278_v46 }
  0xe9   :  { %v5343_v49 = vadd.f32 %v4069_v20, %v170_v43  ;;  %4634 = vtanh.f32 %v277_v48  ;;  %v4082_v2 = vmul.f32 -1.442695, %v277_v48 }
  0xea   :  { %v280_v50 = vadd.f32 %v264_v47, %v5339_v45 }
  0xeb   :  { %v279_v54 = vadd.f32 %v263_v52, %v5343_v49 }
  0xec   :  { %v4625_v51 = vpop.eup %4624  ;;  %4636 = vtanh.f32 %v280_v50  ;;  %v4085_v6 = vmul.f32 -1.442695, %v280_v50 }
  0xed   :  { %353 = vrot.lane.b32.xlu1 %v4625_v51, %s5203_s0  ;;  %4638 = vtanh.f32 %v279_v54  ;;  %v4084_v7 = vmul.f32 -1.442695, %v279_v54 }
  0xee   :  { %v4627_v53 = vpop.eup %4626  ;;  %4640 = vpow2.f32 %v4078_v61 }
  0xef   :  { %v4629_v55 = vpop.eup %4628  ;;  %4642 = vpow2.f32 %v4079_v62 }
  0xf0   :  { %355 = vrot.lane.b32.xlu0 %v4629_v55, %s5203_s0  ;;  %v4631_v56 = vpop.eup %4630  ;;  %4644 = vpow2.f32 %v4081_v63 }
  0xf1   :  { %359 = vrot.lane.b32.xlu1 %v4627_v53, %s5203_s0  ;;  %4646 = vpow2.f32 %v4080_v1 }
  0xf2   :  { %v4633_v57 = vpop.eup %4632  ;;  %4648 = vpow2.f32 %v4082_v2 }
  0xf3   :  { %v4635_v58 = vpop.eup %4634  ;;  %4650 = vpow2.f32 %v4083_v3 }
  0xf4   :  { %357 = vrot.lane.b32.xlu0 %v4631_v56, %s5203_s0  ;;  %4652 = vpow2.f32 %v4085_v6 }
  0xf5   :  { %363 = vrot.lane.b32.xlu1 %v4633_v57, %s5203_s0  ;;  %4654 = vpow2.f32 %v4084_v7 }
  0xf6   :  { %v4637_v59 = vpop.eup %4636 }
  0xf7   :  { %v4639_v60 = vpop.eup %4638 }
  0xf8   :  { %361 = vrot.lane.b32.xlu0 %v4635_v58, %s5203_s0  ;;  %v4641_v5 = vpop.eup %4640 }
  0xf9   :  { %367 = vrot.lane.b32.xlu1 %v4637_v59, %s5203_s0  ;;  %v4643_v8 = vpop.eup %4642  ;;  %v305_v9 = vadd.f32 1.0, %v4641_v5 }
  0xfa   :  { %v4645_v10 = vpop.eup %4644  ;;  %v306_v11 = vadd.f32 1.0, %v4643_v8 }
  0xfb   :  { %4656 = vrcp.f32 %v305_v9  ;;  %v308_v12 = vadd.f32 1.0, %v4645_v10  ;;  %v4647_v13 = vpop.eup %4646 }
  0xfc   :  { %365 = vrot.lane.b32.xlu0 %v4639_v60, %s5203_s0  ;;  %4658 = vrcp.f32 %v306_v11  ;;  %v4649_v14 = vpop.eup %4648  ;;  %v307_v15 = vadd.f32 1.0, %v4647_v13 }
  0xfd   :  { %4660 = vrcp.f32 %v308_v12  ;;  %v4651_v16 = vpop.eup %4650  ;;  %v309_v17 = vadd.f32 1.0, %v4649_v14 }
  0xfe   :  { %v4653_v18 = vpop.eup %4652  ;;  %4662 = vrcp.f32 %v307_v15  ;;  %v310_v19 = vadd.f32 1.0, %v4651_v16 }
  0xff   :  { %v4655_v20 = vpop.eup %4654  ;;  %4664 = vrcp.f32 %v309_v17  ;;  %v312_v25 = vadd.f32 1.0, %v4653_v18 }
 0x100   :  { %4666 = vrcp.f32 %v310_v19  ;;  %v311_v26 = vadd.f32 1.0, %v4655_v20 }
 0x101   :  { %4668 = vrcp.f32 %v312_v25 }
 0x102   :  { %4670 = vrcp.f32 %v311_v26 }
 0x105   :  { %v5355_v21 = vpop.eup %4656 }
 0x106   :  { %v5358_v27 = vpop.eup %4658  ;;  %v337_v55 = vmul.f32 0.0, %v5355_v21 }
 0x107   :  { %v5361_v31 = vpop.eup %4660  ;;  %v338_v59 = vmul.f32 0.0, %v5358_v27 }
 0x108   :  { %v5367_v37 = vpop.eup %4662  ;;  %v340_v58 = vmul.f32 0.0, %v5361_v31 }
 0x109   :  { %v5370_v42 = vpop.eup %4664  ;;  %v339_v1 = vmul.f32 0.0, %v5367_v37 }
 0x10a   :  { %v5373_v44 = vpop.eup %4666  ;;  %v341_v5 = vmul.f32 0.0, %v5370_v42 }
 0x10b   :  { %v5378_v50 = vpop.eup %4668  ;;  %v342_v7 = vmul.f32 0.0, %v5373_v44 }
 0x10c   :  { %v5381_v51 = vpop.eup %4670  ;;  %v344_v13 = vmul.f32 0.0, %v5378_v50 }
 0x10d   :  { %v343_v12 = vmul.f32 0.0, %v5381_v51 }
 0x15f   :  { %v354_v23 = vpop.permute.xlu1 %353 }
 0x160   :  { %v377_v24 = vmul.f32 %v5355_v21, %v354_v23 }
 0x162   :  { %v356_v30 = vpop.permute.xlu0 %355  ;;  %393 = vrot.lane.b32.xlu0 %v377_v24, %s5204_s3 }
 0x163   :  { %v360_v33 = vpop.permute.xlu1 %359  ;;  %v378_v34 = vmul.f32 %v5358_v27, %v356_v30 }
 0x164   :  { %v380_v35 = vmul.f32 %v5361_v31, %v360_v33 }
 0x166   :  { %v358_v36 = vpop.permute.xlu0 %357  ;;  %399 = vrot.lane.b32.xlu1 %v380_v35, %s5204_s3  ;;  %395 = vrot.lane.b32.xlu0 %v378_v34, %s5204_s3 }
 0x167   :  { %v379_v39 = vmul.f32 %v5367_v37, %v358_v36  ;;  %v364_v41 = vpop.permute.xlu1 %363 }
 0x168   :  { %v382_v47 = vmul.f32 %v5373_v44, %v364_v41 }
 0x16a   :  { %v362_v43 = vpop.permute.xlu0 %361  ;;  %397 = vrot.lane.b32.xlu1 %v379_v39, %s5204_s3 }
 0x16b   :  { %v381_v46 = vmul.f32 %v5370_v42, %v362_v43  ;;  %v368_v48 = vpop.permute.xlu1 %367 }
 0x16c   :  { %v384_v53 = vmul.f32 %v5378_v50, %v368_v48 }
 0x16d   :  { %401 = vrot.lane.b32.xlu0 %v381_v46, %s5204_s3 }
 0x16e   :  { %403 = vrot.lane.b32.xlu1 %v382_v47, %s5204_s3  ;;  %v366_v52 = vpop.permute.xlu0 %365 }
 0x16f   :  { %v383_v54 = vmul.f32 %v5381_v51, %v366_v52 }
 0x171   :  { %405 = vrot.lane.b32.xlu0 %v383_v54, %s5204_s3 }
 0x172   :  { %407 = vrot.lane.b32.xlu1 %v384_v53, %s5204_s3 }
 0x1d4   :  { %v394_v56 = vpop.permute.xlu0 %393 }
 0x1d5   :  { %v5388_v57 = vadd.f32 %v394_v56, %v337_v55 }
 0x1d7   :  { %4672 = vtanh.f32 %v5388_v57 }
 0x1d8   :  { %v400_v60 = vpop.permute.xlu1 %399  ;;  %v396_v61 = vpop.permute.xlu0 %395 }
 0x1d9   :  { %v5393_v62 = vadd.f32 %v400_v60, %v340_v58  ;;  %v5395_v63 = vadd.f32 %v396_v61, %v338_v59 }
 0x1db   :  { %4674 = vtanh.f32 %v5393_v62 }
 0x1dc   :  { %4676 = vtanh.f32 %v5395_v63  ;;  %v398_v2 = vpop.permute.xlu1 %397 }
 0x1dd   :  { %v5400_v3 = vadd.f32 %v398_v2, %v339_v1 }
 0x1df   :  { %4678 = vtanh.f32 %v5400_v3  ;;  %v402_v6 = vpop.permute.xlu0 %401 }
 0x1e0   :  { %v5405_v8 = vadd.f32 %v402_v6, %v341_v5  ;;  %v404_v9 = vpop.permute.xlu1 %403 }
 0x1e1   :  { %v4673_v10 = vpop.eup %4672  ;;  %v5407_v11 = vadd.f32 %v404_v9, %v342_v7 }
 0x1e2   :  { %4680 = vtanh.f32 %v5405_v8  ;;  %441 = vrot.lane.b32.xlu0 %v4673_v10, %s5203_s0 }
 0x1e3   :  { %4682 = vtanh.f32 %v5407_v11  ;;  %v406_v14 = vpop.permute.xlu0 %405 }
 0x1e4   :  { %v408_v15 = vpop.permute.xlu1 %407  ;;  %v5414_v17 = vadd.f32 %v406_v14, %v343_v12 }
 0x1e5   :  { %v4675_v16 = vpop.eup %4674  ;;  %v5416_v18 = vadd.f32 %v408_v15, %v344_v13 }
 0x1e6   :  { %v4677_v19 = vpop.eup %4676  ;;  %447 = vrot.lane.b32.xlu1 %v4675_v16, %s5203_s0  ;;  %4684 = vtanh.f32 %v5414_v17 }
 0x1e7   :  { %443 = vrot.lane.b32.xlu0 %v4677_v19, %s5203_s0  ;;  %4686 = vtanh.f32 %v5416_v18 }
 0x1e9   :  { %v4679_v20 = vpop.eup %4678 }
 0x1ea   :  { %445 = vrot.lane.b32.xlu1 %v4679_v20, %s5203_s0 }
 0x1ec   :  { %v4681_v23 = vpop.eup %4680 }
 0x1ed   :  { %v4683_v24 = vpop.eup %4682  ;;  %449 = vrot.lane.b32.xlu0 %v4681_v23, %s5203_s0 }
 0x1ee   :  { %451 = vrot.lane.b32.xlu1 %v4683_v24, %s5203_s0 }
 0x1f0   :  { %v4685_v25 = vpop.eup %4684 }
 0x1f1   :  { %v4687_v26 = vpop.eup %4686  ;;  %453 = vrot.lane.b32.xlu0 %v4685_v25, %s5203_s0 }
 0x1f2   :  { %455 = vrot.lane.b32.xlu1 %v4687_v26, %s5203_s0 }
 0x254   :  { %v442_v30 = vpop.permute.xlu0 %441 }
 0x255   :  { %v465_v46 = vmul.f32 %v5355_v21, %v442_v30 }
 0x258   :  { %v448_v33 = vpop.permute.xlu1 %447 }
 0x259   :  { %v444_v34 = vpop.permute.xlu0 %443  ;;  %v468_v36 = vmul.f32 %v5361_v31, %v448_v33 }
 0x25a   :  { %v466_v35 = vmul.f32 %v5358_v27, %v444_v34 }
 0x25b   :  { %v487_v52 = vrot.slane %v468_v36, 5 }
 0x25c   :  { %v481_v39 = vrot.slane %v466_v35, 7  ;;  %v446_v41 = vpop.permute.xlu1 %445 }
 0x25d   :  { %v467_v43 = vmul.f32 %v5367_v37, %v446_v41 }
 0x25e   :  { %v483_v53 = vsel %vm482_vm2, %v481_v39, %v465_v46 }
 0x25f   :  { %v484_v47 = vrot.slane %v467_v43, 6  ;;  %v450_v48 = vpop.permute.xlu0 %449 }
 0x260   :  { %v469_v54 = vmul.f32 %v5370_v42, %v450_v48  ;;  %v452_v55 = vpop.permute.xlu1 %451 }
 0x261   :  { %v486_v27 = vsel %vm485_vm3, %v484_v47, %v483_v53  ;;  %v470_v31 = vmul.f32 %v5373_v44, %v452_v55 }
 0x262   :  { %v489_v56 = vsel %vm488_vm4, %v487_v52, %v486_v27  ;;  %v490_v37 = vrot.slane %v469_v54, 4 }
 0x263   :  { %v493_v58 = vrot.slane %v470_v31, 3  ;;  %v454_v59 = vpop.permute.xlu0 %453 }
 0x264   :  { %v492_v21 = vsel %vm491_vm5, %v490_v37, %v489_v56  ;;  %v471_v60 = vmul.f32 %v5381_v51, %v454_v59  ;;  %v456_v61 = vpop.permute.xlu1 %455 }
 0x265   :  { %v472_v1 = vmul.f32 %v5378_v50, %v456_v61  ;;  %v495_v42 = vsel %vm494_vm6, %v493_v58, %v492_v21 }
 0x266   :  { %v496_v2 = vrot.slane %v471_v60, 2 }
 0x267   :  { %v499_v5 = vrot.slane %v472_v1, 1 }
 0x268   :  { %v498_v44 = vsel %vm497_vm7, %v496_v2, %v495_v42 }
 0x269   :  { %v501_v6 = vsel %vm500_vm8, %v499_v5, %v498_v44 }
 0x26a   :  { %502 = vrot.lane.b32.xlu0 %v501_v6, %s5204_s3 }
 0x2dc   :  { %v503_v7 = vpop.permute.xlu0 %502 }
 0x2dd   :  { %505 = vst.msk [vmem:[#allocation2] sm:$0xff] %vm183_vm9, %v503_v7  ;;  %4318 = vmatmul.mubr.msk.f32.vlgmr.msra.gmra.mrb[2].mxu1 %vm183_vm9, %v503_v7 }
 0x2de   :  { %4339 = vmatprep.mubr.msk.f32.mxu1 %vm5201_vm1, %v5202_v4 }
 0x3b0   :  { %v578_v50 = vpop.f32.mrb[2].mxu1 }
 0x3b1   :  { %v4319_v51 = vpop.f32.mrb[3].mxu1  ;;  %v584_v9 = vrot.slane %v578_v50, 1  ;;  %v583_v10 = vrot.slane %v578_v50, 7  ;;  %v599_v12 = vadd.f32 %v578_v50, %v5327_v29  ;;  %v585_v13 = vrot.slane %v578_v50, 2 }
 0x3b2   :  { %v586_v15 = vrot.slane %v578_v50, 3  ;;  %v587_v19 = vrot.slane %v578_v50, 4  ;;  %v588_v23 = vrot.slane %v578_v50, 5  ;;  %v589_v25 = vrot.slane %v578_v50, 6 }
 0x3b3   :  { %v600_v14 = vadd.f32 %v584_v9, %v5330_v32  ;;  %v598_v16 = vadd.f32 %v583_v10, %v5323_v22  ;;  %4688 = vtanh.f32 %v599_v12  ;;  %v601_v20 = vadd.f32 %v585_v13, %v5325_v28 }
 0x3b4   :  { %v602_v24 = vadd.f32 %v586_v15, %v5336_v40  ;;  %v603_v26 = vadd.f32 %v587_v19, %v5334_v38  ;;  %v604_v30 = vadd.f32 %v588_v23, %v5343_v49  ;;  %v605_v33 = vadd.f32 %v589_v25, %v5339_v45 }
 0x3b5   :  { %4690 = vtanh.f32 %v600_v14  ;;  %v4088_v48 = vmul.f32 -1.442695, %v599_v12  ;;  %v4089_v52 = vmul.f32 -1.442695, %v600_v14  ;;  %v4087_v53 = vmul.f32 -1.442695, %v598_v16 }
 0x3b6   :  { %4692 = vtanh.f32 %v598_v16  ;;  %v4090_v54 = vmul.f32 -1.442695, %v601_v20  ;;  %v4091_v55 = vmul.f32 -1.442695, %v602_v24  ;;  %v4092_v27 = vmul.f32 -1.442695, %v603_v26 }
 0x3b7   :  { %4694 = vtanh.f32 %v601_v20  ;;  %v4093_v31 = vmul.f32 -1.442695, %v604_v30  ;;  %v4094_v56 = vmul.f32 -1.442695, %v605_v33 }
 0x3b8   :  { %4696 = vtanh.f32 %v602_v24 }
 0x3b9   :  { %4698 = vtanh.f32 %v603_v26 }
 0x3ba   :  { %4700 = vtanh.f32 %v604_v30 }
 0x3bb   :  { %4702 = vtanh.f32 %v605_v33 }
 0x3bc   :  { %4704 = vpow2.f32 %v4088_v48 }
 0x3bd   :  { %v4689_v34 = vpop.eup %4688  ;;  %4706 = vpow2.f32 %v4089_v52 }
 0x3be   :  { %704 = vrot.lane.b32.xlu1 %v4689_v34, %s5203_s0  ;;  %4708 = vpow2.f32 %v4087_v53  ;;  %v671_v53 = vrot.slane %v5395_v63, 7 }
 0x3bf   :  { %v4691_v35 = vpop.eup %4690  ;;  %4710 = vpow2.f32 %v4090_v54  ;;  %v672_v54 = vrot.slane %v5400_v3, 7 }
 0x3c0   :  { %706 = vrot.lane.b32.xlu0 %v4691_v35, %s5203_s0  ;;  %v4693_v36 = vpop.eup %4692  ;;  %4712 = vpow2.f32 %v4091_v55 }
 0x3c1   :  { %v4695_v39 = vpop.eup %4694  ;;  %4714 = vpow2.f32 %v4092_v27 }
 0x3c2   :  { %702 = vrot.lane.b32.xlu1 %v4693_v36, %s5203_s0  ;;  %v4697_v41 = vpop.eup %4696  ;;  %4716 = vpow2.f32 %v4093_v31 }
 0x3c3   :  { %v4699_v43 = vpop.eup %4698  ;;  %4718 = vpow2.f32 %v4094_v56  ;;  %v670_v56 = vrot.slane %v5388_v57, 7 }
 0x3c4   :  { %708 = vrot.lane.b32.xlu0 %v4695_v39, %s5203_s0  ;;  %v4701_v46 = vpop.eup %4700 }
 0x3c5   :  { %v4703_v47 = vpop.eup %4702 }
 0x3c6   :  { %710 = vrot.lane.b32.xlu1 %v4697_v41, %s5203_s0  ;;  %v4705_v37 = vpop.eup %4704 }
 0x3c7   :  { %v4707_v58 = vpop.eup %4706  ;;  %v631_v21 = vadd.f32 1.0, %v4705_v37 }
 0x3c8   :  { %712 = vrot.lane.b32.xlu0 %v4699_v43, %s5203_s0  ;;  %v4709_v59 = vpop.eup %4708  ;;  %v632_v60 = vadd.f32 1.0, %v4707_v58 }
 0x3c9   :  { %v4711_v61 = vpop.eup %4710  ;;  %4720 = vrcp.f32 %v631_v21  ;;  %v630_v1 = vadd.f32 1.0, %v4709_v59  ;;  %v673_v21 = vrot.slane %v5393_v62, 7 }
 0x3ca   :  { %714 = vrot.lane.b32.xlu1 %v4701_v46, %s5203_s0  ;;  %v4713_v42 = vpop.eup %4712  ;;  %4722 = vrcp.f32 %v632_v60  ;;  %v633_v2 = vadd.f32 1.0, %v4711_v61  ;;  %v674_v61 = vrot.slane %v5405_v8, 7 }
 0x3cb   :  { %v4715_v5 = vpop.eup %4714  ;;  %4724 = vrcp.f32 %v630_v1  ;;  %v634_v44 = vadd.f32 1.0, %v4713_v42  ;;  %v675_v42 = vrot.slane %v5407_v11, 7 }
 0x3cc   :  { %716 = vrot.lane.b32.xlu0 %v4703_v47, %s5203_s0  ;;  %v4717_v6 = vpop.eup %4716  ;;  %4726 = vrcp.f32 %v633_v2  ;;  %v635_v7 = vadd.f32 1.0, %v4715_v5 }
 0x3cd   :  { %v4719_v50 = vpop.eup %4718  ;;  %4728 = vrcp.f32 %v634_v44  ;;  %v636_v51 = vadd.f32 1.0, %v4717_v6  ;;  %v676_v6 = vrot.slane %v5414_v17, 7 }
 0x3ce   :  { %4730 = vrcp.f32 %v635_v7  ;;  %v637_v9 = vadd.f32 1.0, %v4719_v50  ;;  %v677_v50 = vrot.slane %v5416_v18, 7 }
 0x3cf   :  { %4732 = vrcp.f32 %v636_v51 }
 0x3d0   :  { %4734 = vrcp.f32 %v637_v9 }
 0x3d3   :  { %v5463_v10 = vpop.eup %4720 }
 0x3d4   :  { %v5465_v13 = vpop.eup %4722  ;;  %v687_v55 = vmul.f32 %v5463_v10, %v671_v53 }
 0x3d5   :  { %v5470_v19 = vpop.eup %4724  ;;  %v688_v31 = vmul.f32 %v5465_v13, %v672_v54 }
 0x3d6   :  { %v5473_v23 = vpop.eup %4726  ;;  %v686_v63 = vmul.f32 %v5470_v19, %v670_v56 }
 0x3d7   :  { %v5478_v30 = vpop.eup %4728  ;;  %v689_v60 = vmul.f32 %v5473_v23, %v673_v21 }
 0x3d8   :  { %v5481_v34 = vpop.eup %4730  ;;  %v690_v62 = vmul.f32 %v5478_v30, %v674_v61 }
 0x3d9   :  { %v5486_v41 = vpop.eup %4732  ;;  %v691_v44 = vmul.f32 %v5481_v34, %v675_v42 }
 0x3da   :  { %v5489_v46 = vpop.eup %4734  ;;  %v692_v11 = vmul.f32 %v5486_v41, %v676_v6 }
 0x430   :  { %v705_v12 = vpop.permute.xlu1 %704 }
 0x431   :  { %v727_v14 = vmul.f32 %v5463_v10, %v705_v12  ;;  %v693_v12 = vmul.f32 %v5489_v46, %v677_v50 }
 0x432   :  { %v707_v15 = vpop.permute.xlu0 %706 }
 0x433   :  { %v728_v16 = vmul.f32 %v5465_v13, %v707_v15  ;;  %744 = vrot.lane.b32.xlu1 %v727_v14, %s5204_s3 }
 0x434   :  { %v703_v20 = vpop.permute.xlu1 %702 }
 0x435   :  { %746 = vrot.lane.b32.xlu0 %v728_v16, %s5204_s3  ;;  %v726_v24 = vmul.f32 %v5470_v19, %v703_v20 }
 0x436   :  { %v709_v25 = vpop.permute.xlu0 %708 }
 0x437   :  { %v729_v26 = vmul.f32 %v5473_v23, %v709_v25  ;;  %742 = vrot.lane.b32.xlu1 %v726_v24, %s5204_s3 }
 0x438   :  { %v711_v33 = vpop.permute.xlu1 %710 }
 0x439   :  { %748 = vrot.lane.b32.xlu0 %v729_v26, %s5204_s3  ;;  %v730_v35 = vmul.f32 %v5478_v30, %v711_v33 }
 0x43a   :  { %v713_v36 = vpop.permute.xlu0 %712 }
 0x43b   :  { %v731_v39 = vmul.f32 %v5481_v34, %v713_v36  ;;  %750 = vrot.lane.b32.xlu1 %v730_v35, %s5204_s3 }
 0x43c   :  { %v715_v43 = vpop.permute.xlu1 %714 }
 0x43d   :  { %752 = vrot.lane.b32.xlu0 %v731_v39, %s5204_s3  ;;  %v732_v47 = vmul.f32 %v5486_v41, %v715_v43 }
 0x43e   :  { %v717_v48 = vpop.permute.xlu0 %716 }
 0x43f   :  { %v733_v52 = vmul.f32 %v5489_v46, %v717_v48  ;;  %754 = vrot.lane.b32.xlu1 %v732_v47, %s5204_s3 }
 0x441   :  { %756 = vrot.lane.b32.xlu0 %v733_v52, %s5204_s3 }
 0x4a5   :  { %v745_v27 = vpop.permute.xlu1 %744 }
 0x4a6   :  { %v5500_v37 = vadd.f32 %v745_v27, %v687_v55 }
 0x4a7   :  { %v747_v58 = vpop.permute.xlu0 %746 }
 0x4a8   :  { %v5503_v59 = vadd.f32 %v747_v58, %v688_v31  ;;  %4736 = vtanh.f32 %v5500_v37 }
 0x4a9   :  { %v743_v3 = vpop.permute.xlu1 %742 }
 0x4aa   :  { %4738 = vtanh.f32 %v5503_v59  ;;  %v5510_v1 = vadd.f32 %v743_v3, %v686_v63 }
 0x4ab   :  { %v749_v57 = vpop.permute.xlu0 %748 }
 0x4ac   :  { %v5513_v2 = vadd.f32 %v749_v57, %v689_v60  ;;  %4740 = vtanh.f32 %v5510_v1 }
 0x4ad   :  { %v751_v5 = vpop.permute.xlu1 %750 }
 0x4ae   :  { %4742 = vtanh.f32 %v5513_v2  ;;  %v5520_v7 = vadd.f32 %v751_v5, %v690_v62 }
 0x4af   :  { %v753_v8 = vpop.permute.xlu0 %752 }
 0x4b0   :  { %v5523_v51 = vadd.f32 %v753_v8, %v691_v44  ;;  %4744 = vtanh.f32 %v5520_v7 }
 0x4b1   :  { %v755_v9 = vpop.permute.xlu1 %754 }
 0x4b2   :  { %4746 = vtanh.f32 %v5523_v51  ;;  %v4737_v14 = vpop.eup %4736  ;;  %v5529_v15 = vadd.f32 %v755_v9, %v692_v11 }
 0x4b3   :  { %v757_v17 = vpop.permute.xlu0 %756  ;;  %792 = vrot.lane.b32.xlu1 %v4737_v14, %s5203_s0 }
 0x4b4   :  { %v4739_v16 = vpop.eup %4738  ;;  %v5531_v20 = vadd.f32 %v757_v17, %v693_v12  ;;  %4748 = vtanh.f32 %v5529_v15 }
 0x4b5   :  { %794 = vrot.lane.b32.xlu0 %v4739_v16, %s5203_s0 }
 0x4b6   :  { %4750 = vtanh.f32 %v5531_v20  ;;  %v4741_v18 = vpop.eup %4740 }
 0x4b7   :  { %790 = vrot.lane.b32.xlu1 %v4741_v18, %s5203_s0 }
 0x4b8   :  { %v4743_v24 = vpop.eup %4742 }
 0x4b9   :  { %796 = vrot.lane.b32.xlu0 %v4743_v24, %s5203_s0 }
 0x4ba   :  { %v4745_v25 = vpop.eup %4744 }
 0x4bb   :  { %798 = vrot.lane.b32.xlu1 %v4745_v25, %s5203_s0 }
 0x4bc   :  { %v4747_v26 = vpop.eup %4746 }
 0x4bd   :  { %800 = vrot.lane.b32.xlu0 %v4747_v26, %s5203_s0 }
 0x4be   :  { %v4749_v33 = vpop.eup %4748 }
 0x4bf   :  { %802 = vrot.lane.b32.xlu1 %v4749_v33, %s5203_s0 }
 0x4c0   :  { %v4751_v35 = vpop.eup %4750 }
 0x4c1   :  { %804 = vrot.lane.b32.xlu0 %v4751_v35, %s5203_s0 }
 0x525   :  { %v793_v36 = vpop.permute.xlu1 %792 }
 0x526   :  { %v815_v39 = vmul.f32 %v5463_v10, %v793_v36 }
 0x527   :  { %v795_v43 = vpop.permute.xlu0 %794 }
 0x528   :  { %v816_v47 = vmul.f32 %v5465_v13, %v795_v43  ;;  %v830_v53 = vrot.slane %v815_v39, 7 }
 0x529   :  { %v791_v52 = vpop.permute.xlu1 %790 }
 0x52a   :  { %v832_v48 = vrot.slane %v816_v47, 6  ;;  %v814_v54 = vmul.f32 %v5470_v19, %v791_v52  ;;  %v859_v58 = vrot.slane %v816_v47, 7 }
 0x52b   :  { %v797_v55 = vpop.permute.xlu0 %796 }
 0x52c   :  { %v817_v27 = vmul.f32 %v5473_v23, %v797_v55  ;;  %v831_v31 = vsel %vm485_vm3, %v830_v53, %v814_v54  ;;  %v857_v56 = vrot.slane %v814_v54, 1 }
 0x52d   :  { %v833_v21 = vsel %vm488_vm4, %v832_v48, %v831_v31  ;;  %v799_v10 = vpop.permute.xlu1 %798 }
 0x52e   :  { %v834_v63 = vrot.slane %v817_v27, 5  ;;  %v861_v3 = vrot.slane %v817_v27, 6  ;;  %v858_v60 = vsel %vm482_vm2, %v815_v39, %v857_v56  ;;  %v818_v13 = vmul.f32 %v5478_v30, %v799_v10 }
 0x52f   :  { %v801_v61 = vpop.permute.xlu0 %800  ;;  %v860_v19 = vsel %vm485_vm3, %v859_v58, %v858_v60 }
 0x530   :  { %v835_v57 = vsel %vm491_vm5, %v834_v63, %v833_v21  ;;  %v819_v23 = vmul.f32 %v5481_v34, %v801_v61  ;;  %v862_v42 = vsel %vm488_vm4, %v861_v3, %v860_v19  ;;  %v836_v62 = vrot.slane %v818_v13, 4 }
 0x531   :  { %v863_v5 = vrot.slane %v818_v13, 5  ;;  %v803_v8 = vpop.permute.xlu1 %802 }
 0x532   :  { %v838_v44 = vrot.slane %v819_v23, 3  ;;  %v865_v6 = vrot.slane %v819_v23, 4  ;;  %v820_v11 = vmul.f32 %v5486_v41, %v803_v8  ;;  %v837_v30 = vsel %vm494_vm6, %v836_v62, %v835_v57 }
 0x533   :  { %v864_v50 = vsel %vm491_vm5, %v863_v5, %v862_v42  ;;  %v805_v9 = vpop.permute.xlu0 %804 }
 0x534   :  { %v5559_v12 = vmul.f32 %v5489_v46, %v805_v9  ;;  %v866_v14 = vsel %vm494_vm6, %v865_v6, %v864_v50  ;;  %v839_v34 = vsel %vm497_vm7, %v838_v44, %v837_v30  ;;  %v840_v17 = vrot.slane %v820_v11, 2 }
 0x535   :  { %v867_v16 = vrot.slane %v820_v11, 3 }
 0x536   :  { %v869_v18 = vrot.slane %v5559_v12, 2  ;;  %v5566_v25 = vsel %vm500_vm8, %v840_v17, %v839_v34 }
 0x537   :  { %v868_v24 = vsel %vm497_vm7, %v867_v16, %v866_v14 }
 0x538   :  { %v870_v41 = vsel %vm500_vm8, %v869_v18, %v868_v24 }
 0x539   :  { %871 = vrot.lane.b32.xlu1 %v870_v41, %s5204_s3 }
 0x5ab   :  { %v872_v26 = vpop.permute.xlu1 %871 }
 0x5ac   :  { %4329 = vmatmul.mubr.msk.f32.vlgmr.msra.gmra.mrb[8].mxu0 %vm183_vm9, %v872_v26 }
 0x5ad   :  { %4350 = vmatprep.mubr.msk.f32.mxu0 %vm5201_vm1, %v5202_v4 }
 0x67f   :  { %v941_v46 = vpop.f32.mrb[8].mxu0 }
 0x680   :  { %v946_v33 = vrot.slane %v941_v46, 6  ;;  %v4330_v35 = vpop.f32.mrb[9].mxu0  ;;  %v948_v39 = vrot.slane %v941_v46, 1  ;;  %v947_v43 = vrot.slane %v941_v46, 7  ;;  %v963_v47 = vadd.f32 %v941_v46, %v5330_v32 }
 0x681   :  { %v949_v48 = vrot.slane %v941_v46, 2  ;;  %v950_v54 = vrot.slane %v941_v46, 3  ;;  %v951_v27 = vrot.slane %v941_v46, 4  ;;  %v952_v56 = vrot.slane %v941_v46, 5 }
 0x682   :  { %v961_v36 = vadd.f32 %v946_v33, %v5323_v22  ;;  %v964_v52 = vadd.f32 %v948_v39, %v5325_v28  ;;  %v962_v55 = vadd.f32 %v947_v43, %v5327_v29  ;;  %v4098_v42 = vmul.f32 -1.442695, %v963_v47 }
 0x683   :  { %v965_v31 = vadd.f32 %v949_v48, %v5336_v40  ;;  %v966_v58 = vadd.f32 %v950_v54, %v5334_v38  ;;  %v967_v21 = vadd.f32 %v951_v27, %v5343_v49  ;;  %v968_v63 = vadd.f32 %v952_v56, %v5339_v45 }
 0x684   :  { %4752 = vtanh.f32 %v961_v36  ;;  %v4096_v23 = vmul.f32 -1.442695, %v961_v36  ;;  %v4099_v62 = vmul.f32 -1.442695, %v964_v52  ;;  %v4097_v44 = vmul.f32 -1.442695, %v962_v55 }
 0x685   :  { %4754 = vtanh.f32 %v963_v47  ;;  %v4100_v6 = vmul.f32 -1.442695, %v965_v31  ;;  %v4101_v50 = vmul.f32 -1.442695, %v966_v58  ;;  %v4102_v11 = vmul.f32 -1.442695, %v967_v21 }
 0x686   :  { %4756 = vtanh.f32 %v964_v52  ;;  %v4103_v9 = vmul.f32 -1.442695, %v968_v63 }
 0x687   :  { %4758 = vtanh.f32 %v962_v55 }
 0x688   :  { %4760 = vtanh.f32 %v965_v31 }
 0x689   :  { %4762 = vtanh.f32 %v966_v58 }
 0x68a   :  { %4764 = vtanh.f32 %v967_v21 }
 0x68b   :  { %4766 = vtanh.f32 %v968_v63 }
 0x68c   :  { %4768 = vpow2.f32 %v4096_v23 }
 0x68d   :  { %4770 = vpow2.f32 %v4098_v42 }
 0x68e   :  { %v4753_v53 = vpop.eup %4752  ;;  %4772 = vpow2.f32 %v4099_v62 }
 0x68f   :  { %1065 = vrot.lane.b32.xlu0 %v4753_v53, %s5203_s0  ;;  %v4755_v3 = vpop.eup %4754  ;;  %4774 = vpow2.f32 %v4097_v44  ;;  %v1033_v44 = vrot.slane %v5510_v1, 7 }
 0x690   :  { %v4757_v10 = vpop.eup %4756  ;;  %1069 = vrot.lane.b32.xlu1 %v4755_v3, %s5203_s0  ;;  %4776 = vpow2.f32 %v4100_v6 }
 0x691   :  { %v4759_v60 = vpop.eup %4758 }
 0x692   :  { %v4761_v13 = vpop.eup %4760 }
 0x693   :  { %1071 = vrot.lane.b32.xlu0 %v4757_v10, %s5203_s0  ;;  %v4763_v61 = vpop.eup %4762 }
 0x694   :  { %1067 = vrot.lane.b32.xlu1 %v4759_v60, %s5203_s0  ;;  %v4765_v57 = vpop.eup %4764 }
 0x695   :  { %v4767_v19 = vpop.eup %4766 }
 0x696   :  { %v4769_v5 = vpop.eup %4768 }
 0x697   :  { %1073 = vrot.lane.b32.xlu0 %v4761_v13, %s5203_s0  ;;  %v993_v8 = vadd.f32 1.0, %v4769_v5  ;;  %v4771_v30 = vpop.eup %4770 }
 0x698   :  { %1075 = vrot.lane.b32.xlu1 %v4763_v61, %s5203_s0  ;;  %v4773_v14 = vpop.eup %4772  ;;  %v995_v34 = vadd.f32 1.0, %v4771_v30 }
 0x699   :  { %4778 = vrcp.f32 %v993_v8  ;;  %v4775_v17 = vpop.eup %4774  ;;  %v996_v16 = vadd.f32 1.0, %v4773_v14 }
 0x69a   :  { %4780 = vpow2.f32 %v4101_v50  ;;  %v4777_v18 = vpop.eup %4776  ;;  %v994_v26 = vadd.f32 1.0, %v4775_v17  ;;  %v1034_v17 = vrot.slane %v5500_v37, 7  ;;  %v1038_v37 = vrot.slane %v5523_v51, 7 }
 0x69b   :  { %1077 = vrot.lane.b32.xlu0 %v4765_v57, %s5203_s0  ;;  %4782 = vpow2.f32 %v4102_v11  ;;  %v997_v35 = vadd.f32 1.0, %v4777_v18  ;;  %v1035_v11 = vrot.slane %v5503_v59, 7  ;;  %v1037_v18 = vrot.slane %v5520_v7, 7 }
 0x69c   :  { %1079 = vrot.lane.b32.xlu1 %v4767_v19, %s5203_s0  ;;  %4784 = vpow2.f32 %v4103_v9  ;;  %v1036_v9 = vrot.slane %v5513_v2, 7  ;;  %v1039_v7 = vrot.slane %v5529_v15, 7 }
 0x69d   :  { %4786 = vrcp.f32 %v995_v34 }
 0x69e   :  { %4788 = vrcp.f32 %v996_v16 }
 0x69f   :  { %4790 = vrcp.f32 %v994_v26 }
 0x6a0   :  { %4792 = vrcp.f32 %v997_v35 }
 0x6a3   :  { %v5589_v24 = vpop.eup %4778 }
 0x6a4   :  { %v4781_v46 = vpop.eup %4780  ;;  %v1049_v6 = vmul.f32 %v5589_v24, %v1033_v44 }
 0x6a5   :  { %v4783_v36 = vpop.eup %4782  ;;  %v998_v39 = vadd.f32 1.0, %v4781_v46 }
 0x6a6   :  { %v4785_v43 = vpop.eup %4784  ;;  %v999_v47 = vadd.f32 1.0, %v4783_v36 }
 0x6a7   :  { %4794 = vrcp.f32 %v998_v39  ;;  %v1000_v48 = vadd.f32 1.0, %v4785_v43  ;;  %v5593_v52 = vpop.eup %4786 }
 0x6a8   :  { %4796 = vrcp.f32 %v999_v47  ;;  %v5595_v54 = vpop.eup %4788  ;;  %v1051_v30 = vmul.f32 %v5593_v52, %v1035_v11 }
 0x6a9   :  { %4798 = vrcp.f32 %v1000_v48  ;;  %v5600_v56 = vpop.eup %4790  ;;  %v1052_v34 = vmul.f32 %v5595_v54, %v1036_v9  ;;  %v1040_v48 = vrot.slane %v5531_v20, 7 }
 0x6aa   :  { %v5603_v21 = vpop.eup %4792  ;;  %v1050_v59 = vmul.f32 %v5600_v56, %v1034_v17 }
 0x6ab   :  { %v1053_v46 = vmul.f32 %v5603_v21, %v1037_v18 }
 0x6b1   :  { %v5608_v60 = vpop.eup %4794 }
 0x6b2   :  { %v5611_v61 = vpop.eup %4796  ;;  %v1054_v39 = vmul.f32 %v5608_v60, %v1038_v37 }
 0x6b3   :  { %v5616_v42 = vpop.eup %4798  ;;  %v1055_v47 = vmul.f32 %v5611_v61, %v1039_v7 }
 0x6b4   :  { %v1056_v15 = vmul.f32 %v5616_v42, %v1040_v48 }
 0x701   :  { %v1066_v41 = vpop.permute.xlu0 %1065 }
 0x702   :  { %v1089_v33 = vmul.f32 %v5589_v24, %v1066_v41  ;;  %v1070_v53 = vpop.permute.xlu1 %1069 }
 0x703   :  { %v1091_v55 = vmul.f32 %v5593_v52, %v1070_v53 }
 0x704   :  { %1105 = vrot.lane.b32.xlu0 %v1089_v33, %s5204_s3 }
 0x705   :  { %v1072_v27 = vpop.permute.xlu0 %1071  ;;  %1109 = vrot.lane.b32.xlu1 %v1091_v55, %s5204_s3 }
 0x706   :  { %v1092_v31 = vmul.f32 %v5595_v54, %v1072_v27  ;;  %v1068_v58 = vpop.permute.xlu1 %1067 }
 0x707   :  { %v1090_v63 = vmul.f32 %v5600_v56, %v1068_v58 }
 0x708   :  { %1111 = vrot.lane.b32.xlu0 %v1092_v31, %s5204_s3 }
 0x709   :  { %v1074_v3 = vpop.permute.xlu0 %1073  ;;  %1107 = vrot.lane.b32.xlu1 %v1090_v63, %s5204_s3 }
 0x70a   :  { %v1093_v10 = vmul.f32 %v5603_v21, %v1074_v3  ;;  %v1076_v13 = vpop.permute.xlu1 %1075 }
 0x70b   :  { %v1094_v57 = vmul.f32 %v5608_v60, %v1076_v13  ;;  %v1217_v13 = vld [vmem:[%s6542_s2 + $0x8] sm:$0xff] }
 0x70c   :  { %1113 = vrot.lane.b32.xlu0 %v1093_v10, %s5204_s3  ;;  %v1216_v10 = vld [vmem:[%s6542_s2] sm:$0xff] }
 0x70d   :  { %v1078_v19 = vpop.permute.xlu0 %1077  ;;  %1115 = vrot.lane.b32.xlu1 %v1094_v57, %s5204_s3  ;;  %v1218_v57 = vld [vmem:[%s6542_s2 + $0x10] sm:$0xff] }
 0x70e   :  { %v1095_v23 = vmul.f32 %v5611_v61, %v1078_v19  ;;  %v1080_v62 = vpop.permute.xlu1 %1079  ;;  %v5675_v19 = vpack.c.bf16 %v1217_v13, %v1216_v10 }
 0x70f   :  { %v1096_v5 = vmul.f32 %v5616_v42, %v1080_v62 }
 0x710   :  { %1117 = vrot.lane.b32.xlu0 %v1095_v23, %s5204_s3  ;;  %v1219_v23 = vld [vmem:[%s6542_s2 + $0x18] sm:$0xff]  ;;  %4529 = vmatpush3.bf16.msra.mxu1 %v5675_v19 }
 0x711   :  { %1119 = vrot.lane.b32.xlu1 %v1096_v5, %s5204_s3  ;;  %v4531_v5 = vpack.c.bf16 %v1219_v23, %v1218_v57  ;;  %4535 = vmatpush3.bf16.msra.mxu0 %v5675_v19 }
 0x712   :  { %4530 = vmatprep.subr.bf16.mxu1 %v5200_v0  ;;  %4536 = vmatprep.subr.bf16.mxu0 %v5200_v0 }
 0x714   :  { %4532 = vmatpush3.bf16.msra.mxu1 %v4531_v5 }
 0x715   :  { %4538 = vmatpush3.bf16.msra.mxu0 %v4531_v5  ;;  %4539 = vmatprep.subr.bf16.mxu1 %v5200_v0 }
 0x716   :  { %4545 = vmatprep.subr.bf16.mxu0 %v5200_v0 }
 0x776   :  { %v1106_v8 = vpop.permute.xlu0 %1105 }
 0x777   :  { %v5623_v50 = vadd.f32 %v1106_v8, %v1049_v6  ;;  %v1110_v14 = vpop.permute.xlu1 %1109 }
 0x778   :  { %v5631_v16 = vadd.f32 %v1110_v14, %v1051_v30 }
 0x779   :  { %4800 = vtanh.f32 %v5623_v50 }
 0x77a   :  { %v1112_v1 = vpop.permute.xlu0 %1111  ;;  %4802 = vtanh.f32 %v5631_v16 }
 0x77b   :  { %v5634_v41 = vadd.f32 %v1112_v1, %v1052_v34  ;;  %v1108_v2 = vpop.permute.xlu1 %1107 }
 0x77c   :  { %v5642_v33 = vadd.f32 %v1108_v2, %v1050_v59 }
 0x77d   :  { %4804 = vtanh.f32 %v5634_v41 }
 0x77e   :  { %v1114_v35 = vpop.permute.xlu0 %1113  ;;  %4806 = vtanh.f32 %v5642_v33 }
 0x77f   :  { %v5645_v36 = vadd.f32 %v1114_v35, %v1053_v46  ;;  %v1116_v43 = vpop.permute.xlu1 %1115 }
 0x780   :  { %v5652_v53 = vadd.f32 %v1116_v43, %v1054_v39 }
 0x781   :  { %4808 = vtanh.f32 %v5645_v36 }
 0x782   :  { %v1118_v51 = vpop.permute.xlu0 %1117  ;;  %4810 = vtanh.f32 %v5652_v53 }
 0x783   :  { %v4801_v26 = vpop.eup %4800  ;;  %v5654_v55 = vadd.f32 %v1118_v51, %v1055_v47  ;;  %v1120_v27 = vpop.permute.xlu1 %1119 }
 0x784   :  { %1153 = vrot.lane.b32.xlu0 %v4801_v26, %s5203_s0  ;;  %v4803_v31 = vpop.eup %4802  ;;  %v5659_v58 = vadd.f32 %v1120_v27, %v1056_v15 }
 0x785   :  { %4812 = vtanh.f32 %v5654_v55  ;;  %1157 = vrot.lane.b32.xlu1 %v4803_v31, %s5203_s0 }
 0x786   :  { %4814 = vtanh.f32 %v5659_v58 }
 0x787   :  { %v4805_v63 = vpop.eup %4804 }
 0x788   :  { %1159 = vrot.lane.b32.xlu0 %v4805_v63, %s5203_s0  ;;  %v4807_v20 = vpop.eup %4806 }
 0x789   :  { %1155 = vrot.lane.b32.xlu1 %v4807_v20, %s5203_s0 }
 0x78b   :  { %v4809_v3 = vpop.eup %4808 }
 0x78c   :  { %1161 = vrot.lane.b32.xlu0 %v4809_v3, %s5203_s0  ;;  %v4811_v62 = vpop.eup %4810 }
 0x78d   :  { %1163 = vrot.lane.b32.xlu1 %v4811_v62, %s5203_s0 }
 0x78f   :  { %v4813_v44 = vpop.eup %4812 }
 0x790   :  { %1165 = vrot.lane.b32.xlu0 %v4813_v44, %s5203_s0  ;;  %v4815_v6 = vpop.eup %4814 }
 0x791   :  { %1167 = vrot.lane.b32.xlu1 %v4815_v6, %s5203_s0 }
 0x7f6   :  { %v1154_v8 = vpop.permute.xlu0 %1153 }
 0x7f7   :  { %v1158_v11 = vpop.permute.xlu1 %1157  ;;  %v1177_v30 = vmul.f32 %v5589_v24, %v1154_v8 }
 0x7f8   :  { %v1179_v34 = vmul.f32 %v5593_v52, %v1158_v11 }
 0x7f9   :  { %v1220_v26 = vrot.slane %v1177_v30, 2 }
 0x7fa   :  { %v1160_v9 = vpop.permute.xlu0 %1159  ;;  %v1195_v7 = vrot.slane %v1179_v34, 6 }
 0x7fb   :  { %v1180_v14 = vmul.f32 %v5595_v54, %v1160_v9  ;;  %v1156_v17 = vpop.permute.xlu1 %1155 }
 0x7fc   :  { %v1178_v1 = vmul.f32 %v5600_v56, %v1156_v17 }
 0x7fd   :  { %v1197_v37 = vrot.slane %v1180_v14, 5  ;;  %v1224_v35 = vrot.slane %v1180_v14, 7 }
 0x7fe   :  { %v1162_v18 = vpop.permute.xlu0 %1161  ;;  %v1193_v2 = vrot.slane %v1178_v1, 7  ;;  %v1221_v46 = vrot.slane %v1178_v1, 1 }
 0x7ff   :  { %v1181_v59 = vmul.f32 %v5603_v21, %v1162_v18  ;;  %v1164_v39 = vpop.permute.xlu1 %1163 }
 0x800   :  { %v1194_v24 = vsel %vm488_vm4, %v1193_v2, %v1177_v30  ;;  %v1222_v54 = vsel %vm482_vm2, %v1221_v46, %v1220_v26  ;;  %v1182_v52 = vmul.f32 %v5608_v60, %v1164_v39 }
 0x801   :  { %v1199_v43 = vrot.slane %v1181_v59, 4  ;;  %v1226_v47 = vrot.slane %v1181_v59, 6  ;;  %v1223_v56 = vsel %vm485_vm3, %v1179_v34, %v1222_v54  ;;  %v1196_v21 = vsel %vm491_vm5, %v1195_v7, %v1194_v24 }
 0x802   :  { %v1166_v48 = vpop.permute.xlu0 %1165  ;;  %v1225_v15 = vsel %vm488_vm4, %v1224_v35, %v1223_v56  ;;  %v1201_v27 = vrot.slane %v1182_v52, 3  ;;  %v1228_v31 = vrot.slane %v1182_v52, 5  ;;  %v1198_v63 = vsel %vm494_vm6, %v1197_v37, %v1196_v21 }
 0x803   :  { %v1183_v51 = vmul.f32 %v5611_v61, %v1166_v48  ;;  %v1227_v20 = vsel %vm491_vm5, %v1226_v47, %v1225_v15  ;;  %v1168_v3 = vpop.permute.xlu1 %1167  ;;  %v1200_v13 = vsel %vm497_vm7, %v1199_v43, %v1198_v63 }
 0x804   :  { %v1184_v60 = vmul.f32 %v5616_v42, %v1168_v3  ;;  %v1229_v23 = vsel %vm494_vm6, %v1228_v31, %v1227_v20  ;;  %v5707_v61 = vsel %vm500_vm8, %v1201_v27, %v1200_v13 }
 0x805   :  { %v1230_v10 = vrot.slane %v1183_v51, 4  ;;  %v1203_v57 = vrot.slane %v1183_v51, 2 }
 0x806   :  { %v1204_v44 = vrot.slane %v1184_v60, 1  ;;  %v1232_v6 = vrot.slane %v1184_v60, 3 }
 0x807   :  { %v1231_v62 = vsel %vm497_vm7, %v1230_v10, %v1229_v23 }
 0x808   :  { %v1233_v8 = vsel %vm500_vm8, %v1232_v6, %v1231_v62  ;;  %v5712_v11 = vsel %vm482_vm2, %v1204_v44, %v1203_v57 }
 0x809   :  { %1234 = vrot.lane.b32.xlu0 %v1233_v8, %s5204_s3 }
 0x87b   :  { %v1235_v9 = vpop.permute.xlu0 %1234 }
 0x87c   :  { %4340 = vmatmul.mubr.msk.f32.vlgmr.msra.gmra.mrb[4].mxu1 %vm183_vm9, %v1235_v9 }
 0x87d   :  { %4541 = vmatpush3.bf16.msra.mxu1 %v5675_v19  ;;  %4361 = vmatprep.mubr.msk.f32.mxu1 %vm5201_vm1, %v5202_v4 }
 0x87e   :  { %4542 = vmatprep.subr.bf16.mxu1 %v5200_v0 }
 0x881   :  { %4544 = vmatpush3.bf16.msra.mxu1 %v4531_v5 }
 0x882   :  { %4551 = vmatprep.subr.bf16.mxu1 %v5200_v0 }
 0x94f   :  { %v1304_v42 = vpop.f32.mrb[4].mxu1 }
 0x950   :  { %v4341_v30 = vpop.f32.mrb[5].mxu1  ;;  %v1310_v14 = vrot.slane %v1304_v42, 6  ;;  %v1312_v34 = vrot.slane %v1304_v42, 1  ;;  %v1309_v1 = vrot.slane %v1304_v42, 5  ;;  %v1327_v18 = vadd.f32 %v1304_v42, %v5325_v28 }
 0x951   :  { %v1313_v26 = vrot.slane %v1304_v42, 2  ;;  %v1311_v59 = vrot.slane %v1304_v42, 7  ;;  %v1315_v5 = vrot.slane %v1304_v42, 4  ;;  %v1314_v37 = vrot.slane %v1304_v42, 3 }
 0x952   :  { %v1325_v17 = vadd.f32 %v1310_v14, %v5327_v29  ;;  %v1328_v19 = vadd.f32 %v1312_v34, %v5336_v40  ;;  %v1324_v2 = vadd.f32 %v1309_v1, %v5323_v22  ;;  %v4108_v15 = vmul.f32 -1.442695, %v1327_v18 }
 0x953   :  { %v1329_v46 = vadd.f32 %v1313_v26, %v5334_v38  ;;  %v1326_v35 = vadd.f32 %v1311_v59, %v5330_v32  ;;  %v1331_v7 = vadd.f32 %v1315_v5, %v5339_v45  ;;  %v1330_v43 = vadd.f32 %v1314_v37, %v5343_v49 }
 0x954   :  { %4816 = vtanh.f32 %v1325_v17  ;;  %v4106_v21 = vmul.f32 -1.442695, %v1325_v17  ;;  %v4109_v27 = vmul.f32 -1.442695, %v1328_v19  ;;  %v4105_v31 = vmul.f32 -1.442695, %v1324_v2 }
 0x955   :  { %4818 = vtanh.f32 %v1327_v18  ;;  %v4110_v63 = vmul.f32 -1.442695, %v1329_v46  ;;  %v4107_v20 = vmul.f32 -1.442695, %v1326_v35  ;;  %v4112_v3 = vmul.f32 -1.442695, %v1331_v7 }
 0x956   :  { %4820 = vtanh.f32 %v1328_v19  ;;  %v4111_v13 = vmul.f32 -1.442695, %v1330_v43 }
 0x957   :  { %4822 = vtanh.f32 %v1324_v2 }
 0x958   :  { %4824 = vtanh.f32 %v1329_v46 }
 0x959   :  { %4826 = vtanh.f32 %v1326_v35 }
 0x95a   :  { %4828 = vtanh.f32 %v1331_v7 }
 0x95b   :  { %4830 = vtanh.f32 %v1330_v43 }
 0x95c   :  { %4832 = vpow2.f32 %v4106_v21 }
 0x95d   :  { %4834 = vpow2.f32 %v4108_v15 }
 0x95e   :  { %v4817_v39 = vpop.eup %4816  ;;  %4836 = vpow2.f32 %v4109_v27 }
 0x95f   :  { %1430 = vrot.lane.b32.xlu0 %v4817_v39, %s5203_s0  ;;  %v4819_v47 = vpop.eup %4818  ;;  %4838 = vpow2.f32 %v4105_v31 }
 0x960   :  { %1434 = vrot.lane.b32.xlu1 %v4819_v47, %s5203_s0  ;;  %v4821_v24 = vpop.eup %4820  ;;  %4840 = vpow2.f32 %v4110_v63 }
 0x961   :  { %v4823_v54 = vpop.eup %4822  ;;  %4842 = vpow2.f32 %v4107_v20 }
 0x962   :  { %v4825_v52 = vpop.eup %4824  ;;  %4844 = vpow2.f32 %v4112_v3  ;;  %v1397_v3 = vrot.slane %v5642_v33, 7 }
 0x963   :  { %1436 = vrot.lane.b32.xlu0 %v4821_v24, %s5203_s0  ;;  %v4827_v48 = vpop.eup %4826  ;;  %4846 = vpow2.f32 %v4111_v13 }
 0x964   :  { %1428 = vrot.lane.b32.xlu1 %v4823_v54, %s5203_s0  ;;  %v4829_v56 = vpop.eup %4828 }
 0x965   :  { %v4831_v51 = vpop.eup %4830 }
 0x966   :  { %v4833_v10 = vpop.eup %4832 }
 0x967   :  { %1438 = vrot.lane.b32.xlu0 %v4825_v52, %s5203_s0  ;;  %v4835_v60 = vpop.eup %4834  ;;  %v1357_v57 = vadd.f32 1.0, %v4833_v10  ;;  %v1399_v10 = vrot.slane %v5634_v41, 7  ;;  %v1401_v41 = vrot.slane %v5652_v53, 7 }
 0x968   :  { %1432 = vrot.lane.b32.xlu1 %v4827_v48, %s5203_s0  ;;  %v4837_v23 = vpop.eup %4836  ;;  %v1359_v62 = vadd.f32 1.0, %v4835_v60 }
 0x969   :  { %v4839_v44 = vpop.eup %4838  ;;  %4848 = vrcp.f32 %v1357_v57  ;;  %v1360_v6 = vadd.f32 1.0, %v4837_v23  ;;  %v1400_v57 = vrot.slane %v5645_v36, 7 }
 0x96a   :  { %v4841_v8 = vpop.eup %4840  ;;  %4850 = vrcp.f32 %v1359_v62  ;;  %v1356_v9 = vadd.f32 1.0, %v4839_v44 }
 0x96b   :  { %1442 = vrot.lane.b32.xlu0 %v4829_v56, %s5203_s0  ;;  %v4843_v42 = vpop.eup %4842  ;;  %4852 = vrcp.f32 %v1360_v6  ;;  %v1361_v30 = vadd.f32 1.0, %v4841_v8  ;;  %v1396_v6 = vrot.slane %v5623_v50, 7 }
 0x96c   :  { %1440 = vrot.lane.b32.xlu1 %v4831_v51, %s5203_s0  ;;  %v4845_v14 = vpop.eup %4844  ;;  %4854 = vrcp.f32 %v1356_v9  ;;  %v1358_v34 = vadd.f32 1.0, %v4843_v42 }
 0x96d   :  { %v4847_v17 = vpop.eup %4846  ;;  %4856 = vrcp.f32 %v1361_v30  ;;  %v1363_v1 = vadd.f32 1.0, %v4845_v14  ;;  %v1398_v14 = vrot.slane %v5631_v16, 7 }
 0x96e   :  { %4858 = vrcp.f32 %v1358_v34  ;;  %v1362_v19 = vadd.f32 1.0, %v4847_v17 }
 0x96f   :  { %4860 = vrcp.f32 %v1363_v1  ;;  %v1403_v1 = vrot.slane %v5659_v58, 7 }
 0x970   :  { %4862 = vrcp.f32 %v1362_v19 }
 0x973   :  { %v5737_v18 = vpop.eup %4848 }
 0x974   :  { %v5740_v2 = vpop.eup %4850  ;;  %v1413_v13 = vmul.f32 %v5737_v18, %v1397_v3 }
 0x975   :  { %v5744_v37 = vpop.eup %4852  ;;  %v1415_v23 = vmul.f32 %v5740_v2, %v1399_v10 }
 0x976   :  { %v5748_v39 = vpop.eup %4854  ;;  %v1416_v33 = vmul.f32 %v5744_v37, %v1400_v57 }
 0x977   :  { %v5752_v24 = vpop.eup %4856  ;;  %v1412_v36 = vmul.f32 %v5748_v39, %v1396_v6 }
 0x978   :  { %v5756_v48 = vpop.eup %4858  ;;  %v1417_v50 = vmul.f32 %v5752_v24, %v1401_v41 }
 0x979   :  { %v5760_v21 = vpop.eup %4860  ;;  %v1414_v53 = vmul.f32 %v5756_v48, %v1398_v14 }
 0x97a   :  { %v5764_v31 = vpop.eup %4862  ;;  %v1419_v16 = vmul.f32 %v5760_v21, %v1403_v1 }
 0x9d1   :  { %v1431_v26 = vpop.permute.xlu0 %1430 }
 0x9d2   :  { %v1453_v59 = vmul.f32 %v5737_v18, %v1431_v26  ;;  %v1435_v5 = vpop.permute.xlu1 %1434 }
 0x9d3   :  { %v1455_v46 = vmul.f32 %v5740_v2, %v1435_v5 }
 0x9d4   :  { %1470 = vrot.lane.b32.xlu0 %v1453_v59, %s5204_s3  ;;  %v1402_v59 = vrot.slane %v5654_v55, 7 }
 0x9d5   :  { %v1437_v35 = vpop.permute.xlu0 %1436  ;;  %1474 = vrot.lane.b32.xlu1 %v1455_v46, %s5204_s3 }
 0x9d6   :  { %v1456_v7 = vmul.f32 %v5744_v37, %v1437_v35  ;;  %v1429_v43 = vpop.permute.xlu1 %1428  ;;  %v1418_v58 = vmul.f32 %v5764_v31, %v1402_v59 }
 0x9d7   :  { %v1452_v47 = vmul.f32 %v5748_v39, %v1429_v43 }
 0x9d8   :  { %1476 = vrot.lane.b32.xlu0 %v1456_v7, %s5204_s3 }
 0x9d9   :  { %v1439_v54 = vpop.permute.xlu0 %1438  ;;  %1468 = vrot.lane.b32.xlu1 %v1452_v47, %s5204_s3 }
 0x9da   :  { %v1457_v52 = vmul.f32 %v5752_v24, %v1439_v54  ;;  %v1433_v56 = vpop.permute.xlu1 %1432 }
 0x9db   :  { %v1454_v51 = vmul.f32 %v5756_v48, %v1433_v56 }
 0x9dc   :  { %1478 = vrot.lane.b32.xlu0 %v1457_v52, %s5204_s3 }
 0x9dd   :  { %v1443_v15 = vpop.permute.xlu0 %1442  ;;  %1472 = vrot.lane.b32.xlu1 %v1454_v51, %s5204_s3 }
 0x9de   :  { %v1459_v27 = vmul.f32 %v5760_v21, %v1443_v15  ;;  %v1441_v63 = vpop.permute.xlu1 %1440 }
 0x9df   :  { %v1458_v20 = vmul.f32 %v5764_v31, %v1441_v63 }
 0x9e0   :  { %1482 = vrot.lane.b32.xlu0 %v1459_v27, %s5204_s3 }
 0x9e1   :  { %1480 = vrot.lane.b32.xlu1 %v1458_v20, %s5204_s3 }
 0xa46   :  { %v1471_v60 = vpop.permute.xlu0 %1470 }
 0xa47   :  { %v5774_v62 = vadd.f32 %v1471_v60, %v1413_v13  ;;  %v1475_v44 = vpop.permute.xlu1 %1474 }
 0xa48   :  { %v5777_v8 = vadd.f32 %v1475_v44, %v1415_v23 }
 0xa49   :  { %4864 = vtanh.f32 %v5774_v62 }
 0xa4a   :  { %v1477_v9 = vpop.permute.xlu0 %1476  ;;  %4866 = vtanh.f32 %v5777_v8 }
 0xa4b   :  { %v5784_v42 = vadd.f32 %v1477_v9, %v1416_v33  ;;  %v1469_v30 = vpop.permute.xlu1 %1468 }
 0xa4c   :  { %v5787_v34 = vadd.f32 %v1469_v30, %v1412_v36 }
 0xa4d   :  { %4868 = vtanh.f32 %v5784_v42 }
 0xa4e   :  { %v1479_v17 = vpop.permute.xlu0 %1478  ;;  %4870 = vtanh.f32 %v5787_v34 }
 0xa4f   :  { %v5794_v26 = vadd.f32 %v1479_v17, %v1417_v50  ;;  %v1473_v19 = vpop.permute.xlu1 %1472 }
 0xa50   :  { %v5797_v5 = vadd.f32 %v1473_v19, %v1414_v53 }
 0xa51   :  { %4872 = vtanh.f32 %v5794_v26 }
 0xa52   :  { %v1483_v46 = vpop.permute.xlu0 %1482  ;;  %4874 = vtanh.f32 %v5797_v5 }
 0xa53   :  { %v4865_v35 = vpop.eup %4864  ;;  %v5803_v7 = vadd.f32 %v1483_v46, %v1419_v16  ;;  %v1481_v43 = vpop.permute.xlu1 %1480 }
 0xa54   :  { %1518 = vrot.lane.b32.xlu0 %v4865_v35, %s5203_s0  ;;  %v4867_v47 = vpop.eup %4866  ;;  %v5806_v54 = vadd.f32 %v1481_v43, %v1418_v58 }
 0xa55   :  { %4876 = vtanh.f32 %v5803_v7  ;;  %1522 = vrot.lane.b32.xlu1 %v4867_v47, %s5203_s0 }
 0xa56   :  { %4878 = vtanh.f32 %v5806_v54 }
 0xa57   :  { %v4869_v55 = vpop.eup %4868 }
 0xa58   :  { %1524 = vrot.lane.b32.xlu0 %v4869_v55, %s5203_s0  ;;  %v4871_v52 = vpop.eup %4870 }
 0xa59   :  { %1516 = vrot.lane.b32.xlu1 %v4871_v52, %s5203_s0 }
 0xa5b   :  { %v4873_v56 = vpop.eup %4872 }
 0xa5c   :  { %1526 = vrot.lane.b32.xlu0 %v4873_v56, %s5203_s0  ;;  %v4875_v51 = vpop.eup %4874 }
 0xa5d   :  { %1520 = vrot.lane.b32.xlu1 %v4875_v51, %s5203_s0 }
 0xa5f   :  { %v4877_v15 = vpop.eup %4876 }
 0xa60   :  { %1530 = vrot.lane.b32.xlu0 %v4877_v15, %s5203_s0  ;;  %v4879_v27 = vpop.eup %4878 }
 0xa61   :  { %1528 = vrot.lane.b32.xlu1 %v4879_v27, %s5203_s0 }
 0xac6   :  { %v1519_v63 = vpop.permute.xlu0 %1518 }
 0xac7   :  { %v1541_v20 = vmul.f32 %v5737_v18, %v1519_v63  ;;  %v1523_v3 = vpop.permute.xlu1 %1522 }
 0xac8   :  { %v1543_v6 = vmul.f32 %v5740_v2, %v1523_v3 }
 0xac9   :  { %v1556_v13 = vrot.slane %v1541_v20, 7  ;;  %v1584_v18 = vrot.slane %v1541_v20, 2 }
 0xaca   :  { %v1525_v10 = vpop.permute.xlu0 %1524 }
 0xacb   :  { %v1517_v60 = vpop.permute.xlu1 %1516  ;;  %v1544_v9 = vmul.f32 %v5744_v37, %v1525_v10 }
 0xacc   :  { %v1540_v57 = vmul.f32 %v5748_v39, %v1517_v60  ;;  %v1560_v39 = vrot.slane %v1543_v6, 5 }
 0xacd   :  { %v1562_v19 = vrot.slane %v1544_v9, 4  ;;  %v1589_v16 = vrot.slane %v1544_v9, 7 }
 0xace   :  { %v1527_v23 = vpop.permute.xlu0 %1526  ;;  %v1557_v44 = vsel %vm491_vm5, %v1556_v13, %v1540_v57  ;;  %v1583_v33 = vrot.slane %v1540_v57, 3 }
 0xacf   :  { %v1521_v41 = vpop.permute.xlu1 %1520  ;;  %v1545_v36 = vmul.f32 %v5752_v24, %v1527_v23 }
 0xad0   :  { %v1542_v30 = vmul.f32 %v5756_v48, %v1521_v41  ;;  %v1585_v53 = vsel %vm482_vm2, %v1584_v18, %v1583_v33 }
 0xad1   :  { %v1591_v59 = vrot.slane %v1545_v36, 6  ;;  %v1564_v46 = vrot.slane %v1545_v36, 3 }
 0xad2   :  { %v1531_v14 = vpop.permute.xlu0 %1530  ;;  %v1558_v50 = vrot.slane %v1542_v30, 6  ;;  %v1586_v17 = vrot.slane %v1542_v30, 1 }
 0xad3   :  { %v1547_v1 = vmul.f32 %v5760_v21, %v1531_v14  ;;  %v1529_v2 = vpop.permute.xlu1 %1528 }
 0xad4   :  { %v1587_v37 = vsel %vm485_vm3, %v1586_v17, %v1585_v53  ;;  %v1546_v24 = vmul.f32 %v5764_v31, %v1529_v2  ;;  %v1559_v43 = vsel %vm494_vm6, %v1558_v50, %v1557_v44 }
 0xad5   :  { %v1588_v48 = vsel %vm488_vm4, %v1543_v6, %v1587_v37  ;;  %v1567_v35 = vrot.slane %v1547_v1, 1  ;;  %v1595_v58 = vrot.slane %v1547_v1, 4  ;;  %v1561_v52 = vsel %vm497_vm7, %v1560_v39, %v1559_v43 }
 0xad6   :  { %v1565_v47 = vrot.slane %v1546_v24, 2  ;;  %v1593_v21 = vrot.slane %v1546_v24, 5  ;;  %v1590_v55 = vsel %vm491_vm5, %v1589_v16, %v1588_v48  ;;  %v5834_v51 = vsel %vm500_vm8, %v1562_v19, %v1561_v52 }
 0xad7   :  { %v1592_v56 = vsel %vm494_vm6, %v1591_v59, %v1590_v55 }
 0xad8   :  { %v1594_v15 = vsel %vm497_vm7, %v1593_v21, %v1592_v56  ;;  %v1566_v31 = vsel %vm482_vm2, %v1565_v47, %v1564_v46 }
 0xad9   :  { %v1596_v27 = vsel %vm500_vm8, %v1595_v58, %v1594_v15  ;;  %v5840_v63 = vsel %vm485_vm3, %v1567_v35, %v1566_v31 }
 0xada   :  { %1597 = vrot.lane.b32.xlu1 %v1596_v27, %s5204_s3 }
 0xb4c   :  { %v1598_v20 = vpop.permute.xlu1 %1597 }
 0xb4d   :  { %4351 = vmatmul.mubr.msk.f32.vlgmr.msra.gmra.mrb[10].mxu0 %vm183_vm9, %v1598_v20 }
 0xb4e   :  { %4372 = vmatprep.mubr.msk.f32.mxu0 %vm5201_vm1, %v5202_v4 }
 0xc20   :  { %v1667_v3 = vpop.f32.mrb[10].mxu0 }
 0xc21   :  { %v1672_v10 = vrot.slane %v1667_v3, 4  ;;  %v4352_v13 = vpop.f32.mrb[11].mxu0  ;;  %v1674_v57 = vrot.slane %v1667_v3, 6  ;;  %v1676_v23 = vrot.slane %v1667_v3, 1  ;;  %v1673_v6 = vrot.slane %v1667_v3, 5 }
 0xc22   :  { %v1691_v33 = vadd.f32 %v1667_v3, %v5336_v40  ;;  %v1677_v41 = vrot.slane %v1667_v3, 2  ;;  %v1675_v30 = vrot.slane %v1667_v3, 7  ;;  %v1678_v50 = vrot.slane %v1667_v3, 3 }
 0xc23   :  { %v1687_v60 = vadd.f32 %v1672_v10, %v5323_v22  ;;  %v1689_v44 = vadd.f32 %v1674_v57, %v5330_v32  ;;  %v1692_v36 = vadd.f32 %v1676_v23, %v5334_v38  ;;  %v1688_v18 = vadd.f32 %v1673_v6, %v5327_v29 }
 0xc24   :  { %v1693_v14 = vadd.f32 %v1677_v41, %v5343_v49  ;;  %v1690_v17 = vadd.f32 %v1675_v30, %v5325_v28  ;;  %v1694_v39 = vadd.f32 %v1678_v50, %v5339_v45  ;;  %v4118_v48 = vmul.f32 -1.442695, %v1691_v33 }
 0xc25   :  { %4880 = vtanh.f32 %v1687_v60  ;;  %v4114_v46 = vmul.f32 -1.442695, %v1687_v60  ;;  %v4116_v24 = vmul.f32 -1.442695, %v1689_v44  ;;  %v4119_v58 = vmul.f32 -1.442695, %v1692_v36 }
 0xc26   :  { %4882 = vtanh.f32 %v1689_v44  ;;  %v4115_v43 = vmul.f32 -1.442695, %v1688_v18  ;;  %v4120_v21 = vmul.f32 -1.442695, %v1693_v14  ;;  %v4117_v55 = vmul.f32 -1.442695, %v1690_v17 }
 0xc27   :  { %4884 = vtanh.f32 %v1691_v33  ;;  %v4121_v56 = vmul.f32 -1.442695, %v1694_v39 }
 0xc28   :  { %4886 = vtanh.f32 %v1692_v36 }
 0xc29   :  { %4888 = vtanh.f32 %v1688_v18 }
 0xc2a   :  { %4890 = vtanh.f32 %v1693_v14 }
 0xc2b   :  { %4892 = vtanh.f32 %v1690_v17 }
 0xc2c   :  { %4894 = vtanh.f32 %v1694_v39 }
 0xc2d   :  { %4896 = vpow2.f32 %v4114_v46 }
 0xc2e   :  { %4898 = vpow2.f32 %v4116_v24 }
 0xc2f   :  { %v4881_v9 = vpop.eup %4880  ;;  %4900 = vpow2.f32 %v4118_v48 }
 0xc30   :  { %1791 = vrot.lane.b32.xlu0 %v4881_v9, %s5203_s0  ;;  %v4883_v1 = vpop.eup %4882  ;;  %4902 = vpow2.f32 %v4119_v58 }
 0xc31   :  { %v4885_v53 = vpop.eup %4884  ;;  %4904 = vpow2.f32 %v4115_v43 }
 0xc32   :  { %1799 = vrot.lane.b32.xlu1 %v4885_v53, %s5203_s0  ;;  %v4887_v19 = vpop.eup %4886 }
 0xc33   :  { %v4889_v59 = vpop.eup %4888 }
 0xc34   :  { %1795 = vrot.lane.b32.xlu0 %v4883_v1, %s5203_s0  ;;  %v4891_v2 = vpop.eup %4890 }
 0xc35   :  { %v4893_v16 = vpop.eup %4892 }
 0xc36   :  { %1793 = vrot.lane.b32.xlu1 %v4889_v59, %s5203_s0  ;;  %v4895_v37 = vpop.eup %4894 }
 0xc37   :  { %v4897_v35 = vpop.eup %4896 }
 0xc38   :  { %1801 = vrot.lane.b32.xlu0 %v4887_v19, %s5203_s0  ;;  %v1719_v47 = vadd.f32 1.0, %v4897_v35  ;;  %v4899_v52 = vpop.eup %4898 }
 0xc39   :  { %v4901_v15 = vpop.eup %4900  ;;  %v1721_v31 = vadd.f32 1.0, %v4899_v52 }
 0xc3a   :  { %1797 = vrot.lane.b32.xlu1 %v4893_v16, %s5203_s0  ;;  %4906 = vrcp.f32 %v1719_v47  ;;  %v4903_v27 = vpop.eup %4902  ;;  %v1723_v20 = vadd.f32 1.0, %v4901_v15 }
 0xc3b   :  { %4908 = vpow2.f32 %v4120_v21  ;;  %v4905_v3 = vpop.eup %4904  ;;  %v1724_v60 = vadd.f32 1.0, %v4903_v27  ;;  %v1763_v27 = vrot.slane %v5784_v42, 7 }
 0xc3c   :  { %1803 = vrot.lane.b32.xlu0 %v4891_v2, %s5203_s0  ;;  %4910 = vpow2.f32 %v4117_v55  ;;  %v1720_v44 = vadd.f32 1.0, %v4905_v3  ;;  %v1759_v55 = vrot.slane %v5787_v34, 7 }
 0xc3d   :  { %4912 = vpow2.f32 %v4121_v56 }
 0xc3e   :  { %1805 = vrot.lane.b32.xlu1 %v4895_v37, %s5203_s0  ;;  %4914 = vrcp.f32 %v1721_v31  ;;  %v1761_v31 = vrot.slane %v5797_v5, 7 }
 0xc3f   :  { %4916 = vrcp.f32 %v1723_v20 }
 0xc40   :  { %4918 = vrcp.f32 %v1724_v60 }
 0xc41   :  { %4920 = vrcp.f32 %v1720_v44  ;;  %v1760_v44 = vrot.slane %v5774_v62, 7  ;;  %v1762_v62 = vrot.slane %v5777_v8, 7 }
 0xc44   :  { %v5862_v10 = vpop.eup %4906 }
 0xc45   :  { %v4909_v57 = vpop.eup %4908  ;;  %v1775_v52 = vmul.f32 %v5862_v10, %v1759_v55 }
 0xc46   :  { %v4911_v6 = vpop.eup %4910  ;;  %v1725_v33 = vadd.f32 1.0, %v4909_v57 }
 0xc47   :  { %v1722_v9 = vadd.f32 1.0, %v4911_v6  ;;  %v4913_v41 = vpop.eup %4912 }
 0xc48   :  { %4922 = vrcp.f32 %v1725_v33  ;;  %v5866_v36 = vpop.eup %4914  ;;  %v1726_v18 = vadd.f32 1.0, %v4913_v41  ;;  %v1765_v33 = vrot.slane %v5806_v54, 7 }
 0xc49   :  { %4924 = vrcp.f32 %v1722_v9  ;;  %v5869_v50 = vpop.eup %4916  ;;  %v1777_v20 = vmul.f32 %v5866_v36, %v1761_v31 }
 0xc4a   :  { %v5873_v39 = vpop.eup %4918  ;;  %4926 = vrcp.f32 %v1726_v18  ;;  %v1779_v60 = vmul.f32 %v5869_v50, %v1763_v27 }
 0xc4b   :  { %v5877_v59 = vpop.eup %4920 }
 0xc52   :  { %v5881_v37 = vpop.eup %4922 }
 0xc53   :  { %v5885_v48 = vpop.eup %4924  ;;  %v1781_v18 = vmul.f32 %v5881_v37, %v1765_v33 }
 0xc54   :  { %v5890_v43 = vpop.eup %4926  ;;  %v1778_v54 = vmul.f32 %v5885_v48, %v1762_v62 }
 0xca2   :  { %v1792_v13 = vpop.permute.xlu0 %1791 }
 0xca3   :  { %v1815_v23 = vmul.f32 %v5862_v10, %v1792_v13  ;;  %v1764_v13 = vrot.slane %v5794_v26, 7  ;;  %v1776_v26 = vmul.f32 %v5877_v59, %v1760_v44 }
 0xca4   :  { %v1800_v17 = vpop.permute.xlu1 %1799 }
 0xca5   :  { %1831 = vrot.lane.b32.xlu0 %v1815_v23, %s5204_s3  ;;  %v1819_v1 = vmul.f32 %v5869_v50, %v1800_v17  ;;  %v1780_v5 = vmul.f32 %v5873_v39, %v1764_v13 }
 0xca6   :  { %v1796_v30 = vpop.permute.xlu0 %1795 }
 0xca7   :  { %v1817_v14 = vmul.f32 %v5866_v36, %v1796_v30  ;;  %1839 = vrot.lane.b32.xlu1 %v1819_v1, %s5204_s3 }
 0xca8   :  { %v1794_v2 = vpop.permute.xlu1 %1793 }
 0xca9   :  { %1835 = vrot.lane.b32.xlu0 %v1817_v14, %s5204_s3  ;;  %v1816_v16 = vmul.f32 %v5877_v59, %v1794_v2 }
 0xcaa   :  { %v1802_v53 = vpop.permute.xlu0 %1801 }
 0xcab   :  { %v1820_v19 = vmul.f32 %v5873_v39, %v1802_v53  ;;  %1833 = vrot.lane.b32.xlu1 %v1816_v16, %s5204_s3  ;;  %v1766_v53 = vrot.slane %v5803_v7, 7 }
 0xcac   :  { %v1798_v35 = vpop.permute.xlu1 %1797 }
 0xcad   :  { %1841 = vrot.lane.b32.xlu0 %v1820_v19, %s5204_s3  ;;  %v1818_v58 = vmul.f32 %v5885_v48, %v1798_v35  ;;  %v1782_v2 = vmul.f32 %v5890_v43, %v1766_v53 }
 0xcae   :  { %v1804_v46 = vpop.permute.xlu0 %1803 }
 0xcaf   :  { %v1821_v24 = vmul.f32 %v5881_v37, %v1804_v46  ;;  %1837 = vrot.lane.b32.xlu1 %v1818_v58, %s5204_s3 }
 0xcb0   :  { %v1806_v47 = vpop.permute.xlu1 %1805 }
 0xcb1   :  { %1843 = vrot.lane.b32.xlu0 %v1821_v24, %s5204_s3  ;;  %v1822_v21 = vmul.f32 %v5890_v43, %v1806_v47 }
 0xcb3   :  { %1845 = vrot.lane.b32.xlu1 %v1822_v21, %s5204_s3 }
 0xd17   :  { %v1832_v56 = vpop.permute.xlu0 %1831 }
 0xd18   :  { %v5896_v15 = vadd.f32 %v1832_v56, %v1775_v52 }
 0xd19   :  { %v1840_v34 = vpop.permute.xlu1 %1839 }
 0xd1a   :  { %4928 = vtanh.f32 %v5896_v15  ;;  %v5907_v6 = vadd.f32 %v1840_v34, %v1779_v60 }
 0xd1b   :  { %v1836_v3 = vpop.permute.xlu0 %1835 }
 0xd1c   :  { %v5904_v57 = vadd.f32 %v1836_v3, %v1777_v20 }
 0xd1d   :  { %v1834_v41 = vpop.permute.xlu1 %1833 }
 0xd1e   :  { %4930 = vtanh.f32 %v5904_v57  ;;  %v5918_v30 = vadd.f32 %v1834_v41, %v1776_v26 }
 0xd1f   :  { %v1842_v42 = vpop.permute.xlu0 %1841  ;;  %4932 = vtanh.f32 %v5907_v6 }
 0xd20   :  { %v5915_v9 = vadd.f32 %v1842_v42, %v1780_v5 }
 0xd21   :  { %v1838_v1 = vpop.permute.xlu1 %1837 }
 0xd22   :  { %4934 = vtanh.f32 %v5915_v9  ;;  %v5927_v19 = vadd.f32 %v1838_v1, %v1778_v54 }
 0xd23   :  { %v1844_v14 = vpop.permute.xlu0 %1843  ;;  %4936 = vtanh.f32 %v5918_v30 }
 0xd24   :  { %v4929_v23 = vpop.eup %4928  ;;  %v5924_v17 = vadd.f32 %v1844_v14, %v1781_v18 }
 0xd25   :  { %1879 = vrot.lane.b32.xlu0 %v4929_v23, %s5203_s0  ;;  %v1846_v16 = vpop.permute.xlu1 %1845 }
 0xd26   :  { %4938 = vtanh.f32 %v5924_v17  ;;  %v5933_v24 = vadd.f32 %v1846_v16, %v1782_v2 }
 0xd27   :  { %4940 = vtanh.f32 %v5927_v19 }
 0xd28   :  { %v4931_v8 = vpop.eup %4930  ;;  %4942 = vtanh.f32 %v5933_v24 }
 0xd29   :  { %1883 = vrot.lane.b32.xlu0 %v4931_v8, %s5203_s0  ;;  %v4933_v46 = vpop.eup %4932 }
 0xd2a   :  { %1887 = vrot.lane.b32.xlu1 %v4933_v46, %s5203_s0 }
 0xd2c   :  { %v4935_v35 = vpop.eup %4934 }
 0xd2d   :  { %1889 = vrot.lane.b32.xlu0 %v4935_v35, %s5203_s0  ;;  %v4937_v7 = vpop.eup %4936 }
 0xd2e   :  { %1881 = vrot.lane.b32.xlu1 %v4937_v7, %s5203_s0 }
 0xd30   :  { %v4939_v58 = vpop.eup %4938 }
 0xd31   :  { %1891 = vrot.lane.b32.xlu0 %v4939_v58, %s5203_s0  ;;  %v4941_v47 = vpop.eup %4940 }
 0xd32   :  { %1885 = vrot.lane.b32.xlu1 %v4941_v47, %s5203_s0  ;;  %v4943_v21 = vpop.eup %4942 }
 0xd36   :  { %1893 = vrot.lane.b32.xlu1 %v4943_v21, %s5203_s0 }
 0xd97   :  { %v1880_v55 = vpop.permute.xlu0 %1879 }
 0xd98   :  { %v1903_v27 = vmul.f32 %v5862_v10, %v1880_v55 }
 0xd9a   :  { %v1946_v5 = vrot.slane %v1903_v27, 4 }
 0xd9b   :  { %v1884_v52 = vpop.permute.xlu0 %1883 }
 0xd9c   :  { %v1888_v56 = vpop.permute.xlu1 %1887  ;;  %v1905_v20 = vmul.f32 %v5866_v36, %v1884_v52 }
 0xd9d   :  { %v1907_v31 = vmul.f32 %v5869_v50, %v1888_v56 }
 0xd9e   :  { %v1921_v42 = vrot.slane %v1905_v20, 6  ;;  %v1949_v33 = vrot.slane %v1905_v20, 2 }
 0xd9f   :  { %v1890_v3 = vpop.permute.xlu0 %1889  ;;  %v1925_v34 = vrot.slane %v1907_v31, 4 }
 0xda0   :  { %v1908_v13 = vmul.f32 %v5873_v39, %v1890_v3  ;;  %v1882_v60 = vpop.permute.xlu1 %1881 }
 0xda1   :  { %v1904_v23 = vmul.f32 %v5877_v59, %v1882_v60 }
 0xda2   :  { %v1926_v44 = vrot.slane %v1908_v13, 3  ;;  %v1954_v59 = vrot.slane %v1908_v13, 7 }
 0xda3   :  { %v1892_v26 = vpop.permute.xlu0 %1891  ;;  %v1919_v41 = vrot.slane %v1904_v23, 7  ;;  %v1947_v62 = vrot.slane %v1904_v23, 3 }
 0xda4   :  { %v1909_v50 = vmul.f32 %v5881_v37, %v1892_v26  ;;  %v1927_v10 = vsel %vm482_vm2, %v1926_v44, %v1925_v34  ;;  %v1886_v18 = vpop.permute.xlu1 %1885 }
 0xda5   :  { %v1948_v36 = vsel %vm482_vm2, %v1947_v62, %v1946_v5  ;;  %v1906_v39 = vmul.f32 %v5885_v48, %v1886_v18  ;;  %v1920_v1 = vsel %vm494_vm6, %v1919_v41, %v1903_v27 }
 0xda6   :  { %v1928_v14 = vrot.slane %v1909_v50, 2  ;;  %v1950_v54 = vsel %vm485_vm3, %v1949_v33, %v1948_v36  ;;  %v1922_v2 = vsel %vm497_vm7, %v1921_v42, %v1920_v1  ;;  %v1956_v46 = vrot.slane %v1909_v50, 6 }
 0xda7   :  { %v1923_v53 = vrot.slane %v1906_v39, 5  ;;  %v1951_v8 = vrot.slane %v1906_v39, 1 }
 0xda8   :  { %v1929_v16 = vsel %vm485_vm3, %v1928_v14, %v1927_v10  ;;  %v1894_v37 = vpop.permute.xlu1 %1893 }
 0xda9   :  { %v1952_v35 = vsel %vm488_vm4, %v1951_v8, %v1950_v54  ;;  %v1910_v7 = vmul.f32 %v5890_v43, %v1894_v37  ;;  %v5958_v48 = vsel %vm500_vm8, %v1923_v53, %v1922_v2 }
 0xdaa   :  { %v1953_v58 = vsel %vm491_vm5, %v1907_v31, %v1952_v35 }
 0xdab   :  { %v1930_v47 = vrot.slane %v1910_v7, 1  ;;  %v1958_v21 = vrot.slane %v1910_v7, 5  ;;  %v1955_v55 = vsel %vm494_vm6, %v1954_v59, %v1953_v58 }
 0xdac   :  { %v1957_v52 = vsel %vm497_vm7, %v1956_v46, %v1955_v55 }
 0xdad   :  { %v1959_v56 = vsel %vm500_vm8, %v1958_v21, %v1957_v52  ;;  %v5965_v27 = vsel %vm488_vm4, %v1930_v47, %v1929_v16 }
 0xdae   :  { %1960 = vrot.lane.b32.xlu0 %v1959_v56, %s5204_s3 }
 0xe20   :  { %v1961_v20 = vpop.permute.xlu0 %1960 }
 0xe21   :  { %4362 = vmatmul.mubr.msk.f32.vlgmr.msra.gmra.mrb[6].mxu1 %vm183_vm9, %v1961_v20 }
 0xe22   :  { %4383 = vmatprep.mubr.msk.f32.mxu1 %vm5201_vm1, %v5202_v4 }
 0xef4   :  { %v2030_v43 = vpop.f32.mrb[6].mxu1 }
 0xef5   :  { %v2035_v31 = vrot.slane %v2030_v43, 3  ;;  %v4363_v3 = vpop.f32.mrb[7].mxu1  ;;  %v2036_v60 = vrot.slane %v2030_v43, 4  ;;  %v2037_v34 = vrot.slane %v2030_v43, 5  ;;  %v2038_v23 = vrot.slane %v2030_v43, 6 }
 0xef6   :  { %v2039_v5 = vrot.slane %v2030_v43, 7  ;;  %v2040_v33 = vrot.slane %v2030_v43, 1  ;;  %v2041_v50 = vrot.slane %v2030_v43, 2  ;;  %v2055_v18 = vadd.f32 %v2030_v43, %v5334_v38 }
 0xef7   :  { %v2050_v13 = vadd.f32 %v2035_v31, %v5323_v22  ;;  %v2051_v44 = vadd.f32 %v2036_v60, %v5327_v29  ;;  %v2052_v42 = vadd.f32 %v2037_v34, %v5330_v32  ;;  %v2053_v26 = vadd.f32 %v2038_v23, %v5325_v28 }
 0xef8   :  { %v2054_v62 = vadd.f32 %v2039_v5, %v5336_v40  ;;  %v2056_v10 = vadd.f32 %v2040_v33, %v5343_v49  ;;  %v2057_v36 = vadd.f32 %v2041_v50, %v5339_v45  ;;  %v4128_v21 = vmul.f32 -1.442695, %v2055_v18 }
 0xef9   :  { %4944 = vtanh.f32 %v2050_v13  ;;  %v4123_v2 = vmul.f32 -1.442695, %v2050_v13  ;;  %v4124_v16 = vmul.f32 -1.442695, %v2051_v44  ;;  %v4125_v37 = vmul.f32 -1.442695, %v2052_v42 }
 0xefa   :  { %4946 = vtanh.f32 %v2051_v44  ;;  %v4126_v46 = vmul.f32 -1.442695, %v2053_v26  ;;  %v4127_v7 = vmul.f32 -1.442695, %v2054_v62  ;;  %v4129_v58 = vmul.f32 -1.442695, %v2056_v10 }
 0xefb   :  { %4948 = vtanh.f32 %v2052_v42  ;;  %v4130_v55 = vmul.f32 -1.442695, %v2057_v36 }
 0xefc   :  { %4950 = vtanh.f32 %v2053_v26 }
 0xefd   :  { %4952 = vtanh.f32 %v2054_v62 }
 0xefe   :  { %4954 = vtanh.f32 %v2056_v10 }
 0xeff   :  { %4956 = vtanh.f32 %v2055_v18 }
 0xf00   :  { %4958 = vtanh.f32 %v2057_v36 }
 0xf01   :  { %4960 = vpow2.f32 %v4123_v2 }
 0xf02   :  { %4962 = vpow2.f32 %v4124_v16 }
 0xf03   :  { %v4945_v41 = vpop.eup %4944  ;;  %4964 = vpow2.f32 %v4125_v37 }
 0xf04   :  { %2154 = vrot.lane.b32.xlu1 %v4945_v41, %s5203_s0  ;;  %v4947_v39 = vpop.eup %4946  ;;  %4966 = vpow2.f32 %v4126_v46 }
 0xf05   :  { %v4949_v14 = vpop.eup %4948  ;;  %2156 = vrot.lane.b32.xlu0 %v4947_v39, %s5203_s0  ;;  %4968 = vpow2.f32 %v4127_v7 }
 0xf06   :  { %v4951_v54 = vpop.eup %4950  ;;  %4970 = vpow2.f32 %v4129_v58 }
 0xf07   :  { %v4953_v59 = vpop.eup %4952 }
 0xf08   :  { %2158 = vrot.lane.b32.xlu1 %v4949_v14, %s5203_s0  ;;  %v4955_v1 = vpop.eup %4954 }
 0xf09   :  { %2160 = vrot.lane.b32.xlu0 %v4951_v54, %s5203_s0  ;;  %v4957_v53 = vpop.eup %4956 }
 0xf0a   :  { %v4959_v8 = vpop.eup %4958 }
 0xf0b   :  { %v4961_v35 = vpop.eup %4960 }
 0xf0c   :  { %2162 = vrot.lane.b32.xlu1 %v4953_v59, %s5203_s0  ;;  %v2082_v47 = vadd.f32 1.0, %v4961_v35  ;;  %v4963_v52 = vpop.eup %4962 }
 0xf0d   :  { %2166 = vrot.lane.b32.xlu0 %v4955_v1, %s5203_s0  ;;  %v4965_v56 = vpop.eup %4964  ;;  %v2083_v20 = vadd.f32 1.0, %v4963_v52  ;;  %v2122_v52 = vrot.slane %v5896_v15, 7 }
 0xf0e   :  { %4972 = vrcp.f32 %v2082_v47  ;;  %v4967_v43 = vpop.eup %4966  ;;  %v2084_v31 = vadd.f32 1.0, %v4965_v56 }
 0xf0f   :  { %4974 = vpow2.f32 %v4128_v21  ;;  %v4969_v3 = vpop.eup %4968  ;;  %v2085_v60 = vadd.f32 1.0, %v4967_v43 }
 0xf10   :  { %2164 = vrot.lane.b32.xlu1 %v4957_v53, %s5203_s0  ;;  %4976 = vpow2.f32 %v4130_v55  ;;  %v4971_v13 = vpop.eup %4970  ;;  %v2086_v44 = vadd.f32 1.0, %v4969_v3  ;;  %v2124_v3 = vrot.slane %v5904_v57, 7 }
 0xf11   :  { %2168 = vrot.lane.b32.xlu0 %v4959_v8, %s5203_s0  ;;  %4978 = vrcp.f32 %v2083_v20  ;;  %v2088_v33 = vadd.f32 1.0, %v4971_v13 }
 0xf12   :  { %4980 = vrcp.f32 %v2084_v31  ;;  %v2123_v31 = vrot.slane %v5918_v30, 7 }
 0xf13   :  { %4982 = vrcp.f32 %v2085_v60 }
 0xf14   :  { %4984 = vrcp.f32 %v2086_v44  ;;  %v2125_v44 = vrot.slane %v5927_v19, 7 }
 0xf15   :  { %4986 = vrcp.f32 %v2088_v33 }
 0xf18   :  { %v5987_v34 = vpop.eup %4972 }
 0xf19   :  { %v4975_v5 = vpop.eup %4974  ;;  %v2138_v56 = vmul.f32 %v5987_v34, %v2122_v52  ;;  %v2306_v52 = vld [vmem:[%s6542_s2 + $0x8] sm:$0xff] }
 0xf1a   :  { %v4977_v26 = vpop.eup %4976  ;;  %v2087_v41 = vadd.f32 1.0, %v4975_v5 }
 0xf1b   :  { %v2089_v62 = vadd.f32 1.0, %v4977_v26  ;;  %v5991_v50 = vpop.eup %4978 }
 0xf1c   :  { %4988 = vrcp.f32 %v2087_v41  ;;  %v5993_v18 = vpop.eup %4980  ;;  %v2139_v13 = vmul.f32 %v5991_v50, %v2123_v31  ;;  %v2308_v31 = vld [vmem:[%s6542_s2 + $0x18] sm:$0xff] }
 0xf1d   :  { %4990 = vrcp.f32 %v2089_v62  ;;  %v5998_v54 = vpop.eup %4982  ;;  %v2128_v62 = vrot.slane %v5924_v17, 7  ;;  %v2129_v17 = vrot.slane %v5933_v24, 7 }
 0xf1e   :  { %v6001_v1 = vpop.eup %4984  ;;  %v2141_v30 = vmul.f32 %v5998_v54, %v2125_v44 }
 0xf1f   :  { %v6006_v16 = vpop.eup %4986 }
 0xf26   :  { %v6009_v46 = vpop.eup %4988 }
 0xf27   :  { %v6014_v47 = vpop.eup %4990 }
 0xf76   :  { %v2155_v23 = vpop.permute.xlu1 %2154 }
 0xf77   :  { %v2178_v42 = vmul.f32 %v5987_v34, %v2155_v23  ;;  %v2157_v10 = vpop.permute.xlu0 %2156  ;;  %v2140_v23 = vmul.f32 %v5993_v18, %v2124_v3 }
 0xf78   :  { %v2179_v36 = vmul.f32 %v5991_v50, %v2157_v10 }
 0xf79   :  { %2194 = vrot.lane.b32.xlu1 %v2178_v42, %s5204_s3  ;;  %v2126_v42 = vrot.slane %v5907_v6, 7  ;;  %v2127_v6 = vrot.slane %v5915_v9, 7  ;;  %v2145_v9 = vmul.f32 %v6014_v47, %v2129_v17 }
 0xf7a   :  { %v2159_v39 = vpop.permute.xlu1 %2158  ;;  %2196 = vrot.lane.b32.xlu0 %v2179_v36, %s5204_s3 }
 0xf7b   :  { %v2180_v14 = vmul.f32 %v5993_v18, %v2159_v39  ;;  %v2161_v59 = vpop.permute.xlu0 %2160  ;;  %v2142_v41 = vmul.f32 %v6001_v1, %v2126_v42  ;;  %v2144_v39 = vmul.f32 %v6006_v16, %v2128_v62 }
 0xf7c   :  { %v2181_v53 = vmul.f32 %v5998_v54, %v2161_v59  ;;  %v2143_v59 = vmul.f32 %v6009_v46, %v2127_v6 }
 0xf7d   :  { %2198 = vrot.lane.b32.xlu1 %v2180_v14, %s5204_s3 }
 0xf7e   :  { %v2163_v8 = vpop.permute.xlu1 %2162  ;;  %2200 = vrot.lane.b32.xlu0 %v2181_v53, %s5204_s3 }
 0xf7f   :  { %v2182_v2 = vmul.f32 %v6001_v1, %v2163_v8  ;;  %v2167_v37 = vpop.permute.xlu0 %2166 }
 0xf80   :  { %v2184_v35 = vmul.f32 %v6006_v16, %v2167_v37 }
 0xf81   :  { %2202 = vrot.lane.b32.xlu1 %v2182_v2, %s5204_s3 }
 0xf82   :  { %v2165_v7 = vpop.permute.xlu1 %2164  ;;  %2206 = vrot.lane.b32.xlu0 %v2184_v35, %s5204_s3 }
 0xf83   :  { %v2183_v58 = vmul.f32 %v6009_v46, %v2165_v7  ;;  %v2169_v21 = vpop.permute.xlu0 %2168 }
 0xf84   :  { %v2185_v55 = vmul.f32 %v6014_v47, %v2169_v21 }
 0xf85   :  { %2204 = vrot.lane.b32.xlu1 %v2183_v58, %s5204_s3 }
 0xf86   :  { %2208 = vrot.lane.b32.xlu0 %v2185_v55, %s5204_s3  ;;  %v2305_v55 = vld [vmem:[%s6542_s2] sm:$0xff] }
 0xfeb   :  { %v2195_v20 = vpop.permute.xlu1 %2194 }
 0xfec   :  { %v6021_v43 = vadd.f32 %v2195_v20, %v2138_v56  ;;  %v2197_v60 = vpop.permute.xlu0 %2196  ;;  %v2307_v56 = vld [vmem:[%s6542_s2 + $0x10] sm:$0xff]  ;;  %v4546_v20 = vpack.c.bf16 %v2306_v52, %v2305_v55 }
 0xfed   :  { %v6029_v5 = vadd.f32 %v2197_v60, %v2139_v13  ;;  %v4549_v13 = vpack.c.bf16 %v2308_v31, %v2307_v56 }
 0xfee   :  { %4992 = vtanh.f32 %v6021_v43  ;;  %4547 = vmatpush3.bf16.msra.mxu0 %v4546_v20  ;;  %4553 = vmatpush3.bf16.msra.mxu1 %v4546_v20 }
 0xfef   :  { %v2199_v15 = vpop.permute.xlu1 %2198  ;;  %4994 = vtanh.f32 %v6029_v5  ;;  %4548 = vmatprep.subr.bf16.mxu0 %v5200_v0  ;;  %4554 = vmatprep.subr.bf16.mxu1 %v5200_v0 }
 0xff0   :  { %v6032_v33 = vadd.f32 %v2199_v15, %v2140_v23  ;;  %v2201_v57 = vpop.permute.xlu0 %2200 }
 0xff1   :  { %v6039_v19 = vadd.f32 %v2201_v57, %v2141_v30 }
 0xff2   :  { %4996 = vtanh.f32 %v6032_v33  ;;  %4550 = vmatpush3.bf16.msra.mxu0 %v4549_v13  ;;  %4556 = vmatpush3.bf16.msra.mxu1 %v4549_v13 }
 0xff3   :  { %v2203_v10 = vpop.permute.xlu1 %2202  ;;  %4998 = vtanh.f32 %v6039_v19  ;;  %4565 = vmatprep.subr.bf16.mxu1 %v5200_v0 }
 0xff4   :  { %v6043_v36 = vadd.f32 %v2203_v10, %v2142_v41  ;;  %v2207_v14 = vpop.permute.xlu0 %2206 }
 0xff5   :  { %v6050_v53 = vadd.f32 %v2207_v14, %v2144_v39 }
 0xff6   :  { %5000 = vtanh.f32 %v6043_v36 }
 0xff7   :  { %v2205_v8 = vpop.permute.xlu1 %2204  ;;  %5002 = vtanh.f32 %v6050_v53 }
 0xff8   :  { %v4993_v26 = vpop.eup %4992  ;;  %v6052_v2 = vadd.f32 %v2205_v8, %v2143_v59  ;;  %v2209_v37 = vpop.permute.xlu0 %2208 }
 0xff9   :  { %2242 = vrot.lane.b32.xlu1 %v4993_v26, %s5203_s0  ;;  %v4995_v35 = vpop.eup %4994  ;;  %v6057_v7 = vadd.f32 %v2209_v37, %v2145_v9 }
 0xffa   :  { %5004 = vtanh.f32 %v6052_v2  ;;  %2244 = vrot.lane.b32.xlu0 %v4995_v35, %s5203_s0 }
 0xffb   :  { %5006 = vtanh.f32 %v6057_v7 }
 0xffc   :  { %v4997_v58 = vpop.eup %4996 }
 0xffd   :  { %2246 = vrot.lane.b32.xlu1 %v4997_v58, %s5203_s0  ;;  %v4999_v24 = vpop.eup %4998 }
 0xffe   :  { %2248 = vrot.lane.b32.xlu0 %v4999_v24, %s5203_s0 }
0x1000   :  { %v5001_v21 = vpop.eup %5000 }
0x1001   :  { %2250 = vrot.lane.b32.xlu1 %v5001_v21, %s5203_s0  ;;  %v5003_v3 = vpop.eup %5002 }
0x1002   :  { %2254 = vrot.lane.b32.xlu0 %v5003_v3, %s5203_s0 }
0x1004   :  { %v5005_v60 = vpop.eup %5004 }
0x1005   :  { %2252 = vrot.lane.b32.xlu1 %v5005_v60, %s5203_s0  ;;  %v5007_v23 = vpop.eup %5006 }
0x1006   :  { %2256 = vrot.lane.b32.xlu0 %v5007_v23, %s5203_s0 }
0x106b   :  { %v2243_v44 = vpop.permute.xlu1 %2242 }
0x106c   :  { %v2266_v15 = vmul.f32 %v5987_v34, %v2243_v44  ;;  %v2245_v42 = vpop.permute.xlu0 %2244 }
0x106d   :  { %v2267_v30 = vmul.f32 %v5991_v50, %v2245_v42 }
0x106e   :  { %v2309_v26 = vrot.slane %v2266_v15, 5 }
0x106f   :  { %v2247_v57 = vpop.permute.xlu1 %2246  ;;  %v2282_v62 = vrot.slane %v2267_v30, 7  ;;  %v2310_v10 = vrot.slane %v2267_v30, 4 }
0x1070   :  { %v2268_v41 = vmul.f32 %v5993_v18, %v2247_v57  ;;  %v2249_v6 = vpop.permute.xlu0 %2248 }
0x1071   :  { %v2311_v59 = vsel %vm482_vm2, %v2310_v10, %v2309_v26  ;;  %v2269_v17 = vmul.f32 %v5998_v54, %v2249_v6  ;;  %v2283_v9 = vsel %vm497_vm7, %v2282_v62, %v2266_v15  ;;  %v3032_v62 = vld [vmem:[#allocation2] sm:$0xff] }
0x1072   :  { %v2284_v39 = vrot.slane %v2268_v41, 6  ;;  %v2312_v14 = vrot.slane %v2268_v41, 3 }
0x1073   :  { %v2251_v8 = vpop.permute.xlu1 %2250  ;;  %v2314_v18 = vrot.slane %v2269_v17, 2  ;;  %v2286_v35 = vrot.slane %v2269_v17, 5 }
0x1074   :  { %v2313_v34 = vsel %vm485_vm3, %v2312_v14, %v2311_v59  ;;  %v2270_v50 = vmul.f32 %v6001_v1, %v2251_v8  ;;  %v6091_v37 = vsel %vm500_vm8, %v2284_v39, %v2283_v9  ;;  %v2255_v58 = vpop.permute.xlu0 %2254 }
0x1075   :  { %v2272_v55 = vmul.f32 %v6006_v16, %v2255_v58  ;;  %v2315_v52 = vsel %vm488_vm4, %v2314_v18, %v2313_v34 }
0x1076   :  { %v2287_v24 = vrot.slane %v2270_v50, 4  ;;  %v2316_v21 = vrot.slane %v2270_v50, 1 }
0x1077   :  { %v2253_v54 = vpop.permute.xlu1 %2252  ;;  %v2319_v1 = vrot.slane %v2272_v55, 7  ;;  %v2291_v23 = vrot.slane %v2272_v55, 2 }
0x1078   :  { %v2288_v56 = vsel %vm482_vm2, %v2287_v24, %v2286_v35  ;;  %v2317_v20 = vsel %vm491_vm5, %v2316_v21, %v2315_v52  ;;  %v2271_v31 = vmul.f32 %v6009_v46, %v2253_v54  ;;  %v2257_v3 = vpop.permute.xlu0 %2256 }
0x1079   :  { %v2273_v44 = vmul.f32 %v6014_v47, %v2257_v3 }
0x107a   :  { %v2289_v13 = vrot.slane %v2271_v31, 3  ;;  %v2318_v60 = vsel %vm494_vm6, %v2271_v31, %v2317_v20 }
0x107b   :  { %v2320_v16 = vsel %vm497_vm7, %v2319_v1, %v2318_v60  ;;  %v2293_v42 = vrot.slane %v2273_v44, 1  ;;  %v2321_v30 = vrot.slane %v2273_v44, 6 }
0x107c   :  { %v2290_v15 = vsel %vm485_vm3, %v2289_v13, %v2288_v56 }
0x107d   :  { %v2292_v26 = vsel %vm488_vm4, %v2291_v23, %v2290_v15  ;;  %v2322_v57 = vsel %vm500_vm8, %v2321_v30, %v2320_v16 }
0x107e   :  { %v6105_v46 = vsel %vm491_vm5, %v2293_v42, %v2292_v26  ;;  %2323 = vrot.lane.b32.xlu1 %v2322_v57, %s5204_s3 }
0x10f0   :  { %v2324_v41 = vpop.permute.xlu1 %2323 }
0x10f1   :  { %4373 = vmatmul.mubr.msk.f32.vlgmr.msra.gmra.mrb[12].mxu0 %vm183_vm9, %v2324_v41 }
0x10f2   :  { %4394 = vmatprep.mubr.msk.f32.mxu0 %vm183_vm9, %v3032_v62 }
0x11c4   :  { %v2393_v47 = vpop.f32.mrb[12].mxu0 }
0x11c5   :  { %v2398_v10 = vrot.slane %v2393_v47, 2  ;;  %v4374_v6 = vpop.f32.mrb[13].mxu0  ;;  %v2399_v14 = vrot.slane %v2393_v47, 3  ;;  %v2400_v59 = vrot.slane %v2393_v47, 4  ;;  %v2401_v17 = vrot.slane %v2393_v47, 5 }
0x11c6   :  { %v2402_v9 = vrot.slane %v2393_v47, 6  ;;  %v2403_v50 = vrot.slane %v2393_v47, 7  ;;  %v2404_v58 = vrot.slane %v2393_v47, 1  ;;  %v2419_v52 = vadd.f32 %v2393_v47, %v5343_v49 }
0x11c7   :  { %v2413_v39 = vadd.f32 %v2398_v10, %v5323_v22  ;;  %v2414_v8 = vadd.f32 %v2399_v14, %v5327_v29  ;;  %v2415_v34 = vadd.f32 %v2400_v59, %v5330_v32  ;;  %v2416_v18 = vadd.f32 %v2401_v17, %v5325_v28 }
0x11c8   :  { %v2417_v24 = vadd.f32 %v2402_v9, %v5336_v40  ;;  %v2418_v21 = vadd.f32 %v2403_v50, %v5334_v38  ;;  %v2420_v55 = vadd.f32 %v2404_v58, %v5339_v45  ;;  %v4138_v41 = vmul.f32 -1.442695, %v2419_v52 }
0x11c9   :  { %5008 = vtanh.f32 %v2413_v39  ;;  %v4132_v60 = vmul.f32 -1.442695, %v2413_v39  ;;  %v4133_v23 = vmul.f32 -1.442695, %v2414_v8  ;;  %v4134_v44 = vmul.f32 -1.442695, %v2415_v34 }
0x11ca   :  { %5010 = vtanh.f32 %v2414_v8  ;;  %v4135_v15 = vmul.f32 -1.442695, %v2416_v18  ;;  %v4136_v42 = vmul.f32 -1.442695, %v2417_v24  ;;  %v4137_v30 = vmul.f32 -1.442695, %v2418_v21 }
0x11cb   :  { %5012 = vtanh.f32 %v2415_v34  ;;  %v4139_v57 = vmul.f32 -1.442695, %v2420_v55 }
0x11cc   :  { %5014 = vtanh.f32 %v2416_v18 }
0x11cd   :  { %5016 = vtanh.f32 %v2417_v24 }
0x11ce   :  { %5018 = vtanh.f32 %v2418_v21 }
0x11cf   :  { %5020 = vtanh.f32 %v2420_v55 }
0x11d0   :  { %5022 = vtanh.f32 %v2419_v52 }
0x11d1   :  { %5024 = vpow2.f32 %v4132_v60 }
0x11d2   :  { %5026 = vpow2.f32 %v4133_v23 }
0x11d3   :  { %v5009_v35 = vpop.eup %5008  ;;  %5028 = vpow2.f32 %v4134_v44 }
0x11d4   :  { %2517 = vrot.lane.b32.xlu0 %v5009_v35, %s5203_s0  ;;  %v5011_v54 = vpop.eup %5010  ;;  %5030 = vpow2.f32 %v4135_v15 }
0x11d5   :  { %v5013_v56 = vpop.eup %5012  ;;  %2519 = vrot.lane.b32.xlu1 %v5011_v54, %s5203_s0  ;;  %5032 = vpow2.f32 %v4136_v42 }
0x11d6   :  { %v5015_v20 = vpop.eup %5014  ;;  %5034 = vpow2.f32 %v4137_v30 }
0x11d7   :  { %v5017_v31 = vpop.eup %5016 }
0x11d8   :  { %2521 = vrot.lane.b32.xlu0 %v5013_v56, %s5203_s0  ;;  %v5019_v1 = vpop.eup %5018 }
0x11d9   :  { %2523 = vrot.lane.b32.xlu1 %v5015_v20, %s5203_s0  ;;  %v5021_v3 = vpop.eup %5020 }
0x11da   :  { %v5023_v13 = vpop.eup %5022 }
0x11db   :  { %v5025_v16 = vpop.eup %5024 }
0x11dc   :  { %2525 = vrot.lane.b32.xlu0 %v5017_v31, %s5203_s0  ;;  %v2445_v26 = vadd.f32 1.0, %v5025_v16  ;;  %v5027_v62 = vpop.eup %5026 }
0x11dd   :  { %2527 = vrot.lane.b32.xlu1 %v5019_v1, %s5203_s0  ;;  %v5029_v47 = vpop.eup %5028  ;;  %v2446_v10 = vadd.f32 1.0, %v5027_v62 }
0x11de   :  { %5036 = vrcp.f32 %v2445_v26  ;;  %v5031_v6 = vpop.eup %5030  ;;  %v2447_v39 = vadd.f32 1.0, %v5029_v47 }
0x11df   :  { %5038 = vpow2.f32 %v4139_v57  ;;  %v5033_v14 = vpop.eup %5032  ;;  %v2448_v17 = vadd.f32 1.0, %v5031_v6 }
0x11e0   :  { %2531 = vrot.lane.b32.xlu0 %v5021_v3, %s5203_s0  ;;  %5040 = vpow2.f32 %v4138_v41  ;;  %v5035_v59 = vpop.eup %5034  ;;  %v2449_v34 = vadd.f32 1.0, %v5033_v14 }
0x11e1   :  { %2529 = vrot.lane.b32.xlu1 %v5023_v13, %s5203_s0  ;;  %5042 = vrcp.f32 %v2446_v10  ;;  %v2450_v35 = vadd.f32 1.0, %v5035_v59  ;;  %v2485_v10 = vrot.slane %v6021_v43, 7  ;;  %v2486_v59 = vrot.slane %v6029_v5, 7 }
0x11e2   :  { %5044 = vrcp.f32 %v2447_v39 }
0x11e3   :  { %5046 = vrcp.f32 %v2448_v17  ;;  %v2487_v17 = vrot.slane %v6032_v33, 7 }
0x11e4   :  { %5048 = vrcp.f32 %v2449_v34 }
0x11e5   :  { %5050 = vrcp.f32 %v2450_v35 }
0x11e8   :  { %v6126_v8 = vpop.eup %5036 }
0x11e9   :  { %v5039_v50 = vpop.eup %5038  ;;  %v2501_v6 = vmul.f32 %v6126_v8, %v2485_v10 }
0x11ea   :  { %v5041_v58 = vpop.eup %5040  ;;  %v2452_v24 = vadd.f32 1.0, %v5039_v50 }
0x11eb   :  { %v2451_v21 = vadd.f32 1.0, %v5041_v58  ;;  %v6130_v55 = vpop.eup %5042  ;;  %v2489_v58 = vrot.slane %v6043_v36, 7  ;;  %v2492_v36 = vrot.slane %v6057_v7, 7 }
0x11ec   :  { %5052 = vrcp.f32 %v2452_v24  ;;  %v6132_v54 = vpop.eup %5044 }
0x11ed   :  { %5054 = vrcp.f32 %v2451_v21  ;;  %v6137_v1 = vpop.eup %5046  ;;  %v2503_v50 = vmul.f32 %v6132_v54, %v2487_v17 }
0x11ee   :  { %v6140_v13 = vpop.eup %5048 }
0x11ef   :  { %v6145_v15 = vpop.eup %5050 }
0x11f6   :  { %v6148_v42 = vpop.eup %5052 }
0x11f7   :  { %v6153_v41 = vpop.eup %5054 }
0x1246   :  { %v2518_v9 = vpop.permute.xlu0 %2517 }
0x1247   :  { %v2541_v18 = vmul.f32 %v6126_v8, %v2518_v9  ;;  %v2520_v52 = vpop.permute.xlu1 %2519  ;;  %v2502_v9 = vmul.f32 %v6130_v55, %v2486_v59  ;;  %v3042_v59 = vld [vmem:[%s6545_s4 + $0x10] sm:$0xff] }
0x1248   :  { %v2542_v56 = vmul.f32 %v6130_v55, %v2520_v52  ;;  %v2505_v52 = vmul.f32 %v6140_v13, %v2489_v58  ;;  %v842_v58 = vrot.slane %v5559_v12, 1 }
0x1249   :  { %2557 = vrot.lane.b32.xlu0 %v2541_v18, %s5204_s3  ;;  %v2488_v18 = vrot.slane %v6039_v19, 7 }
0x124a   :  { %v2522_v20 = vpop.permute.xlu0 %2521  ;;  %2559 = vrot.lane.b32.xlu1 %v2542_v56, %s5204_s3  ;;  %v2490_v56 = vrot.slane %v6052_v2, 7  ;;  %v2491_v2 = vrot.slane %v6050_v53, 7 }
0x124b   :  { %v2543_v31 = vmul.f32 %v6132_v54, %v2522_v20  ;;  %v2524_v3 = vpop.permute.xlu1 %2523  ;;  %v2504_v5 = vmul.f32 %v6137_v1, %v2488_v18 }
0x124c   :  { %v2544_v60 = vmul.f32 %v6137_v1, %v2524_v3  ;;  %v2506_v3 = vmul.f32 %v6145_v15, %v2490_v56  ;;  %v2507_v7 = vmul.f32 %v6153_v41, %v2491_v2 }
0x124d   :  { %2561 = vrot.lane.b32.xlu0 %v2543_v31, %s5204_s3 }
0x124e   :  { %v2526_v23 = vpop.permute.xlu0 %2525  ;;  %2563 = vrot.lane.b32.xlu1 %v2544_v60, %s5204_s3 }
0x124f   :  { %v2545_v44 = vmul.f32 %v6140_v13, %v2526_v23  ;;  %v2528_v16 = vpop.permute.xlu1 %2527  ;;  %v2508_v23 = vmul.f32 %v6148_v42, %v2492_v36 }
0x1250   :  { %v2546_v30 = vmul.f32 %v6145_v15, %v2528_v16 }
0x1251   :  { %2565 = vrot.lane.b32.xlu0 %v2545_v44, %s5204_s3 }
0x1252   :  { %v2532_v26 = vpop.permute.xlu0 %2531  ;;  %2567 = vrot.lane.b32.xlu1 %v2546_v30, %s5204_s3 }
0x1253   :  { %v2548_v57 = vmul.f32 %v6148_v42, %v2532_v26  ;;  %v2530_v62 = vpop.permute.xlu1 %2529 }
0x1254   :  { %v2547_v47 = vmul.f32 %v6153_v41, %v2530_v62 }
0x1255   :  { %2571 = vrot.lane.b32.xlu0 %v2548_v57, %s5204_s3 }
0x1256   :  { %2569 = vrot.lane.b32.xlu1 %v2547_v47, %s5204_s3 }
0x12bb   :  { %v2558_v39 = vpop.permute.xlu0 %2557 }
0x12bc   :  { %v6160_v14 = vadd.f32 %v2558_v39, %v2501_v6  ;;  %v2560_v34 = vpop.permute.xlu1 %2559  ;;  %v3040_v6 = vld [vmem:[%s6545_s4] sm:$0xff]  ;;  %v3041_v39 = vld [vmem:[%s6545_s4 + $0x8] sm:$0xff] }
0x12bd   :  { %v6168_v35 = vadd.f32 %v2560_v34, %v2502_v9  ;;  %v4557_v17 = vpack.c.bf16 %v3041_v39, %v3040_v6  ;;  %v3043_v9 = vld [vmem:[%s6545_s4 + $0x18] sm:$0xff] }
0x12be   :  { %5056 = vtanh.f32 %v6160_v14  ;;  %v4561_v34 = vpack.c.bf16 %v3043_v9, %v3042_v59 }
0x12bf   :  { %v2562_v43 = vpop.permute.xlu0 %2561  ;;  %5058 = vtanh.f32 %v6168_v35  ;;  %4558 = vmatprep.subr.bf16.mxu0 %v4557_v17 }
0x12c0   :  { %v6171_v24 = vadd.f32 %v2562_v43, %v2503_v50  ;;  %v2564_v33 = vpop.permute.xlu1 %2563  ;;  %4560 = vmatpush3.bf16.msra.mxu0 %v4557_v17 }
0x12c1   :  { %v6178_v19 = vadd.f32 %v2564_v33, %v2504_v5  ;;  %4562 = vmatprep.subr.bf16.mxu0 %v4561_v34 }
0x12c2   :  { %5060 = vtanh.f32 %v6171_v24 }
0x12c3   :  { %v2566_v20 = vpop.permute.xlu0 %2565  ;;  %5062 = vtanh.f32 %v6178_v19 }
0x12c4   :  { %v6182_v31 = vadd.f32 %v2566_v20, %v2505_v52  ;;  %v2568_v60 = vpop.permute.xlu1 %2567  ;;  %4564 = vmatpush3.bf16.msra.mxu0 %v4561_v34 }
0x12c5   :  { %v6189_v44 = vadd.f32 %v2568_v60, %v2506_v3  ;;  %4577 = vmatprep.subr.bf16.mxu0 %v5200_v0 }
0x12c6   :  { %5064 = vtanh.f32 %v6182_v31 }
0x12c7   :  { %v2572_v16 = vpop.permute.xlu0 %2571  ;;  %5066 = vtanh.f32 %v6189_v44 }
0x12c8   :  { %v5057_v21 = vpop.eup %5056  ;;  %v6191_v30 = vadd.f32 %v2572_v16, %v2508_v23  ;;  %v2570_v26 = vpop.permute.xlu1 %2569 }
0x12c9   :  { %2605 = vrot.lane.b32.xlu0 %v5057_v21, %s5203_s0  ;;  %v5059_v57 = vpop.eup %5058  ;;  %v6196_v62 = vadd.f32 %v2570_v26, %v2507_v7 }
0x12ca   :  { %5068 = vtanh.f32 %v6191_v30  ;;  %2607 = vrot.lane.b32.xlu1 %v5059_v57, %s5203_s0 }
0x12cb   :  { %5070 = vtanh.f32 %v6196_v62 }
0x12cc   :  { %v5061_v47 = vpop.eup %5060 }
0x12cd   :  { %2609 = vrot.lane.b32.xlu0 %v5061_v47, %s5203_s0  ;;  %v5063_v53 = vpop.eup %5062 }
0x12ce   :  { %2611 = vrot.lane.b32.xlu1 %v5063_v53, %s5203_s0 }
0x12d0   :  { %v5065_v10 = vpop.eup %5064 }
0x12d1   :  { %2613 = vrot.lane.b32.xlu0 %v5065_v10, %s5203_s0  ;;  %v5067_v50 = vpop.eup %5066 }
0x12d2   :  { %2615 = vrot.lane.b32.xlu1 %v5067_v50, %s5203_s0 }
0x12d4   :  { %v5069_v18 = vpop.eup %5068 }
0x12d5   :  { %2619 = vrot.lane.b32.xlu0 %v5069_v18, %s5203_s0  ;;  %v5071_v43 = vpop.eup %5070 }
0x12d6   :  { %2617 = vrot.lane.b32.xlu1 %v5071_v43, %s5203_s0 }
0x12d9   :  { %843 = vrot.lane.b32.xlu0 %v5566_v25, %s5204_s3 }
0x12da   :  { %845 = vrot.lane.b32.xlu1 %v842_v58, %s5204_s3 }
0x133b   :  { %v2606_v5 = vpop.permute.xlu0 %2605 }
0x133c   :  { %v2629_v21 = vmul.f32 %v6126_v8, %v2606_v5  ;;  %v2608_v33 = vpop.permute.xlu1 %2607 }
0x133d   :  { %v2630_v52 = vmul.f32 %v6130_v55, %v2608_v33 }
0x133e   :  { %v2672_v56 = vrot.slane %v2629_v21, 6 }
0x133f   :  { %v2610_v20 = vpop.permute.xlu0 %2609  ;;  %v2645_v3 = vrot.slane %v2630_v52, 7  ;;  %v2673_v60 = vrot.slane %v2630_v52, 5 }
0x1340   :  { %v2631_v36 = vmul.f32 %v6132_v54, %v2610_v20  ;;  %v2612_v23 = vpop.permute.xlu1 %2611 }
0x1341   :  { %v2674_v2 = vsel %vm482_vm2, %v2673_v60, %v2672_v56  ;;  %v2632_v12 = vmul.f32 %v6137_v1, %v2612_v23  ;;  %v6229_v26 = vsel %vm500_vm8, %v2645_v3, %v2629_v21  ;;  %v3179_v3 = vld [vmem:[%s6546_s5] sm:$0xff]  ;;  %v3180_v60 = vld [vmem:[%s6546_s5 + $0x8] sm:$0xff] }
0x1342   :  { %v2675_v25 = vrot.slane %v2631_v36, 4  ;;  %v2647_v16 = vrot.slane %v2631_v36, 6 }
0x1343   :  { %v2614_v7 = vpop.permute.xlu0 %2613  ;;  %v2648_v57 = vrot.slane %v2632_v12, 5  ;;  %v2677_v47 = vrot.slane %v2632_v12, 3  ;;  %v3182_v12 = vld [vmem:[%s6546_s5 + $0x18] sm:$0xff] }
0x1344   :  { %v2676_v8 = vsel %vm485_vm3, %v2675_v25, %v2674_v2  ;;  %v2633_v55 = vmul.f32 %v6140_v13, %v2614_v7  ;;  %v2616_v54 = vpop.permute.xlu1 %2615  ;;  %v6255_v25 = vpack.c.bf16 %v3180_v60, %v3179_v3  ;;  %v3181_v2 = vld [vmem:[%s6546_s5 + $0x10] sm:$0xff] }
0x1345   :  { %v2649_v6 = vsel %vm482_vm2, %v2648_v57, %v2647_v16  ;;  %v2634_v39 = vmul.f32 %v6145_v15, %v2616_v54  ;;  %v2678_v1 = vsel %vm488_vm4, %v2677_v47, %v2676_v8  ;;  %v6266_v16 = vpack.c.bf16 %v3182_v12, %v3181_v2  ;;  %v6291_v54 = vld [vmem:[%s6547_s6] ss:$0 sm:$0xff] }
0x1346   :  { %v2650_v53 = vrot.slane %v2633_v55, 4  ;;  %v2679_v10 = vrot.slane %v2633_v55, 2 }
0x1347   :  { %v2620_v59 = vpop.permute.xlu0 %2619  ;;  %v2652_v50 = vrot.slane %v2634_v39, 3  ;;  %v2681_v13 = vrot.slane %v2634_v39, 1 }
0x1348   :  { %v2651_v17 = vsel %vm485_vm3, %v2650_v53, %v2649_v6  ;;  %v2680_v9 = vsel %vm491_vm5, %v2679_v10, %v2678_v1  ;;  %v2636_v34 = vmul.f32 %v6148_v42, %v2620_v59  ;;  %v2618_v18 = vpop.permute.xlu1 %2617 }
0x1349   :  { %v2635_v58 = vmul.f32 %v6153_v41, %v2618_v18  ;;  %v2682_v5 = vsel %vm494_vm6, %v2681_v13, %v2680_v9  ;;  %v2653_v15 = vsel %vm488_vm4, %v2652_v50, %v2651_v17 }
0x134a   :  { %v2684_v43 = vrot.slane %v2636_v34, 7  ;;  %v2656_v33 = vrot.slane %v2636_v34, 1 }
0x134b   :  { %v844_v21 = vpop.permute.xlu0 %843  ;;  %v2654_v52 = vrot.slane %v2635_v58, 2  ;;  %v2683_v56 = vsel %vm497_vm7, %v2635_v58, %v2682_v5 }
0x134c   :  { %850 = vst.msk [vmem:[#allocation2 + $0x7] sm:$0xfe] %vm849_vm10, %v844_v21  ;;  %v846_v20 = vpop.permute.xlu1 %845  ;;  %v2685_v42 = vsel %vm500_vm8, %v2684_v43, %v2683_v56  ;;  %vm3029_vm8 = vcmask 260096  }
0x134d   :  { %852 = vst.msk [vmem:[#allocation2 + $0xf] sm:$0x1] %vm851_vm11, %v846_v20  ;;  %2686 = vrot.lane.b32.xlu0 %v2685_v42, %s5204_s3  ;;  %v2655_v36 = vsel %vm491_vm5, %v2654_v52, %v2653_v15 }
0x134e   :  { %v6247_v41 = vsel %vm494_vm6, %v2656_v33, %v2655_v36 }
0x1354   :  { %v3033_v23 = vld [vmem:[#allocation2 + $0x8] sm:$0xff] }
0x1355   :  { %4395 = vmatmul.mubr.msk.f32.vlgmr.msra.gmra.mrb[14].mxu0 %vm183_vm9, %v3033_v23 }
0x1356   :  { %4579 = vmatpush3.bf16.msra.mxu0 %v6255_v25 }
0x1357   :  { %4580 = vmatprep.subr.bf16.mxu0 %v5200_v0 }
0x135a   :  { %4582 = vmatpush3.bf16.msra.mxu0 %v6266_v16 }
0x135b   :  { %4589 = vmatprep.subr.bf16.mxu0 %v5200_v0 }
0x13bf   :  { %v2687_v7 = vpop.permute.xlu0 %2686 }
0x13c0   :  { %4384 = vmatmul.mubr.msk.f32.vlgmr.msra.gmra.mrb[8].mxu1 %vm183_vm9, %v2687_v7 }
0x13c1   :  { %4567 = vmatpush3.bf16.msra.mxu1 %v6255_v25  ;;  %4414 = vmatprep.mubr.msk.f32.mxu1 %vm5201_vm1, %v5202_v4 }
0x13c2   :  { %4568 = vmatprep.subr.bf16.mxu1 %v5200_v0 }
0x13c5   :  { %4570 = vmatpush3.bf16.msra.mxu1 %v6266_v16 }
0x13c6   :  { %4571 = vmatprep.subr.bf16.mxu1 %v5200_v0 }
0x13c8   :  { %4415 = vmatmul.mubr.f32.vlgmr.msra.gmra.mrb[10].mxu1 %v5202_v4 }
0x13c9   :  { %4573 = vmatpush3.bf16.msra.mxu1 %v6255_v25  ;;  %4425 = vmatprep.mubr.msk.f32.mxu1 %vm5201_vm1, %v5202_v4 }
0x13ca   :  { %4574 = vmatprep.subr.bf16.mxu1 %v5200_v0 }
0x13cd   :  { %4576 = vmatpush3.bf16.msra.mxu1 %v6266_v16 }
0x13ce   :  { %4583 = vmatprep.subr.bf16.mxu1 %v5200_v0 }
0x1428   :  { %v6284_v8 = vpop.f32.mrb[14].mxu0 }
0x1429   :  { %v3140_v55 = vpop.f32.mrb[15].mxu0 }
0x142a   :  { %v3141_v53 = vadd.f32 %v6291_v54, %v3140_v55 }
0x1493   :  { %v6286_v57 = vpop.f32.mrb[8].mxu1 }
0x1494   :  { %v4385_v47 = vpop.f32.mrb[9].mxu1  ;;  %v2762_v18 = vrot.slane %v6286_v57, 2  ;;  %v2764_v21 = vrot.slane %v6286_v57, 4  ;;  %v2766_v33 = vrot.slane %v6286_v57, 6  ;;  %v2783_v42 = vadd.f32 %v6286_v57, %v5339_v45 }
0x1495   :  { %v2765_v23 = vrot.slane %v6286_v57, 5  ;;  %v2767_v12 = vrot.slane %v6286_v57, 7  ;;  %v2761_v47 = vrot.slane %v6286_v57, 1 }
0x1496   :  { %v2777_v15 = vadd.f32 %v2762_v18, %v5327_v29  ;;  %v2779_v52 = vadd.f32 %v2764_v21, %v5325_v28  ;;  %v2781_v56 = vadd.f32 %v2766_v33, %v5334_v38  ;;  %v2763_v38 = vrot.slane %v6286_v57, 3 }
0x1497   :  { %v2780_v7 = vadd.f32 %v2765_v23, %v5336_v40 }
0x1498   :  { %v4142_v60 = vmul.f32 -1.442695, %v2777_v15  ;;  %v2778_v45 = vadd.f32 %v2763_v38, %v5330_v32  ;;  %v4144_v2 = vmul.f32 -1.442695, %v2779_v52  ;;  %v4146_v55 = vmul.f32 -1.442695, %v2781_v56 }
0x1499   :  { %v2776_v32 = vadd.f32 %v2761_v47, %v5323_v22  ;;  %v4145_v23 = vmul.f32 -1.442695, %v2780_v7 }
0x149a   :  { %v4143_v38 = vmul.f32 -1.442695, %v2778_v45 }
0x149b   :  { %v3249_v10 = vpop.f32.mrb[10].mxu1 }
0x149c   :  { %v3253_v6 = vadd.f32 %v3249_v10, %v3141_v53  ;;  %v4416_v39 = vpop.f32.mrb[11].mxu1  ;;  %v2782_v53 = vadd.f32 %v2767_v12, %v5343_v49 }
0x149e   :  { %5072 = vtanh.f32 %v3253_v6  ;;  %v4158_v59 = vmul.f32 -1.442695, %v3253_v6  ;;  %v4148_v6 = vmul.f32 -1.442695, %v2783_v42 }
0x14a0   :  { %5074 = vpow2.f32 %v4158_v59 }
0x14a8   :  { %v5073_v1 = vpop.eup %5072 }
0x14a9   :  { %3263 = vrot.lane.b32.xlu1 %v5073_v1, %s5203_s0 }
0x14aa   :  { %v5075_v17 = vpop.eup %5074 }
0x14ab   :  { %v3257_v9 = vadd.f32 1.0, %v5075_v17 }
0x14ad   :  { %5076 = vrcp.f32 %v3257_v9 }
0x14b7   :  { %v5077_v34 = vpop.eup %5076 }
0x14b8   :  { %v3261_v43 = vmul.f32 0.0, %v5077_v34 }
0x151b   :  { %v3264_v50 = vpop.permute.xlu1 %3263 }
0x151c   :  { %v3266_v13 = vmul.f32 %v5077_v34, %v3264_v50 }
0x151e   :  { %3268 = vrot.lane.b32.xlu0 %v3266_v13, %s5204_s3 }
0x1590   :  { %v3269_v58 = vpop.permute.xlu0 %3268 }
0x1591   :  { %v6297_v5 = vadd.f32 %v3269_v58, %v3261_v43 }
0x1593   :  { %5078 = vtanh.f32 %v6297_v5 }
0x1594   :  { %5080 = vtanh.f32 %v2777_v15 }
0x1595   :  { %5082 = vtanh.f32 %v2779_v52 }
0x1596   :  { %5084 = vtanh.f32 %v2781_v56 }
0x1597   :  { %5086 = vtanh.f32 %v2783_v42 }
0x1598   :  { %5088 = vpow2.f32 %v4142_v60 }
0x1599   :  { %5090 = vtanh.f32 %v2778_v45 }
0x159a   :  { %5092 = vpow2.f32 %v4144_v2  ;;  %v4147_v2 = vmul.f32 -1.442695, %v2782_v53 }
0x159b   :  { %5094 = vtanh.f32 %v2780_v7 }
0x159c   :  { %5096 = vpow2.f32 %v4146_v55  ;;  %v4141_v55 = vmul.f32 -1.442695, %v2776_v32 }
0x159d   :  { %v5079_v20 = vpop.eup %5078  ;;  %5098 = vtanh.f32 %v2782_v53 }
0x159e   :  { %3274 = vrot.lane.b32.xlu1 %v5079_v20, %s5203_s0  ;;  %v5081_v36 = vpop.eup %5080  ;;  %5100 = vpow2.f32 %v4148_v6  ;;  %v3146_v6 = vadd.f32 %v6284_v8, %v6291_v54 }
0x159f   :  { %v5083_v29 = vpop.eup %5082  ;;  %5102 = vtanh.f32 %v2776_v32 }
0x15a0   :  { %v5085_v3 = vpop.eup %5084 }
0x15a1   :  { %v5087_v28 = vpop.eup %5086 }
0x15a2   :  { %2882 = vrot.lane.b32.xlu1 %v5081_v36, %s5203_s0  ;;  %v5089_v1 = vpop.eup %5088 }
0x15a3   :  { %v5091_v40 = vpop.eup %5090  ;;  %v2809_v59 = vadd.f32 1.0, %v5089_v1 }
0x15a4   :  { %v5093_v17 = vpop.eup %5092 }
0x15a5   :  { %v5095_v57 = vpop.eup %5094  ;;  %5104 = vrcp.f32 %v2809_v59  ;;  %v2811_v49 = vadd.f32 1.0, %v5093_v17 }
0x15a6   :  { %2886 = vrot.lane.b32.xlu1 %v5083_v29, %s5203_s0  ;;  %v5097_v9 = vpop.eup %5096 }
0x15a7   :  { %v5099_v50 = vpop.eup %5098  ;;  %5106 = vrcp.f32 %v2811_v49  ;;  %v2813_v13 = vadd.f32 1.0, %v5097_v9 }
0x15a8   :  { %v5101_v18 = vpop.eup %5100 }
0x15a9   :  { %v5103_v22 = vpop.eup %5102  ;;  %v2815_v43 = vadd.f32 1.0, %v5101_v18  ;;  %5108 = vrcp.f32 %v2813_v13 }
0x15aa   :  { %2890 = vrot.lane.b32.xlu1 %v5085_v3, %s5203_s0 }
0x15ab   :  { %5110 = vrcp.f32 %v2815_v43 }
0x15ac   :  { %5112 = vpow2.f32 %v4143_v38 }
0x15ad   :  { %5114 = vpow2.f32 %v4145_v23 }
0x15ae   :  { %2894 = vrot.lane.b32.xlu1 %v5087_v28, %s5203_s0  ;;  %5116 = vpow2.f32 %v4147_v2 }
0x15af   :  { %v6325_v21 = vpop.eup %5104  ;;  %5118 = vpow2.f32 %v4141_v55 }
0x15b1   :  { %v6329_v33 = vpop.eup %5106 }
0x15b3   :  { %v6333_v20 = vpop.eup %5108 }
0x15b5   :  { %v6337_v29 = vpop.eup %5110 }
0x15b6   :  { %v5113_v47 = vpop.eup %5112 }
0x15b7   :  { %v2810_v1 = vadd.f32 1.0, %v5113_v47  ;;  %v5115_v17 = vpop.eup %5114 }
0x15b8   :  { %v2812_v7 = vadd.f32 1.0, %v5115_v17 }
0x1610   :  { %v3275_v10 = vpop.permute.xlu1 %3274 }
0x1611   :  { %v3277_v39 = vmul.f32 %v5077_v34, %v3275_v10 }
0x1613   :  { %3279 = vrot.lane.b32.xlu0 %v3277_v39, %s5204_s3 }
0x1614   :  { %v2883_v34 = vpop.permute.xlu1 %2882 }
0x1615   :  { %v2905_v15 = vmul.f32 %v6325_v21, %v2883_v34 }
0x1617   :  { %2884 = vrot.lane.b32.xlu0 %v5091_v40, %s5203_s0 }
0x1618   :  { %v2887_v58 = vpop.permute.xlu1 %2886 }
0x1619   :  { %v2907_v56 = vmul.f32 %v6329_v33, %v2887_v58  ;;  %v2851_v58 = vrot.slane %v6178_v19, 7 }
0x161b   :  { %2888 = vrot.lane.b32.xlu0 %v5095_v57, %s5203_s0  ;;  %v5117_v57 = vpop.eup %5116 }
0x161c   :  { %v2891_v52 = vpop.permute.xlu1 %2890  ;;  %v2814_v53 = vadd.f32 1.0, %v5117_v57  ;;  %v5119_v32 = vpop.eup %5118 }
0x161d   :  { %v2909_v42 = vmul.f32 %v6333_v20, %v2891_v52  ;;  %v2808_v34 = vadd.f32 1.0, %v5119_v32 }
0x161f   :  { %2892 = vrot.lane.b32.xlu0 %v5099_v50, %s5203_s0  ;;  %v2849_v50 = vrot.slane %v6168_v35, 7 }
0x1620   :  { %v2895_v36 = vpop.permute.xlu1 %2894 }
0x1621   :  { %v2911_v3 = vmul.f32 %v6337_v29, %v2895_v36  ;;  %v2853_v36 = vrot.slane %v6189_v44, 7 }
0x1623   :  { %2880 = vrot.lane.b32.xlu0 %v5103_v22, %s5203_s0  ;;  %v2865_v22 = vmul.f32 %v6325_v21, %v2849_v50  ;;  %v2869_v38 = vmul.f32 %v6333_v20, %v2853_v36  ;;  %v2854_v50 = vrot.slane %v6196_v62, 7 }
0x1627   :  { %2922 = vrot.lane.b32.xlu0 %v2905_v15, %s5204_s3 }
0x162b   :  { %2926 = vrot.lane.b32.xlu0 %v2907_v56, %s5204_s3  ;;  %v2867_v56 = vmul.f32 %v6329_v33, %v2851_v58 }
0x162f   :  { %2930 = vrot.lane.b32.xlu0 %v2909_v42, %s5204_s3 }
0x1633   :  { %2934 = vrot.lane.b32.xlu0 %v2911_v3, %s5204_s3 }
0x1685   :  { %v3280_v28 = vpop.permute.xlu0 %3279 }
0x1686   :  { %4426 = vmatmul.mubr.msk.f32.vlgmr.msra.gmra.mrb[12].mxu1 %vm183_vm9, %v3280_v28 }
0x1687   :  { %4585 = vmatpush3.bf16.msra.mxu1 %v6255_v25  ;;  %4447 = vmatprep.mubr.msk.f32.mxu1 %vm5201_vm1, %v5202_v4 }
0x1688   :  { %4586 = vmatprep.subr.bf16.mxu1 %v5200_v0 }
0x1689   :  { %v2885_v60 = vpop.permute.xlu0 %2884 }
0x168b   :  { %4588 = vmatpush3.bf16.msra.mxu1 %v6266_v16 }
0x168c   :  { %4595 = vmatprep.subr.bf16.mxu1 %v5200_v0 }
0x168d   :  { %v2889_v12 = vpop.permute.xlu0 %2888 }
0x1691   :  { %v2893_v10 = vpop.permute.xlu0 %2892 }
0x1695   :  { %v2881_v45 = vpop.permute.xlu0 %2880 }
0x1699   :  { %v2923_v49 = vpop.permute.xlu0 %2922 }
0x169a   :  { %v2945_v15 = vadd.f32 %v2923_v49, %v2865_v22  ;;  %v2852_v49 = vrot.slane %v6182_v31, 7  ;;  %v2848_v22 = vrot.slane %v6160_v14, 7 }
0x169d   :  { %v2927_v18 = vpop.permute.xlu0 %2926 }
0x169e   :  { %v2947_v3 = vadd.f32 %v2927_v18, %v2867_v56 }
0x16a1   :  { %v2931_v42 = vpop.permute.xlu0 %2930 }
0x16a2   :  { %v2949_v23 = vadd.f32 %v2931_v42, %v2869_v38 }
0x1759   :  { %v3349_v39 = vpop.f32.mrb[12].mxu1 }
0x175a   :  { %v3353_v40 = vadd.f32 %v3349_v39, %v3146_v6  ;;  %v4427_v59 = vpop.f32.mrb[13].mxu1 }
0x175c   :  { %5120 = vtanh.f32 %v3353_v40  ;;  %v4160_v39 = vmul.f32 -1.442695, %v3353_v40 }
0x175d   :  { %5122 = vrcp.f32 %v2810_v1 }
0x175e   :  { %5124 = vrcp.f32 %v2812_v7  ;;  %v2850_v7 = vrot.slane %v6171_v24, 7 }
0x175f   :  { %5126 = vrcp.f32 %v2814_v53 }
0x1760   :  { %5128 = vrcp.f32 %v2808_v34 }
0x1761   :  { %5130 = vtanh.f32 %v2945_v15 }
0x1762   :  { %5132 = vtanh.f32 %v2947_v3 }
0x1763   :  { %5134 = vtanh.f32 %v2949_v23 }
0x1766   :  { %v5121_v9 = vpop.eup %5120 }
0x1767   :  { %3363 = vrot.lane.b32.xlu1 %v5121_v9, %s5203_s0  ;;  %v6351_v8 = vpop.eup %5122 }
0x1768   :  { %v2906_v13 = vmul.f32 %v6351_v8, %v2885_v60  ;;  %v6357_v43 = vpop.eup %5124  ;;  %v2855_v60 = vrot.slane %v6191_v30, 7  ;;  %v2866_v53 = vmul.f32 %v6351_v8, %v2850_v7 }
0x1769   :  { %v2908_v52 = vmul.f32 %v6357_v43, %v2889_v12  ;;  %v6363_v35 = vpop.eup %5126  ;;  %v2935_v12 = vpop.permute.xlu0 %2934  ;;  %v2868_v40 = vmul.f32 %v6357_v43, %v2852_v49 }
0x176a   :  { %v2910_v28 = vmul.f32 %v6363_v35, %v2893_v10  ;;  %v6369_v19 = vpop.eup %5128  ;;  %v2871_v55 = vmul.f32 %v6337_v29, %v2855_v60  ;;  %v2870_v24 = vmul.f32 %v6363_v35, %v2854_v50 }
0x176b   :  { %2924 = vrot.lane.b32.xlu1 %v2906_v13, %s5204_s3  ;;  %v2904_v2 = vmul.f32 %v6369_v19, %v2881_v45  ;;  %v5131_v47 = vpop.eup %5130  ;;  %v2864_v15 = vmul.f32 %v6369_v19, %v2848_v22 }
0x176c   :  { %v2951_v44 = vadd.f32 %v2935_v12, %v2871_v55  ;;  %v5133_v10 = vpop.eup %5132 }
0x176d   :  { %v5135_v6 = vpop.eup %5134 }
0x176e   :  { %5136 = vtanh.f32 %v2951_v44 }
0x176f   :  { %2928 = vrot.lane.b32.xlu1 %v2908_v52, %s5204_s3  ;;  %5138 = vpow2.f32 %v4160_v39 }
0x1773   :  { %2932 = vrot.lane.b32.xlu1 %v2910_v28, %s5204_s3 }
0x1777   :  { %2920 = vrot.lane.b32.xlu1 %v2904_v2, %s5204_s3 }
0x1778   :  { %v5137_v30 = vpop.eup %5136 }
0x1779   :  { %v5139_v1 = vpop.eup %5138 }
0x177a   :  { %v3357_v59 = vadd.f32 1.0, %v5139_v1 }
0x177b   :  { %2970 = vrot.lane.b32.xlu1 %v5131_v47, %s5203_s0 }
0x177c   :  { %5140 = vrcp.f32 %v3357_v59 }
0x177f   :  { %2974 = vrot.lane.b32.xlu1 %v5133_v10, %s5203_s0 }
0x1783   :  { %2978 = vrot.lane.b32.xlu1 %v5135_v6, %s5203_s0 }
0x1786   :  { %v6379_v17 = vpop.eup %5140 }
0x1787   :  { %2982 = vrot.lane.b32.xlu1 %v5137_v30, %s5203_s0  ;;  %v3361_v14 = vmul.f32 %v6379_v17, %v6297_v5 }
0x17d9   :  { %v3364_v45 = vpop.permute.xlu1 %3363 }
0x17da   :  { %v3366_v57 = vmul.f32 %v6379_v17, %v3364_v45 }
0x17dc   :  { %3368 = vrot.lane.b32.xlu0 %v3366_v57, %s5204_s3 }
0x17dd   :  { %v2925_v32 = vpop.permute.xlu1 %2924 }
0x17de   :  { %v2946_v9 = vadd.f32 %v2925_v32, %v2866_v53 }
0x17e0   :  { %5142 = vtanh.f32 %v2946_v9 }
0x17e1   :  { %v2929_v34 = vpop.permute.xlu1 %2928 }
0x17e2   :  { %v2948_v13 = vadd.f32 %v2929_v34, %v2868_v40 }
0x17e4   :  { %5144 = vtanh.f32 %v2948_v13 }
0x17e5   :  { %v2933_v18 = vpop.permute.xlu1 %2932 }
0x17e6   :  { %v2950_v58 = vadd.f32 %v2933_v18, %v2870_v24 }
0x17e8   :  { %5146 = vtanh.f32 %v2950_v58 }
0x17e9   :  { %v2921_v52 = vpop.permute.xlu1 %2920 }
0x17ea   :  { %v5143_v31 = vpop.eup %5142  ;;  %v2944_v56 = vadd.f32 %v2921_v52, %v2864_v15 }
0x17eb   :  { %2972 = vrot.lane.b32.xlu0 %v5143_v31, %s5203_s0 }
0x17ec   :  { %5148 = vtanh.f32 %v2944_v56 }
0x17ee   :  { %v5145_v42 = vpop.eup %5144 }
0x17ef   :  { %2976 = vrot.lane.b32.xlu0 %v5145_v42, %s5203_s0 }
0x17f2   :  { %v5147_v62 = vpop.eup %5146 }
0x17f3   :  { %2980 = vrot.lane.b32.xlu0 %v5147_v62, %s5203_s0 }
0x17f6   :  { %v5149_v36 = vpop.eup %5148 }
0x17f7   :  { %2968 = vrot.lane.b32.xlu0 %v5149_v36, %s5203_s0 }
0x17fb   :  { %1206 = vrot.lane.b32.xlu0 %v5707_v61, %s5204_s3  ;;  %v2971_v61 = vpop.permute.xlu1 %2970 }
0x17ff   :  { %1569 = vrot.lane.b32.xlu0 %v5834_v51, %s5204_s3 }
0x1803   :  { %1932 = vrot.lane.b32.xlu0 %v5958_v48, %s5204_s3  ;;  %v2975_v48 = vpop.permute.xlu1 %2974 }
0x1804   :  { %v2995_v12 = vmul.f32 %v6329_v33, %v2975_v48 }
0x1807   :  { %2295 = vrot.lane.b32.xlu0 %v6091_v37, %s5204_s3  ;;  %v2979_v5 = vpop.permute.xlu1 %2978 }
0x180b   :  { %2658 = vrot.lane.b32.xlu0 %v6229_v26, %s5204_s3  ;;  %v2993_v26 = vmul.f32 %v6325_v21, %v2971_v61  ;;  %v2997_v21 = vmul.f32 %v6333_v20, %v2979_v5 }
0x180d   :  { %v3008_v44 = vrot.slane %v2993_v26, 7 }
0x184e   :  { %v3369_v3 = vpop.permute.xlu0 %3368 }
0x184f   :  { %v6407_v28 = vadd.f32 %v3369_v3, %v3361_v14 }
0x1851   :  { %5150 = vtanh.f32 %v6407_v28 }
0x185b   :  { %v5151_v38 = vpop.eup %5150 }
0x185c   :  { %3374 = vrot.lane.b32.xlu1 %v5151_v38, %s5203_s0 }
0x185d   :  { %v2973_v51 = vpop.permute.xlu0 %2972 }
0x185e   :  { %v2994_v60 = vmul.f32 %v6351_v8, %v2973_v51 }
0x1860   :  { %1208 = vrot.lane.b32.xlu1 %v5712_v11, %s5204_s3  ;;  %v3009_v23 = vrot.slane %v2994_v60, 6  ;;  %v3011_v11 = vrot.slane %v2995_v12, 5 }
0x1861   :  { %v2977_v37 = vpop.permute.xlu0 %2976 }
0x1862   :  { %v2996_v2 = vmul.f32 %v6357_v43, %v2977_v37  ;;  %v3010_v47 = vsel %vm482_vm2, %v3009_v23, %v3008_v44  ;;  %v2983_v43 = vpop.permute.xlu1 %2982  ;;  %vm1214_vm2 = vcmask 254976  }
0x1864   :  { %1571 = vrot.lane.b32.xlu1 %v5840_v63, %s5204_s3  ;;  %v3013_v8 = vrot.slane %v2996_v2, 4  ;;  %v3012_v63 = vsel %vm485_vm3, %v3011_v11, %v3010_v47  ;;  %vm1577_vm3 = vcmask 256000  }
0x1865   :  { %v2981_v55 = vpop.permute.xlu0 %2980 }
0x1866   :  { %v2998_v10 = vmul.f32 %v6363_v35, %v2981_v55  ;;  %v3014_v33 = vsel %vm488_vm4, %v3013_v8, %v3012_v63  ;;  %v3015_v35 = vrot.slane %v2997_v21, 3  ;;  %vm1940_vm4 = vcmask 257024  }
0x1868   :  { %1934 = vrot.lane.b32.xlu1 %v5965_v27, %s5204_s3  ;;  %v3017_v39 = vrot.slane %v2998_v10, 2  ;;  %v2999_v27 = vmul.f32 %v6337_v29, %v2983_v43  ;;  %v3016_v20 = vsel %vm491_vm5, %v3015_v35, %v3014_v33  ;;  %vm3027_vm5 = vcmask 261127  }
0x1869   :  { %v2969_v6 = vpop.permute.xlu0 %2968 }
0x186a   :  { %v2992_v30 = vmul.f32 %v6369_v19, %v2969_v6  ;;  %v3018_v19 = vsel %vm494_vm6, %v3017_v39, %v3016_v20  ;;  %v3019_v59 = vrot.slane %v2999_v27, 1  ;;  %vm2303_vm6 = vcmask 258048  }
0x186c   :  { %2297 = vrot.lane.b32.xlu1 %v6105_v46, %s5204_s3  ;;  %3021 = vrot.lane.b32.xlu0 %v2992_v30, %s5204_s3  ;;  %v3020_v46 = vsel %vm497_vm7, %v3019_v59, %v3018_v19  ;;  %vm2666_vm7 = vcmask 259072  }
0x186d   :  { %v1207_v1 = vpop.permute.xlu0 %1206 }
0x186e   :  { %1213 = vst.msk [vmem:[#allocation2 + $0xe] sm:$0xfc] %vm1212_vm12, %v1207_v1 }
0x1870   :  { %2660 = vrot.lane.b32.xlu1 %v6247_v41, %s5204_s3 }
0x1871   :  { %v1570_v45 = vpop.permute.xlu0 %1569 }
0x1872   :  { %1576 = vst.msk [vmem:[#allocation2 + $0x15] sm:$0xf8] %vm1575_vm13, %v1570_v45 }
0x1874   :  { %3023 = vrot.lane.b32.xlu1 %v3020_v46, %s5204_s3 }
0x1875   :  { %v1933_v7 = vpop.permute.xlu0 %1932 }
0x1876   :  { %1939 = vst.msk [vmem:[#allocation2 + $0x1c] sm:$0xf0] %vm1938_vm14, %v1933_v7 }
0x1879   :  { %v2296_v29 = vpop.permute.xlu0 %2295 }
0x187a   :  { %2302 = vst.msk [vmem:[#allocation2 + $0x23] sm:$0xe0] %vm2301_vm15, %v2296_v29 }
0x187d   :  { %v2659_v57 = vpop.permute.xlu0 %2658 }
0x187e   :  { %2665 = vst.msk [vmem:[#allocation2 + $0x2a] sm:$0xc0] %vm2664_vm0, %v2659_v57 }
0x18ce   :  { %v3375_v53 = vpop.permute.xlu1 %3374 }
0x18cf   :  { %v3377_v32 = vmul.f32 %v6379_v17, %v3375_v53 }
0x18d1   :  { %3379 = vrot.lane.b32.xlu0 %v3377_v32, %s5204_s3 }
0x18d2   :  { %v1209_v41 = vpop.permute.xlu1 %1208 }
0x18d3   :  { %1215 = vst.msk [vmem:[#allocation2 + $0x16] sm:$0x3] %vm1214_vm2, %v1209_v41 }
0x18d6   :  { %v1572_v49 = vpop.permute.xlu1 %1571 }
0x18d7   :  { %1578 = vst.msk [vmem:[#allocation2 + $0x1d] sm:$0x7] %vm1577_vm3, %v1572_v49 }
0x18da   :  { %v1935_v9 = vpop.permute.xlu1 %1934  ;;  %v3034_v40 = vld [vmem:[#allocation2 + $0x10] sm:$0xff] }
0x18db   :  { %1941 = vst.msk [vmem:[#allocation2 + $0x24] sm:$0xf] %vm1940_vm4, %v1935_v9  ;;  %4397 = vmatprep.mubr.msk.f32.mxu0 %vm183_vm9, %v3034_v40 }
0x18de   :  { %v3022_v34 = vpop.permute.xlu0 %3021  ;;  %v2298_v50 = vpop.permute.xlu1 %2297  ;;  %v3035_v13 = vld [vmem:[#allocation2 + $0x18] sm:$0xff] }
0x18df   :  { %3028 = vst.msk [vmem:[#allocation2 + $0x31] sm:$0x80] %vm3027_vm5, %v3022_v34  ;;  %4398 = vmatmul.mubr.msk.f32.gmra.mrb[16].mxu0 %vm183_vm9, %v3035_v13 }
0x18e0   :  { %2304 = vst.msk [vmem:[#allocation2 + $0x2b] sm:$0x1f] %vm2303_vm6, %v2298_v50 }
0x18e2   :  { %v2661_v17 = vpop.permute.xlu1 %2660  ;;  %v3036_v24 = vld [vmem:[#allocation2 + $0x20] sm:$0xff] }
0x18e3   :  { %2667 = vst.msk [vmem:[#allocation2 + $0x32] sm:$0x3f] %vm2666_vm7, %v2661_v17  ;;  %4400 = vmatprep.mubr.msk.f32.mxu0 %vm183_vm9, %v3036_v24 }
0x18e6   :  { %v3024_v18 = vpop.permute.xlu1 %3023 }
0x18e7   :  { %v3037_v22 = vld [vmem:[#allocation2 + $0x28] sm:$0xff]  ;;  %3030 = vst.msk [vmem:[#allocation2 + $0x39] sm:$0x7f] %vm3029_vm8, %v3024_v18 }
0x18e8   :  { %4401 = vmatmul.mubr.msk.f32.gmra.mrb[18].mxu0 %vm183_vm9, %v3037_v22 }
0x18ea   :  { %v3038_v58 = vld [vmem:[#allocation2 + $0x30] sm:$0xff] }
0x18eb   :  { %4403 = vmatprep.mubr.msk.f32.mxu0 %vm183_vm9, %v3038_v58 }
0x18ee   :  { %v3039_v15 = vld [vmem:[#allocation2 + $0x38] sm:$0xff] }
0x18ef   :  { %4404 = vmatmul.mubr.msk.f32.gmra.mrb[20].mxu0 %vm183_vm9, %v3039_v15 }
0x18f0   :  { %4436 = vmatprep.mubr.msk.f32.mxu0 %vm5201_vm1, %v5202_v4 }
0x1943   :  { %v3380_v52 = vpop.permute.xlu0 %3379 }
0x1944   :  { %4437 = vmatmul.mubr.msk.f32.vlgmr.msra.gmra.mrb[22].mxu0 %vm183_vm9, %v3380_v52 }
0x1945   :  { %4591 = vmatpush3.bf16.msra.mxu0 %v6255_v25  ;;  %4458 = vmatprep.mubr.msk.f32.mxu0 %vm5201_vm1, %v5202_v4 }
0x1946   :  { %4592 = vmatprep.subr.bf16.mxu0 %v5200_v0 }
0x1949   :  { %4594 = vmatpush3.bf16.msra.mxu0 %v6266_v16 }
0x194a   :  { %4601 = vmatprep.subr.bf16.mxu0 %v5200_v0 }
0x19b2   :  { %v4399_v31 = vpop.f32.mrb[16].mxu0 }
0x19b3   :  { %v3150_v56 = vpop.f32.mrb[17].mxu0 }
0x19b4   :  { %v3151_v3 = vadd.f32 %v6291_v54, %v3150_v56 }
0x19bb   :  { %v6454_v42 = vpop.f32.mrb[18].mxu0 }
0x19bc   :  { %v6456_v62 = vpop.f32.mrb[19].mxu0  ;;  %v3166_v56 = vadd.f32 %v6454_v42, %v6291_v54 }
0x19bd   :  { %v3161_v57 = vadd.f32 %v6291_v54, %v6456_v62 }
0x19c2   :  { %v6458_v36 = vpop.f32.mrb[20].mxu0 }
0x19c3   :  { %v6460_v14 = vpop.f32.mrb[21].mxu0 }
0x1a17   :  { %v3449_v61 = vpop.f32.mrb[22].mxu0 }
0x1a18   :  { %v3453_v38 = vadd.f32 %v3449_v61, %v3151_v3  ;;  %v4438_v51 = vpop.f32.mrb[23].mxu0 }
0x1a1a   :  { %5152 = vtanh.f32 %v3453_v38  ;;  %v4162_v60 = vmul.f32 -1.442695, %v3453_v38 }
0x1a1c   :  { %5154 = vpow2.f32 %v4162_v60 }
0x1a24   :  { %v5153_v48 = vpop.eup %5152 }
0x1a25   :  { %3463 = vrot.lane.b32.xlu1 %v5153_v48, %s5203_s0 }
0x1a26   :  { %v5155_v37 = vpop.eup %5154 }
0x1a27   :  { %v3457_v26 = vadd.f32 1.0, %v5155_v37 }
0x1a29   :  { %5156 = vrcp.f32 %v3457_v26 }
0x1a33   :  { %v5157_v5 = vpop.eup %5156 }
0x1a34   :  { %v3461_v12 = vmul.f32 %v5157_v5, %v6407_v28  ;;  %v3156_v28 = vadd.f32 %v4399_v31, %v6291_v54 }
0x1a97   :  { %v3464_v23 = vpop.permute.xlu1 %3463 }
0x1a98   :  { %v3466_v2 = vmul.f32 %v5157_v5, %v3464_v23 }
0x1a9a   :  { %3468 = vrot.lane.b32.xlu0 %v3466_v2, %s5204_s3 }
0x1b0c   :  { %v3469_v55 = vpop.permute.xlu0 %3468 }
0x1b0d   :  { %v3471_v44 = vadd.f32 %v3469_v55, %v3461_v12 }
0x1b0f   :  { %5158 = vtanh.f32 %v3471_v44 }
0x1b19   :  { %v5159_v47 = vpop.eup %5158 }
0x1b1a   :  { %3474 = vrot.lane.b32.xlu1 %v5159_v47, %s5203_s0 }
0x1b8c   :  { %v3475_v8 = vpop.permute.xlu1 %3474 }
0x1b8d   :  { %v3477_v10 = vmul.f32 %v5157_v5, %v3475_v8 }
0x1b8f   :  { %3479 = vrot.lane.b32.xlu0 %v3477_v10, %s5204_s3 }
0x1c01   :  { %v3480_v11 = vpop.permute.xlu0 %3479 }
0x1c02   :  { %4448 = vmatmul.mubr.msk.f32.vlgmr.msra.gmra.mrb[14].mxu1 %vm183_vm9, %v3480_v11 }
0x1c03   :  { %4597 = vmatpush3.bf16.msra.mxu1 %v6255_v25  ;;  %4469 = vmatprep.mubr.msk.f32.mxu1 %vm5201_vm1, %v5202_v4 }
0x1c04   :  { %4598 = vmatprep.subr.bf16.mxu1 %v5200_v0 }
0x1c07   :  { %4600 = vmatpush3.bf16.msra.mxu1 %v6266_v16 }
0x1c08   :  { %4607 = vmatprep.subr.bf16.mxu1 %v5200_v0 }
0x1cd5   :  { %v3549_v21 = vpop.f32.mrb[14].mxu1 }
0x1cd6   :  { %v3553_v6 = vadd.f32 %v3549_v21, %v3156_v28  ;;  %v4449_v43 = vpop.f32.mrb[15].mxu1 }
0x1cd8   :  { %5160 = vtanh.f32 %v3553_v6  ;;  %v4164_v63 = vmul.f32 -1.442695, %v3553_v6 }
0x1cda   :  { %5162 = vpow2.f32 %v4164_v63 }
0x1ce2   :  { %v5161_v30 = vpop.eup %5160 }
0x1ce3   :  { %3563 = vrot.lane.b32.xlu1 %v5161_v30, %s5203_s0 }
0x1ce4   :  { %v5163_v33 = vpop.eup %5162 }
0x1ce5   :  { %v3557_v39 = vadd.f32 1.0, %v5163_v33 }
0x1ce7   :  { %5164 = vrcp.f32 %v3557_v39 }
0x1cf1   :  { %v5165_v35 = vpop.eup %5164 }
0x1cf2   :  { %v3561_v20 = vmul.f32 %v5165_v35, %v3471_v44  ;;  %v3171_v44 = vadd.f32 %v6291_v54, %v6460_v14 }
0x1d55   :  { %v3564_v27 = vpop.permute.xlu1 %3563 }
0x1d56   :  { %v3566_v1 = vmul.f32 %v5165_v35, %v3564_v27 }
0x1d58   :  { %3568 = vrot.lane.b32.xlu0 %v3566_v1, %s5204_s3 }
0x1dca   :  { %v3569_v19 = vpop.permute.xlu0 %3568 }
0x1dcb   :  { %v3571_v59 = vadd.f32 %v3569_v19, %v3561_v20  ;;  %v3176_v20 = vadd.f32 %v6458_v36, %v6291_v54  ;;  %v3978_v36 = vld [vmem:[%s6548_s7] sm:$0xff] }
0x1dcd   :  { %5166 = vtanh.f32 %v3571_v59 }
0x1dd7   :  { %v5167_v45 = vpop.eup %5166 }
0x1dd8   :  { %3574 = vrot.lane.b32.xlu1 %v5167_v45, %s5203_s0 }
0x1e4a   :  { %v3575_v46 = vpop.permute.xlu1 %3574 }
0x1e4b   :  { %v3577_v7 = vmul.f32 %v5165_v35, %v3575_v46 }
0x1e4d   :  { %3579 = vrot.lane.b32.xlu0 %v3577_v7, %s5204_s3 }
0x1ebf   :  { %v3580_v29 = vpop.permute.xlu0 %3579 }
0x1ec0   :  { %4459 = vmatmul.mubr.msk.f32.vlgmr.msra.gmra.mrb[24].mxu0 %vm183_vm9, %v3580_v29 }
0x1ec1   :  { %4603 = vmatpush3.bf16.msra.mxu0 %v6255_v25  ;;  %4480 = vmatprep.mubr.msk.f32.mxu0 %vm5201_vm1, %v5202_v4 }
0x1ec2   :  { %4604 = vmatprep.subr.bf16.mxu0 %v5200_v0 }
0x1ec5   :  { %4606 = vmatpush3.bf16.msra.mxu0 %v6266_v16 }
0x1ec6   :  { %4613 = vmatprep.subr.bf16.mxu0 %v5200_v0 }
0x1f93   :  { %v3649_v53 = vpop.f32.mrb[24].mxu0 }
0x1f94   :  { %v3653_v32 = vadd.f32 %v3649_v53, %v3161_v57  ;;  %v4460_v41 = vpop.f32.mrb[25].mxu0 }
0x1f96   :  { %5168 = vtanh.f32 %v3653_v32  ;;  %v4166_v9 = vmul.f32 -1.442695, %v3653_v32 }
0x1f98   :  { %5170 = vpow2.f32 %v4166_v9 }
0x1fa0   :  { %v5169_v49 = vpop.eup %5168 }
0x1fa1   :  { %3663 = vrot.lane.b32.xlu1 %v5169_v49, %s5203_s0 }
0x1fa2   :  { %v5171_v40 = vpop.eup %5170 }
0x1fa3   :  { %v3657_v34 = vadd.f32 1.0, %v5171_v40  ;;  %v3979_v40 = vld [vmem:[%s6548_s7 + $0x8] sm:$0xff] }
0x1fa5   :  { %5172 = vrcp.f32 %v3657_v34  ;;  %v3980_v34 = vld [vmem:[%s6548_s7 + $0x10] sm:$0xff] }
0x1faf   :  { %v5173_v50 = vpop.eup %5172 }
0x1fb0   :  { %v3661_v24 = vmul.f32 %v5173_v50, %v3571_v59 }
0x2013   :  { %v3664_v13 = vpop.permute.xlu1 %3663 }
0x2014   :  { %v3666_v17 = vmul.f32 %v5173_v50, %v3664_v13  ;;  %v3981_v13 = vld [vmem:[%s6548_s7 + $0x18] sm:$0xff] }
0x2016   :  { %3668 = vrot.lane.b32.xlu0 %v3666_v17, %s5204_s3  ;;  %v4617_v17 = vpack.c.bf16 %v3981_v13, %v3980_v34 }
0x2088   :  { %v3669_v18 = vpop.permute.xlu0 %3668 }
0x2089   :  { %v3671_v22 = vadd.f32 %v3669_v18, %v3661_v24 }
0x208b   :  { %5174 = vtanh.f32 %v3671_v22 }
0x2095   :  { %v5175_v58 = vpop.eup %5174 }
0x2096   :  { %3674 = vrot.lane.b32.xlu1 %v5175_v58, %s5203_s0 }
0x2108   :  { %v3675_v15 = vpop.permute.xlu1 %3674 }
0x2109   :  { %v3677_v52 = vmul.f32 %v5173_v50, %v3675_v15  ;;  %v4614_v50 = vpack.c.bf16 %v3979_v40, %v3978_v36  ;;  %v4173_v15 = vld [vmem:[%s6549_s8] ss:$0 sm:$0xff] }
0x210b   :  { %3679 = vrot.lane.b32.xlu0 %v3677_v52, %s5204_s3 }
0x217d   :  { %v3680_v31 = vpop.permute.xlu0 %3679 }
0x217e   :  { %4470 = vmatmul.mubr.msk.f32.vlgmr.msra.gmra.mrb[16].mxu1 %vm183_vm9, %v3680_v31 }
0x217f   :  { %4609 = vmatpush3.bf16.msra.mxu1 %v6255_v25  ;;  %4491 = vmatprep.mubr.msk.f32.mxu1 %vm5201_vm1, %v5202_v4 }
0x2180   :  { %4610 = vmatprep.subr.bf16.mxu1 %v5200_v0 }
0x2183   :  { %4612 = vmatpush3.bf16.msra.mxu1 %v6266_v16 }
0x2251   :  { %v3749_v62 = vpop.f32.mrb[16].mxu1 }
0x2252   :  { %v3753_v3 = vadd.f32 %v3749_v62, %v3166_v56  ;;  %v4471_v61 = vpop.f32.mrb[17].mxu1 }
0x2254   :  { %5176 = vtanh.f32 %v3753_v3  ;;  %v4168_v51 = vmul.f32 -1.442695, %v3753_v3 }
0x2256   :  { %5178 = vpow2.f32 %v4168_v51 }
0x225e   :  { %v5177_v38 = vpop.eup %5176 }
0x225f   :  { %3763 = vrot.lane.b32.xlu1 %v5177_v38, %s5203_s0 }
0x2260   :  { %v5179_v25 = vpop.eup %5178 }
0x2261   :  { %v3757_v48 = vadd.f32 1.0, %v5179_v25 }
0x2263   :  { %5180 = vrcp.f32 %v3757_v48 }
0x226d   :  { %v5181_v60 = vpop.eup %5180 }
0x226e   :  { %v3761_v16 = vmul.f32 %v5181_v60, %v3671_v22 }
0x22d1   :  { %v3764_v37 = vpop.permute.xlu1 %3763 }
0x22d2   :  { %v3766_v26 = vmul.f32 %v5181_v60, %v3764_v37 }
0x22d4   :  { %3768 = vrot.lane.b32.xlu0 %v3766_v26, %s5204_s3 }
0x2346   :  { %v3769_v5 = vpop.permute.xlu0 %3768 }
0x2347   :  { %v3771_v42 = vadd.f32 %v3769_v5, %v3761_v16 }
0x2349   :  { %5182 = vtanh.f32 %v3771_v42 }
0x2353   :  { %v5183_v23 = vpop.eup %5182 }
0x2354   :  { %3774 = vrot.lane.b32.xlu1 %v5183_v23, %s5203_s0 }
0x23c6   :  { %v3775_v2 = vpop.permute.xlu1 %3774 }
0x23c7   :  { %v3777_v12 = vmul.f32 %v5181_v60, %v3775_v2 }
0x23c9   :  { %3779 = vrot.lane.b32.xlu0 %v3777_v12, %s5204_s3 }
0x243b   :  { %v3780_v55 = vpop.permute.xlu0 %3779 }
0x243c   :  { %4481 = vmatmul.mubr.msk.f32.vlgmr.msra.gmra.mrb[26].mxu0 %vm183_vm9, %v3780_v55 }
0x243d   :  { %4502 = vmatprep.mubr.msk.f32.mxu0 %vm5201_vm1, %v5202_v4  ;;  %4615 = vmatpush3.bf16.msra.mxu0 %v4614_v50 }
0x243e   :  { %4616 = vmatprep.subr.bf16.mxu0 %v5200_v0 }
0x2441   :  { %4618 = vmatpush3.bf16.msra.mxu0 %v4617_v17 }
0x250f   :  { %v3849_v47 = vpop.f32.mrb[26].mxu0 }
0x2510   :  { %v3853_v8 = vadd.f32 %v3849_v47, %v3171_v44  ;;  %v4482_v10 = vpop.f32.mrb[27].mxu0 }
0x2512   :  { %5184 = vtanh.f32 %v3853_v8  ;;  %v4170_v28 = vmul.f32 -1.442695, %v3853_v8 }
0x2514   :  { %5186 = vpow2.f32 %v4170_v28 }
0x251c   :  { %v5185_v11 = vpop.eup %5184 }
0x251d   :  { %3863 = vrot.lane.b32.xlu1 %v5185_v11, %s5203_s0 }
0x251e   :  { %v5187_v21 = vpop.eup %5186 }
0x251f   :  { %v3857_v6 = vadd.f32 1.0, %v5187_v21 }
0x2521   :  { %5188 = vrcp.f32 %v3857_v6 }
0x252b   :  { %v5189_v43 = vpop.eup %5188 }
0x252c   :  { %v3861_v4 = vmul.f32 %v5189_v43, %v3771_v42 }
0x258f   :  { %v3864_v30 = vpop.permute.xlu1 %3863 }
0x2590   :  { %v3866_v63 = vmul.f32 %v5189_v43, %v3864_v30 }
0x2592   :  { %3868 = vrot.lane.b32.xlu0 %v3866_v63, %s5204_s3 }
0x2604   :  { %v3869_v33 = vpop.permute.xlu0 %3868 }
0x2605   :  { %v3871_v14 = vadd.f32 %v3869_v33, %v3861_v4 }
0x2607   :  { %5190 = vtanh.f32 %v3871_v14 }
0x2611   :  { %v5191_v39 = vpop.eup %5190 }
0x2612   :  { %3874 = vrot.lane.b32.xlu1 %v5191_v39, %s5203_s0 }
0x2684   :  { %v3875_v35 = vpop.permute.xlu1 %3874 }
0x2685   :  { %v3877_v27 = vmul.f32 %v5189_v43, %v3875_v35 }
0x2687   :  { %3879 = vrot.lane.b32.xlu0 %v3877_v27, %s5204_s3 }
0x26f9   :  { %v3880_v1 = vpop.permute.xlu0 %3879 }
0x26fa   :  { %4492 = vmatmul.mubr.msk.f32.vlgmr.msra.gmra.mrb[18].mxu1 %vm183_vm9, %v3880_v1 }
0x27cd   :  { %v3949_v19 = vpop.f32.mrb[18].mxu1 }
0x27ce   :  { %v3953_v59 = vadd.f32 %v3949_v19, %v3176_v20  ;;  %v4493_v45 = vpop.f32.mrb[19].mxu1 }
0x27d0   :  { %5192 = vtanh.f32 %v3953_v59  ;;  %v4172_v7 = vmul.f32 -1.442695, %v3953_v59 }
0x27d2   :  { %5194 = vpow2.f32 %v4172_v7 }
0x27da   :  { %v5193_v46 = vpop.eup %5192 }
0x27db   :  { %3963 = vrot.lane.b32.xlu1 %v5193_v46, %s5203_s0 }
0x27dc   :  { %v5195_v29 = vpop.eup %5194 }
0x27dd   :  { %v3957_v57 = vadd.f32 1.0, %v5195_v29 }
0x27df   :  { %5196 = vrcp.f32 %v3957_v57 }
0x27e9   :  { %v5197_v53 = vpop.eup %5196 }
0x27ea   :  { %v3961_v49 = vmul.f32 %v5197_v53, %v3871_v14 }
0x284d   :  { %v3964_v32 = vpop.permute.xlu1 %3963 }
0x284e   :  { %v3966_v41 = vmul.f32 %v5197_v53, %v3964_v32 }
0x2850   :  { %3968 = vrot.lane.b32.xlu0 %v3966_v41, %s5204_s3 }
0x28c2   :  { %v3969_v9 = vpop.permute.xlu0 %3968 }
0x28c3   :  { %v3971_v54 = vadd.f32 %v3969_v9, %v3961_v49 }
0x28c5   :  { %5198 = vtanh.f32 %v3971_v54 }
0x28cf   :  { %v5199_v24 = vpop.eup %5198 }
0x28d0   :  { %3974 = vrot.lane.b32.xlu1 %v5199_v24, %s5203_s0 }
0x2942   :  { %v3975_v18 = vpop.permute.xlu1 %3974 }
0x2943   :  { %v3977_v22 = vmul.f32 %v5197_v53, %v3975_v18 }
0x2945   :  { %3990 = vrot.lane.b32.xlu0 %v3977_v22, %s5204_s3 }
0x29b7   :  { %v3991_v58 = vpop.permute.xlu0 %3990 }
0x29b8   :  { %4503 = vmatmul.mubr.msk.f32.vlgmr.msra.gmra.mrb[28].mxu0 %vm183_vm9, %v3991_v58 }
0x2a8b   :  { %v4060_v52 = vpop.f32.mrb[28].mxu0 }
0x2a8c   :  { %v4061_v31 = vadd.f32 %v4173_v15, %v4060_v52  ;;  %v4504_v56 = vpop.f32.mrb[29].mxu0 }
0x2a8e   :  { %4064 = vst [vmem:[%s6550_s9] sm:$0xff] %v4061_v31 }

</bundles_post_ra>
